<compile_context>
chip_gen: v7x
topology: tpu7x:2x2x1
jax: 0.10.0
libtpu: 0.0.40
codegen_flags: <defaults>
</compile_context>

<pallas_src>
import functools

import jax
import jax.numpy as jnp
import numpy as np
from jax import lax
from jax.experimental import pallas as pl
from jax.experimental.pallas import tpu as pltpu


# --------------------------------- fused kernel ---------------------------------
def _fused_forward_kernel(x_ref, t1_ref, b1_ref, t2_ref, b2_ref,
                          fc1w_ref, fc1b_ref, fc2w_ref, fc2b_ref,
                          o_ref, pad1_ref, pad2_ref,
                          *, B, H, W, Cin, C1, C2):
    f32 = jnp.float32
    Hp, Wp = H // 2, W // 2

    # ---- conv1: 3x3, pad=1, bias, relu  (single row-Toeplitz matmul) ----
    pad1_ref[...] = jnp.zeros_like(pad1_ref)                      # zero H halo rows
    pad1_ref[:, 1:H + 1, :] = x_ref[...].astype(f32)
    xp1 = pad1_ref[...]                                           # (B, H+2, W*Cin)
    r1 = jnp.concatenate(
        [xp1[:, kh:kh + H, :].reshape(B * H, W * Cin) for kh in range(3)],
        axis=-1)                                                  # (B*H, 3*W*Cin)
    y1 = jnp.dot(r1, t1_ref[...], preferred_element_type=f32) + b1_ref[...]
    y1 = jnp.maximum(y1, 0.0)                                     # (B*H, W*C1)

    # ---- conv2: 3x3, pad=1, bias, relu ----
    pad2_ref[...] = jnp.zeros_like(pad2_ref)
    pad2_ref[:, 1:H + 1, :] = y1.reshape(B, H, W * C1)
    xp2 = pad2_ref[...]                                           # (B, H+2, W*C1)
    r2 = jnp.concatenate(
        [xp2[:, kh:kh + H, :].reshape(B * H, W * C1) for kh in range(3)],
        axis=-1)                                                  # (B*H, 3*W*C1)
    y2 = jnp.dot(r2, t2_ref[...], preferred_element_type=f32) + b2_ref[...]
    y2 = jnp.maximum(y2, 0.0)                                     # (B*H, W*C2)

    # ---- 2x2 max-pool (fused epilogue).  lanes = (w, c); rows = (b, h). ----
    wpool = jnp.concatenate(
        [jnp.maximum(y2[:, (2 * wp) * C2:(2 * wp + 1) * C2],
                     y2[:, (2 * wp + 1) * C2:(2 * wp + 2) * C2])
         for wp in range(Wp)],
        axis=-1)                                                  # (B*H, Wp*C2)
    wp3 = wpool.reshape(B * Hp, 2, Wp * C2)
    hpool = jnp.maximum(wp3[:, 0, :], wp3[:, 1, :])               # (B*Hp, Wp*C2)

    # ---- flatten to (B, Hp*Wp*C2) in (h, w, c) order (fc1 weights pre-permuted) ----
    t3 = hpool.reshape(B, Hp, Wp * C2)
    flat = jnp.concatenate([t3[:, i, :] for i in range(Hp)], axis=-1)  # (B, Hp*Wp*C2)

    # ---- fc1 + relu, fc2 ----
    h1 = jnp.dot(flat, fc1w_ref[...], preferred_element_type=f32) + fc1b_ref[...]
    h1 = jnp.maximum(h1, 0.0)
    out = jnp.dot(h1, fc2w_ref[...], preferred_element_type=f32) + fc2b_ref[...]
    o_ref[...] = out.astype(o_ref.dtype)


# --------------------------------- wrapper --------------------------------------
def _full_block_spec(arr):
    nd = arr.ndim
    return pl.BlockSpec(arr.shape, lambda i, _nd=nd: (0,) * _nd)


def very_simple_model_forward(x_nchw, params):
    B, Cin, H, W = x_nchw.shape
    C1 = params["b1r"].shape[-1] // W
    C2 = params["b2r"].shape[-1] // W
    num_classes = params["fc2_w"].shape[-1]

    # NCHW -> rows=(b, h), lanes=(w, c).  For Cin == 1 this is a free reshape.
    x_rows = jnp.transpose(x_nchw, (0, 2, 3, 1)).reshape(B, H, W * Cin)

    args = (x_rows, params["t1"], params["b1r"], params["t2"], params["b2r"],
            params["fc1_w"], params["fc1_b"], params["fc2_w"], params["fc2_b"])

    return pl.pallas_call(
        functools.partial(_fused_forward_kernel,
                          B=B, H=H, W=W, Cin=Cin, C1=C1, C2=C2),
        out_shape=jax.ShapeDtypeStruct((B, num_classes), x_nchw.dtype),
        grid=(1,),
        in_specs=[_full_block_spec(a) for a in args],
        out_specs=pl.BlockSpec((B, num_classes), lambda i: (0, 0)),
        scratch_shapes=[
            pltpu.VMEM((B, H + 2, W * Cin), jnp.float32),   # padded conv1 input
            pltpu.VMEM((B, H + 2, W * C1), jnp.float32),    # padded conv2 input
        ],
        # Single grid step (whole batch fused); semantics value is irrelevant here.
        compiler_params=pltpu.CompilerParams(dimension_semantics=("arbitrary",)),
    )(*args)


# ----------------------------- parameter preparation -----------------------------
def _row_conv_weight(w_pt, W):
    """PyTorch (Cout, Cin, 3, 3) conv weight -> (3*W*Cin, W*Cout) row-Toeplitz matrix.

    y[(b,h), w*Cout+co] = sum_{kh,w',ci} xpad[b, h+kh, w'*Cin+ci] * T[(kh,w',ci),(w,co)]
    with T nonzero only for w' = w + kw - 1, kw in {0,1,2}.  Zero padding along W is
    implicit (out-of-range w' rows do not exist); H padding is done in-kernel.
    """
    w_np = np.asarray(w_pt, dtype=np.float32)
    Cout, Cin = w_np.shape[0], w_np.shape[1]
    T = np.zeros((3, W, Cin, W, Cout), np.float32)
    for kh in range(3):
        for kw in range(3):
            tap = w_np[:, :, kh, kw].T                      # (Cin, Cout)
            for w in range(W):
                w_src = w + kw - 1
                if 0 <= w_src < W:
                    T[kh, w_src, :, w, :] = tap
    return jnp.asarray(T.reshape(3 * W * Cin, W * Cout))


def prepare_params(w1_pt, b1, w2_pt, b2, fc1_w_pt, fc1_b, fc2_w_pt, fc2_b, *, H, W):
    C1 = w1_pt.shape[0]
    C2 = w2_pt.shape[0]
    Hp, Wp = H // 2, W // 2
    n_hidden = fc1_w_pt.shape[0]
    n_cls = fc2_w_pt.shape[0]
    # The kernel flattens the pooled map in (h, w, c) order; PyTorch's view(B, -1) on
    # NCHW flattens in (c, h, w) order -> permute fc1 weight rows once at prep time.
    fc1_w = (np.asarray(fc1_w_pt, np.float32)
             .reshape(n_hidden, C2, Hp, Wp)
             .transpose(2, 3, 1, 0)
             .reshape(Hp * Wp * C2, n_hidden))
    return {
        "t1": _row_conv_weight(w1_pt, W),
        "b1r": jnp.asarray(np.tile(np.asarray(b1, np.float32), W)).reshape(1, W * C1),
        "t2": _row_conv_weight(w2_pt, W),
        "b2r": jnp.asarray(np.tile(np.asarray(b2, np.float32), W)).reshape(1, W * C2),
        "fc1_w": jnp.asarray(fc1_w),
        "fc1_b": jnp.asarray(fc1_b, jnp.float32).reshape(1, n_hidden),
        "fc2_w": jnp.asarray(np.asarray(fc2_w_pt, np.float32).T),
        "fc2_b": jnp.asarray(fc2_b, jnp.float32).reshape(1, n_cls),
    }


# ------------------------------------- main --------------------------------------
if __name__ == "__main__":
    num_classes = 10
    B, Cin, H, W = 2, 1, 16, 16          # small version of the default (1, 32, 32)
    feat = 32 * (H // 2) * (W // 2)

    key = jax.random.PRNGKey(0)
    ks = jax.random.split(key, 9)

    # Deterministic synthetic parameters in PyTorch layouts.
    w1_pt = 0.10 * jax.random.normal(ks[0], (32, Cin, 3, 3), jnp.float32)
    b1 = 0.10 * jax.random.normal(ks[1], (32,), jnp.float32)
    w2_pt = 0.05 * jax.random.normal(ks[2], (32, 32, 3, 3), jnp.float32)
    b2 = 0.10 * jax.random.normal(ks[3], (32,), jnp.float32)
    fc1_w_pt = 0.02 * jax.random.normal(ks[4], (128, feat), jnp.float32)
    fc1_b = 0.10 * jax.random.normal(ks[5], (128,), jnp.float32)
    fc2_w_pt = 0.05 * jax.random.normal(ks[6], (num_classes, 128), jnp.float32)
    fc2_b = 0.10 * jax.random.normal(ks[7], (num_classes,), jnp.float32)

    params = prepare_params(w1_pt, b1, w2_pt, b2, fc1_w_pt, fc1_b, fc2_w_pt, fc2_b,
                            H=H, W=W)
    x_nchw = jax.random.normal(ks[8], (B, Cin, H, W), jnp.float32)

    fwd = jax.jit(very_simple_model_forward)
    out = jax.block_until_ready(fwd(x_nchw, params))
    assert out.shape == (B, num_classes)

    # Pure-JAX reference (same math) as a sanity check.
    def ref_forward(xn):
        x = jnp.transpose(xn, (0, 2, 3, 1))

        def conv(x, w_pt, b):
            w = jnp.transpose(w_pt, (2, 3, 1, 0))             # HWIO
            y = lax.conv_general_dilated(
                x, w, (1, 1), "SAME",
                dimension_numbers=("NHWC", "HWIO", "NHWC"),
                precision=lax.Precision.HIGHEST)
            return jnp.maximum(y + b, 0.0)

        x = conv(x, w1_pt, b1)
        x = conv(x, w2_pt, b2)
        Bb, Hh, Ww, Cc = x.shape
        x = x.reshape(Bb, Hh // 2, 2, Ww // 2, 2, Cc).max(axis=(2, 4))
        x = jnp.transpose(x, (0, 3, 1, 2)).reshape(Bb, -1)    # PyTorch view order
        x = jnp.maximum(
            jnp.dot(x, fc1_w_pt.T, precision=lax.Precision.HIGHEST) + fc1_b, 0.0)
        return jnp.dot(x, fc2_w_pt.T, precision=lax.Precision.HIGHEST) + fc2_b

    ref = jax.block_until_ready(ref_forward(x_nchw))
    np.testing.assert_allclose(np.asarray(out), np.asarray(ref), rtol=2e-2, atol=2e-2)

    print("KERNEL_OK")
</pallas_src>

<mosaic_0001>
module attributes {stable_mosaic.version = 11 : i64} {
  func.func @_fused_forward_kernel(%arg0: i32, %arg1: memref<2x16x16xf32, #tpu.memory_space<vmem>>, %arg2: memref<48x512xf32, #tpu.memory_space<vmem>>, %arg3: memref<1x512xf32, #tpu.memory_space<vmem>>, %arg4: memref<1536x512xf32, #tpu.memory_space<vmem>>, %arg5: memref<1x512xf32, #tpu.memory_space<vmem>>, %arg6: memref<2048x128xf32, #tpu.memory_space<vmem>>, %arg7: memref<1x128xf32, #tpu.memory_space<vmem>>, %arg8: memref<128x10xf32, #tpu.memory_space<vmem>>, %arg9: memref<1x10xf32, #tpu.memory_space<vmem>>, %arg10: memref<2x10xf32, #tpu.memory_space<vmem>>, %arg11: memref<2x18x16xf32, #tpu.memory_space<vmem>>, %arg12: memref<2x18x512xf32, #tpu.memory_space<vmem>>) attributes {dimension_semantics = [#tpu.dimension_semantics<arbitrary>], iteration_bounds = array<i64: 1>, scalar_prefetch = 0 : i64, scratch_operands = 2 : i64, tpu.core_type = #tpu.core_type<tc>, window_params = [{pipeline_mode = #tpu.pipeline_mode<synchronous>, transform_indices = @transform_0, window_bounds = array<i64: 2, 16, 16>}, {pipeline_mode = #tpu.pipeline_mode<synchronous>, transform_indices = @transform_1, window_bounds = array<i64: 48, 512>}, {pipeline_mode = #tpu.pipeline_mode<synchronous>, transform_indices = @transform_2, window_bounds = array<i64: 1, 512>}, {pipeline_mode = #tpu.pipeline_mode<synchronous>, transform_indices = @transform_3, window_bounds = array<i64: 1536, 512>}, {pipeline_mode = #tpu.pipeline_mode<synchronous>, transform_indices = @transform_4, window_bounds = array<i64: 1, 512>}, {pipeline_mode = #tpu.pipeline_mode<synchronous>, transform_indices = @transform_5, window_bounds = array<i64: 2048, 128>}, {pipeline_mode = #tpu.pipeline_mode<synchronous>, transform_indices = @transform_6, window_bounds = array<i64: 1, 128>}, {pipeline_mode = #tpu.pipeline_mode<synchronous>, transform_indices = @transform_7, window_bounds = array<i64: 128, 10>}, {pipeline_mode = #tpu.pipeline_mode<synchronous>, transform_indices = @transform_8, window_bounds = array<i64: 1, 10>}, {pipeline_mode = #tpu.pipeline_mode<synchronous>, transform_indices = @transform_9, window_bounds = array<i64: 2, 10>}]} {
    %cst = arith.constant 0.000000e+00 : f32
    %0 = vector.broadcast %cst : f32 to vector<2x18x16xf32>
    %c0 = arith.constant 0 : index
    %c0_0 = arith.constant 0 : index
    %c0_1 = arith.constant 0 : index
    %1 = vector.load %arg11[%c0, %c0_0, %c0_1] : memref<2x18x16xf32, #tpu.memory_space<vmem>>, vector<2x18x16xf32>
    tpu.vector_store %arg11[%c0, %c0_0, %c0_1], %0 {strides = array<i32>} : memref<2x18x16xf32, #tpu.memory_space<vmem>>, vector<2x18x16xf32>,
    %c0_2 = arith.constant 0 : index
    %c0_3 = arith.constant 0 : index
    %c0_4 = arith.constant 0 : index
    %2 = vector.load %arg1[%c0_2, %c0_3, %c0_4] : memref<2x16x16xf32, #tpu.memory_space<vmem>>, vector<2x16x16xf32>
    %c0_5 = arith.constant 0 : index
    %c1 = arith.constant 1 : index
    %c0_6 = arith.constant 0 : index
    %3 = vector.load %arg11[%c0_5, %c1, %c0_6] : memref<2x18x16xf32, #tpu.memory_space<vmem>>, vector<2x16x16xf32>
    tpu.vector_store %arg11[%c0_5, %c1, %c0_6], %2 {strides = array<i32>} : memref<2x18x16xf32, #tpu.memory_space<vmem>>, vector<2x16x16xf32>,
    %c0_7 = arith.constant 0 : index
    %c0_8 = arith.constant 0 : index
    %c0_9 = arith.constant 0 : index
    %4 = vector.load %arg11[%c0_7, %c0_8, %c0_9] : memref<2x18x16xf32, #tpu.memory_space<vmem>>, vector<2x18x16xf32>
    %5 = vector.extract_strided_slice %4 {offsets = [0, 0, 0], sizes = [2, 16, 16], strides = [1, 1, 1]} : vector<2x18x16xf32> to vector<2x16x16xf32>
    %6 = vector.shape_cast %5 : vector<2x16x16xf32> to vector<32x16xf32>
    %7 = vector.extract_strided_slice %4 {offsets = [0, 1, 0], sizes = [2, 16, 16], strides = [1, 1, 1]} : vector<2x18x16xf32> to vector<2x16x16xf32>
    %8 = vector.shape_cast %7 : vector<2x16x16xf32> to vector<32x16xf32>
    %9 = vector.extract_strided_slice %4 {offsets = [0, 2, 0], sizes = [2, 16, 16], strides = [1, 1, 1]} : vector<2x18x16xf32> to vector<2x16x16xf32>
    %10 = vector.shape_cast %9 : vector<2x16x16xf32> to vector<32x16xf32>
    %11 = tpu.concatenate %6, %8, %10 in 1 : vector<32x16xf32>, vector<32x16xf32>, vector<32x16xf32> -> vector<32x48xf32>
    %c0_10 = arith.constant 0 : index
    %c0_11 = arith.constant 0 : index
    %12 = vector.load %arg2[%c0_10, %c0_11] : memref<48x512xf32, #tpu.memory_space<vmem>>, vector<48x512xf32>
    %cst_12 = arith.constant dense<0.000000e+00> : vector<32x512xf32>
    %13 = tpu.matmul %11, %12, %cst_12 {dimension_numbers = #tpu.dot_dimension_numbers<[1], [0], [0], [1], [0, 0, 1, 1], [], []>} : vector<32x48xf32>, vector<48x512xf32>, vector<32x512xf32> -> vector<32x512xf32>
    %c0_13 = arith.constant 0 : index
    %c0_14 = arith.constant 0 : index
    %14 = vector.load %arg3[%c0_13, %c0_14] : memref<1x512xf32, #tpu.memory_space<vmem>>, vector<1x512xf32>
    %15 = vector.broadcast %14 : vector<1x512xf32> to vector<32x512xf32>
    %16 = arith.addf %13, %15 : vector<32x512xf32>
    %cst_15 = arith.constant 0.000000e+00 : f32
    %17 = vector.broadcast %cst_15 : f32 to vector<32x512xf32>
    %18 = arith.maximumf %16, %17 : vector<32x512xf32>
    %cst_16 = arith.constant 0.000000e+00 : f32
    %19 = vector.broadcast %cst_16 : f32 to vector<2x18x512xf32>
    %c0_17 = arith.constant 0 : index
    %c0_18 = arith.constant 0 : index
    %c0_19 = arith.constant 0 : index
    %20 = vector.load %arg12[%c0_17, %c0_18, %c0_19] : memref<2x18x512xf32, #tpu.memory_space<vmem>>, vector<2x18x512xf32>
    tpu.vector_store %arg12[%c0_17, %c0_18, %c0_19], %19 {strides = array<i32>} : memref<2x18x512xf32, #tpu.memory_space<vmem>>, vector<2x18x512xf32>,
    %21 = vector.shape_cast %18 : vector<32x512xf32> to vector<2x16x512xf32>
    %c0_20 = arith.constant 0 : index
    %c1_21 = arith.constant 1 : index
    %c0_22 = arith.constant 0 : index
    %22 = vector.load %arg12[%c0_20, %c1_21, %c0_22] : memref<2x18x512xf32, #tpu.memory_space<vmem>>, vector<2x16x512xf32>
    tpu.vector_store %arg12[%c0_20, %c1_21, %c0_22], %21 {strides = array<i32>} : memref<2x18x512xf32, #tpu.memory_space<vmem>>, vector<2x16x512xf32>,
    %c0_23 = arith.constant 0 : index
    %c0_24 = arith.constant 0 : index
    %c0_25 = arith.constant 0 : index
    %23 = vector.load %arg12[%c0_23, %c0_24, %c0_25] : memref<2x18x512xf32, #tpu.memory_space<vmem>>, vector<2x18x512xf32>
    %24 = vector.extract_strided_slice %23 {offsets = [0, 0, 0], sizes = [2, 16, 512], strides = [1, 1, 1]} : vector<2x18x512xf32> to vector<2x16x512xf32>
    %25 = vector.shape_cast %24 : vector<2x16x512xf32> to vector<32x512xf32>
    %26 = vector.extract_strided_slice %23 {offsets = [0, 1, 0], sizes = [2, 16, 512], strides = [1, 1, 1]} : vector<2x18x512xf32> to vector<2x16x512xf32>
    %27 = vector.shape_cast %26 : vector<2x16x512xf32> to vector<32x512xf32>
    %28 = vector.extract_strided_slice %23 {offsets = [0, 2, 0], sizes = [2, 16, 512], strides = [1, 1, 1]} : vector<2x18x512xf32> to vector<2x16x512xf32>
    %29 = vector.shape_cast %28 : vector<2x16x512xf32> to vector<32x512xf32>
    %30 = tpu.concatenate %25, %27, %29 in 1 : vector<32x512xf32>, vector<32x512xf32>, vector<32x512xf32> -> vector<32x1536xf32>
    %c0_26 = arith.constant 0 : index
    %c0_27 = arith.constant 0 : index
    %31 = vector.load %arg4[%c0_26, %c0_27] : memref<1536x512xf32, #tpu.memory_space<vmem>>, vector<1536x512xf32>
    %cst_28 = arith.constant dense<0.000000e+00> : vector<32x512xf32>
    %32 = tpu.matmul %30, %31, %cst_28 {dimension_numbers = #tpu.dot_dimension_numbers<[1], [0], [0], [1], [0, 0, 1, 1], [], []>} : vector<32x1536xf32>, vector<1536x512xf32>, vector<32x512xf32> -> vector<32x512xf32>
    %c0_29 = arith.constant 0 : index
    %c0_30 = arith.constant 0 : index
    %33 = vector.load %arg5[%c0_29, %c0_30] : memref<1x512xf32, #tpu.memory_space<vmem>>, vector<1x512xf32>
    %34 = vector.broadcast %33 : vector<1x512xf32> to vector<32x512xf32>
    %35 = arith.addf %32, %34 : vector<32x512xf32>
    %cst_31 = arith.constant 0.000000e+00 : f32
    %36 = vector.broadcast %cst_31 : f32 to vector<32x512xf32>
    %37 = arith.maximumf %35, %36 : vector<32x512xf32>
    %38 = vector.extract_strided_slice %37 {offsets = [0, 0], sizes = [32, 32], strides = [1, 1]} : vector<32x512xf32> to vector<32x32xf32>
    %39 = vector.extract_strided_slice %37 {offsets = [0, 32], sizes = [32, 32], strides = [1, 1]} : vector<32x512xf32> to vector<32x32xf32>
    %40 = arith.maximumf %38, %39 : vector<32x32xf32>
    %41 = vector.extract_strided_slice %37 {offsets = [0, 64], sizes = [32, 32], strides = [1, 1]} : vector<32x512xf32> to vector<32x32xf32>
    %42 = vector.extract_strided_slice %37 {offsets = [0, 96], sizes = [32, 32], strides = [1, 1]} : vector<32x512xf32> to vector<32x32xf32>
    %43 = arith.maximumf %41, %42 : vector<32x32xf32>
    %44 = vector.extract_strided_slice %37 {offsets = [0, 128], sizes = [32, 32], strides = [1, 1]} : vector<32x512xf32> to vector<32x32xf32>
    %45 = vector.extract_strided_slice %37 {offsets = [0, 160], sizes = [32, 32], strides = [1, 1]} : vector<32x512xf32> to vector<32x32xf32>
    %46 = arith.maximumf %44, %45 : vector<32x32xf32>
    %47 = vector.extract_strided_slice %37 {offsets = [0, 192], sizes = [32, 32], strides = [1, 1]} : vector<32x512xf32> to vector<32x32xf32>
    %48 = vector.extract_strided_slice %37 {offsets = [0, 224], sizes = [32, 32], strides = [1, 1]} : vector<32x512xf32> to vector<32x32xf32>
    %49 = arith.maximumf %47, %48 : vector<32x32xf32>
    %50 = vector.extract_strided_slice %37 {offsets = [0, 256], sizes = [32, 32], strides = [1, 1]} : vector<32x512xf32> to vector<32x32xf32>
    %51 = vector.extract_strided_slice %37 {offsets = [0, 288], sizes = [32, 32], strides = [1, 1]} : vector<32x512xf32> to vector<32x32xf32>
    %52 = arith.maximumf %50, %51 : vector<32x32xf32>
    %53 = vector.extract_strided_slice %37 {offsets = [0, 320], sizes = [32, 32], strides = [1, 1]} : vector<32x512xf32> to vector<32x32xf32>
    %54 = vector.extract_strided_slice %37 {offsets = [0, 352], sizes = [32, 32], strides = [1, 1]} : vector<32x512xf32> to vector<32x32xf32>
    %55 = arith.maximumf %53, %54 : vector<32x32xf32>
    %56 = vector.extract_strided_slice %37 {offsets = [0, 384], sizes = [32, 32], strides = [1, 1]} : vector<32x512xf32> to vector<32x32xf32>
    %57 = vector.extract_strided_slice %37 {offsets = [0, 416], sizes = [32, 32], strides = [1, 1]} : vector<32x512xf32> to vector<32x32xf32>
    %58 = arith.maximumf %56, %57 : vector<32x32xf32>
    %59 = vector.extract_strided_slice %37 {offsets = [0, 448], sizes = [32, 32], strides = [1, 1]} : vector<32x512xf32> to vector<32x32xf32>
    %60 = vector.extract_strided_slice %37 {offsets = [0, 480], sizes = [32, 32], strides = [1, 1]} : vector<32x512xf32> to vector<32x32xf32>
    %61 = arith.maximumf %59, %60 : vector<32x32xf32>
    %62 = tpu.concatenate %40, %43, %46, %49, %52, %55, %58, %61 in 1 : vector<32x32xf32>, vector<32x32xf32>, vector<32x32xf32>, vector<32x32xf32>, vector<32x32xf32>, vector<32x32xf32>, vector<32x32xf32>, vector<32x32xf32> -> vector<32x256xf32>
    %63 = vector.shape_cast %62 : vector<32x256xf32> to vector<16x2x256xf32>
    %64 = vector.extract_strided_slice %63 {offsets = [0, 0, 0], sizes = [16, 1, 256], strides = [1, 1, 1]} : vector<16x2x256xf32> to vector<16x1x256xf32>
    %65 = vector.shape_cast %64 : vector<16x1x256xf32> to vector<16x256xf32>
    %66 = vector.extract_strided_slice %63 {offsets = [0, 1, 0], sizes = [16, 1, 256], strides = [1, 1, 1]} : vector<16x2x256xf32> to vector<16x1x256xf32>
    %67 = vector.shape_cast %66 : vector<16x1x256xf32> to vector<16x256xf32>
    %68 = arith.maximumf %65, %67 : vector<16x256xf32>
    %69 = vector.shape_cast %68 : vector<16x256xf32> to vector<2x8x256xf32>
    %70 = vector.extract_strided_slice %69 {offsets = [0, 0, 0], sizes = [2, 1, 256], strides = [1, 1, 1]} : vector<2x8x256xf32> to vector<2x1x256xf32>
    %71 = vector.shape_cast %70 : vector<2x1x256xf32> to vector<2x256xf32>
    %72 = vector.extract_strided_slice %69 {offsets = [0, 1, 0], sizes = [2, 1, 256], strides = [1, 1, 1]} : vector<2x8x256xf32> to vector<2x1x256xf32>
    %73 = vector.shape_cast %72 : vector<2x1x256xf32> to vector<2x256xf32>
    %74 = vector.extract_strided_slice %69 {offsets = [0, 2, 0], sizes = [2, 1, 256], strides = [1, 1, 1]} : vector<2x8x256xf32> to vector<2x1x256xf32>
    %75 = vector.shape_cast %74 : vector<2x1x256xf32> to vector<2x256xf32>
    %76 = vector.extract_strided_slice %69 {offsets = [0, 3, 0], sizes = [2, 1, 256], strides = [1, 1, 1]} : vector<2x8x256xf32> to vector<2x1x256xf32>
    %77 = vector.shape_cast %76 : vector<2x1x256xf32> to vector<2x256xf32>
    %78 = vector.extract_strided_slice %69 {offsets = [0, 4, 0], sizes = [2, 1, 256], strides = [1, 1, 1]} : vector<2x8x256xf32> to vector<2x1x256xf32>
    %79 = vector.shape_cast %78 : vector<2x1x256xf32> to vector<2x256xf32>
    %80 = vector.extract_strided_slice %69 {offsets = [0, 5, 0], sizes = [2, 1, 256], strides = [1, 1, 1]} : vector<2x8x256xf32> to vector<2x1x256xf32>
    %81 = vector.shape_cast %80 : vector<2x1x256xf32> to vector<2x256xf32>
    %82 = vector.extract_strided_slice %69 {offsets = [0, 6, 0], sizes = [2, 1, 256], strides = [1, 1, 1]} : vector<2x8x256xf32> to vector<2x1x256xf32>
    %83 = vector.shape_cast %82 : vector<2x1x256xf32> to vector<2x256xf32>
    %84 = vector.extract_strided_slice %69 {offsets = [0, 7, 0], sizes = [2, 1, 256], strides = [1, 1, 1]} : vector<2x8x256xf32> to vector<2x1x256xf32>
    %85 = vector.shape_cast %84 : vector<2x1x256xf32> to vector<2x256xf32>
    %86 = tpu.concatenate %71, %73, %75, %77, %79, %81, %83, %85 in 1 : vector<2x256xf32>, vector<2x256xf32>, vector<2x256xf32>, vector<2x256xf32>, vector<2x256xf32>, vector<2x256xf32>, vector<2x256xf32>, vector<2x256xf32> -> vector<2x2048xf32>
    %c0_32 = arith.constant 0 : index
    %c0_33 = arith.constant 0 : index
    %87 = vector.load %arg6[%c0_32, %c0_33] : memref<2048x128xf32, #tpu.memory_space<vmem>>, vector<2048x128xf32>
    %cst_34 = arith.constant dense<0.000000e+00> : vector<2x128xf32>
    %88 = tpu.matmul %86, %87, %cst_34 {dimension_numbers = #tpu.dot_dimension_numbers<[1], [0], [0], [1], [0, 0, 1, 1], [], []>} : vector<2x2048xf32>, vector<2048x128xf32>, vector<2x128xf32> -> vector<2x128xf32>
    %c0_35 = arith.constant 0 : index
    %c0_36 = arith.constant 0 : index
    %89 = vector.load %arg7[%c0_35, %c0_36] : memref<1x128xf32, #tpu.memory_space<vmem>>, vector<1x128xf32>
    %90 = vector.broadcast %89 : vector<1x128xf32> to vector<2x128xf32>
    %91 = arith.addf %88, %90 : vector<2x128xf32>
    %cst_37 = arith.constant 0.000000e+00 : f32
    %92 = vector.broadcast %cst_37 : f32 to vector<2x128xf32>
    %93 = arith.maximumf %91, %92 : vector<2x128xf32>
    %c0_38 = arith.constant 0 : index
    %c0_39 = arith.constant 0 : index
    %94 = vector.load %arg8[%c0_38, %c0_39] : memref<128x10xf32, #tpu.memory_space<vmem>>, vector<128x10xf32>
    %cst_40 = arith.constant dense<0.000000e+00> : vector<2x10xf32>
    %95 = tpu.matmul %93, %94, %cst_40 {dimension_numbers = #tpu.dot_dimension_numbers<[1], [0], [0], [1], [0, 0, 1, 1], [], []>} : vector<2x128xf32>, vector<128x10xf32>, vector<2x10xf32> -> vector<2x10xf32>
    %c0_41 = arith.constant 0 : index
    %c0_42 = arith.constant 0 : index
    %96 = vector.load %arg9[%c0_41, %c0_42] : memref<1x10xf32, #tpu.memory_space<vmem>>, vector<1x10xf32>
    %97 = vector.broadcast %96 : vector<1x10xf32> to vector<2x10xf32>
    %98 = arith.addf %95, %97 : vector<2x10xf32>
    %c0_43 = arith.constant 0 : index
    %c0_44 = arith.constant 0 : index
    %99 = vector.load %arg10[%c0_43, %c0_44] : memref<2x10xf32, #tpu.memory_space<vmem>>, vector<2x10xf32>
    tpu.vector_store %arg10[%c0_43, %c0_44], %98 {strides = array<i32>} : memref<2x10xf32, #tpu.memory_space<vmem>>, vector<2x10xf32>,
    return
  }
  func.func @transform_0(%arg0: i32) -> (i32, i32, i32) {
    %c0_i32 = arith.constant 0 : i32
    %c0_i32_0 = arith.constant 0 : i32
    %c0_i32_1 = arith.constant 0 : i32
    %c0_i32_2 = arith.constant 0 : i32
    return %c0_i32, %c0_i32_0, %c0_i32_1 : i32, i32, i32
  }
  func.func @transform_1(%arg0: i32) -> (i32, i32) {
    %c0_i32 = arith.constant 0 : i32
    %c0_i32_0 = arith.constant 0 : i32
    %c0_i32_1 = arith.constant 0 : i32
    return %c0_i32, %c0_i32_0 : i32, i32
  }
  func.func @transform_2(%arg0: i32) -> (i32, i32) {
    %c0_i32 = arith.constant 0 : i32
    %c0_i32_0 = arith.constant 0 : i32
    %c0_i32_1 = arith.constant 0 : i32
    return %c0_i32, %c0_i32_0 : i32, i32
  }
  func.func @transform_3(%arg0: i32) -> (i32, i32) {
    %c0_i32 = arith.constant 0 : i32
    %c0_i32_0 = arith.constant 0 : i32
    %c0_i32_1 = arith.constant 0 : i32
    return %c0_i32, %c0_i32_0 : i32, i32
  }
  func.func @transform_4(%arg0: i32) -> (i32, i32) {
    %c0_i32 = arith.constant 0 : i32
    %c0_i32_0 = arith.constant 0 : i32
    %c0_i32_1 = arith.constant 0 : i32
    return %c0_i32, %c0_i32_0 : i32, i32
  }
  func.func @transform_5(%arg0: i32) -> (i32, i32) {
    %c0_i32 = arith.constant 0 : i32
    %c0_i32_0 = arith.constant 0 : i32
    %c0_i32_1 = arith.constant 0 : i32
    return %c0_i32, %c0_i32_0 : i32, i32
  }
  func.func @transform_6(%arg0: i32) -> (i32, i32) {
    %c0_i32 = arith.constant 0 : i32
    %c0_i32_0 = arith.constant 0 : i32
    %c0_i32_1 = arith.constant 0 : i32
    return %c0_i32, %c0_i32_0 : i32, i32
  }
  func.func @transform_7(%arg0: i32) -> (i32, i32) {
    %c0_i32 = arith.constant 0 : i32
    %c0_i32_0 = arith.constant 0 : i32
    %c0_i32_1 = arith.constant 0 : i32
    return %c0_i32, %c0_i32_0 : i32, i32
  }
  func.func @transform_8(%arg0: i32) -> (i32, i32) {
    %c0_i32 = arith.constant 0 : i32
    %c0_i32_0 = arith.constant 0 : i32
    %c0_i32_1 = arith.constant 0 : i32
    return %c0_i32, %c0_i32_0 : i32, i32
  }
  func.func @transform_9(%arg0: i32) -> (i32, i32) {
    %c0_i32 = arith.constant 0 : i32
    %c0_i32_0 = arith.constant 0 : i32
    %c0_i32_1 = arith.constant 0 : i32
    return %c0_i32, %c0_i32_0 : i32, i32
  }
}

</mosaic_0001>

<bundles_post_ra>
// kernel: very_simple_model_forward.1
= control target key start
LH: loop header
LB: loop body
LE: loop exit
PB: predicated region body
PF: predicated region fallthrough
CT: control target
= control target key end

     0   :  { %14 = vsyncpa [#allocation5], 0  ;;  %s6846_s0 = inlined_call_operand.hbm [shape: f32[2,16,16], index: 0, kind: input, shape index: {}]   ;;  %s6847_s1 = inlined_call_operand.hbm [shape: f32[48,512], index: 1, kind: input, shape index: {}]   ;;  %s6848_s2 = inlined_call_operand.hbm [shape: f32[1,512], index: 2, kind: input, shape index: {}]   ;;  %s6849_s3 = inlined_call_operand.hbm [shape: f32[1536,512], index: 3, kind: input, shape index: {}]   ;;  %s6850_s4 = inlined_call_operand.hbm [shape: f32[1,512], index: 4, kind: input, shape index: {}]   ;;  %s6851_s5 = inlined_call_operand.hbm [shape: f32[2048,128], index: 5, kind: input, shape index: {}]   ;;  %s6852_s6 = inlined_call_operand.hbm [shape: f32[1,128], index: 6, kind: input, shape index: {}]   ;;  %s6853_s7 = inlined_call_operand.vmem [shape: f32[128,10], index: 7, kind: input, shape index: {}]   ;;  %s6854_s8 = inlined_call_operand.hbm [shape: f32[1,10], index: 8, kind: input, shape index: {}]   ;;  %s6855_s9 = inlined_call_operand.hbm [shape: f32[2,10], index: 9, kind: output, shape index: {}]  }
   0x1   :  { %15 = vsyncpa [#allocation8], 0 }
   0x2   :  { %16 = vsyncpa [#allocation11], 0 }
   0x3   :  { %17 = vsyncpa [#allocation14], 0 }
   0x4   :  { %18 = vsyncpa [#allocation17], 0 }
   0x5   :  { %19 = vsyncpa [#allocation6], 0  ;;  %s5846_s30 = smov [#allocation7]   ;;  %s5636_s13 = scalar_lea.hbm %s6847_s1, 3072 }
   0x6   :  { %s37_s10 = sshll.u32 %s5846_s30, 4  ;;  %p5637_p0 = scmp.ne.s32.totalorder %s6847_s1, %s5636_s13  ;;  %s38_s10 = int_to_ptr.vmem [resolvable:$true] %s37_s10 }
   0x7   :  { %p5640_p1 = scmp.lt.u32.totalorder %s5636_s13, %s6847_s1 }
   0x9   :  { %p5642_p2 = pnand %p5640_p1, %p5637_p0 }
   0xb   :  { %5645 = shalt.err (!%p5642_p2)
}
   0xc   :  { %s5646_s18 = scalar_lea.vmem %s38_s10, 3072  ;;  %p5651_p4 = scmp.lt.s32.totalorder %s38_s10, %s38_s10 }
   0xd   :  { %p5647_p3 = scmp.ne.s32.totalorder %s38_s10, %s5646_s18  ;;  %p5652_p5 = scmp.lt.s32.totalorder %s5646_s18, %s5646_s18 }
   0xf   :  { %p5653_p6 = por %p5652_p5, %p5651_p4 }
  0x11   :  { %p5654_p7 = pnand %p5653_p6, %p5647_p3 }
  0x13   :  { %5657 = shalt.err (!%p5654_p7)
}
  0x14   :  { %s5847_s19 = smov 512   ;;  %s5848_s20 = smov 32  }
  0x15   :  { %43 = dma.hbm_to_vmem [thread:$0]  %s6847_s1, 3072, %s38_s10, [#allocation8], %s5847_s19, %s5847_s19, %s5848_s20  }
  0x16   :  { %s5849_s23 = smov [#allocation10]   ;;  %s5658_s27 = scalar_lea.hbm %s6849_s3, 98304 }
  0x17   :  { %s59_s24 = sshll.u32 %s5849_s23, 4  ;;  %p5659_p8 = scmp.ne.s32.totalorder %s6849_s3, %s5658_s27  ;;  %s60_s24 = int_to_ptr.vmem [resolvable:$true] %s59_s24 }
  0x18   :  { %p5662_p9 = scmp.lt.u32.totalorder %s5658_s27, %s6849_s3 }
  0x1a   :  { %p5664_p10 = pnand %p5662_p9, %p5659_p8 }
  0x1c   :  { %5667 = shalt.err (!%p5664_p10)
}
  0x1d   :  { %s5668_s12 = scalar_lea.vmem %s60_s24, 98304  ;;  %p5673_p12 = scmp.lt.s32.totalorder %s60_s24, %s60_s24 }
  0x1e   :  { %p5669_p11 = scmp.ne.s32.totalorder %s60_s24, %s5668_s12  ;;  %p5674_p13 = scmp.lt.s32.totalorder %s5668_s12, %s5668_s12 }
  0x20   :  { %p5675_p0 = por %p5674_p13, %p5673_p12 }
  0x22   :  { %p5676_p1 = pnand %p5675_p0, %p5669_p11 }
  0x24   :  { %5679 = shalt.err (!%p5676_p1)
}
  0x25   :  { %65 = dma.hbm_to_vmem [thread:$0]  %s6849_s3, 98304, %s60_s24, [#allocation11], %s5847_s19, %s5847_s19, %s5848_s20  }
  0x26   :  { %s5850_s13 = smov [#allocation13]   ;;  %s5851_s15 = smov [#allocation4]  }
  0x27   :  { %s81_s14 = sshll.u32 %s5850_s13, 4  ;;  %s25_s16 = sshll.u32 %s5851_s15, 4  ;;  %s82_s14 = int_to_ptr.vmem [resolvable:$true] %s81_s14  ;;  %s5942_s16 = int_to_ptr.vmem [resolvable:$true] %s25_s16 }
  0x28   :  { %s5680_s21 = scalar_lea.hbm %s6851_s5, 32768 }
  0x29   :  { %p5681_p2 = scmp.ne.s32.totalorder %s6851_s5, %s5680_s21  ;;  %p5684_p3 = scmp.lt.u32.totalorder %s5680_s21, %s6851_s5 }
  0x2b   :  { %p5686_p4 = pnand %p5684_p3, %p5681_p2 }
  0x2d   :  { %5689 = shalt.err (!%p5686_p4)
}
  0x2e   :  { %s5690_s3 = scalar_lea.vmem %s82_s14, 32768  ;;  %p5695_p6 = scmp.lt.s32.totalorder %s82_s14, %s82_s14 }
  0x2f   :  { %p5691_p5 = scmp.ne.s32.totalorder %s82_s14, %s5690_s3  ;;  %p5696_p7 = scmp.lt.s32.totalorder %s5690_s3, %s5690_s3 }
  0x31   :  { %p5697_p8 = por %p5696_p7, %p5695_p6 }
  0x33   :  { %p5698_p9 = pnand %p5697_p8, %p5691_p5 }
  0x35   :  { %5701 = shalt.err (!%p5698_p9)
}
  0x36   :  { %s5852_s19 = smov 128   ;;  %s5853_s24 = smov 8  }
  0x37   :  { %87 = dma.hbm_to_vmem [thread:$0]  %s6851_s5, 32768, %s82_s14, [#allocation14], %s5852_s19, %s5852_s19, %s5853_s24  }
  0x38   :  { %s5702_s11 = scalar_lea.hbm %s6846_s0, 512 }
  0x39   :  { %p5703_p10 = scmp.ne.s32.totalorder %s6846_s0, %s5702_s11  ;;  %p5706_p11 = scmp.lt.u32.totalorder %s5702_s11, %s6846_s0 }
  0x3b   :  { %p5708_p12 = pnand %p5706_p11, %p5703_p10 }
  0x3d   :  { %5711 = shalt.err (!%p5708_p12)
}
  0x3e   :  { %s5712_s15 = scalar_lea.vmem %s5942_s16, 512  ;;  %p5717_p0 = scmp.lt.s32.totalorder %s5942_s16, %s5942_s16 }
  0x3f   :  { %p5713_p13 = scmp.ne.s32.totalorder %s5942_s16, %s5712_s15  ;;  %p5718_p1 = scmp.lt.s32.totalorder %s5712_s15, %s5712_s15 }
  0x41   :  { %p5719_p2 = por %p5718_p1, %p5717_p0 }
  0x43   :  { %p5720_p3 = pnand %p5719_p2, %p5713_p13 }
  0x45   :  { %5723 = shalt.err (!%p5720_p3)
}
  0x46   :  { %31 = dma.hbm_to_vmem [thread:$0]  %s6846_s0, 512, %s5942_s16, [#allocation5], %s5852_s19, %s5852_s19, %s5853_s24  }
  0x47   :  { %s5854_s17 = smov [#allocation9]   ;;  %s5855_s21 = smov [#allocation12]  }
  0x48   :  { %s50_s18 = sshll.u32 %s5854_s17, 4  ;;  %s72_s22 = sshll.u32 %s5855_s21, 4  ;;  %s51_s18 = int_to_ptr.vmem [resolvable:$true] %s50_s18  ;;  %s73_s22 = int_to_ptr.vmem [resolvable:$true] %s72_s22 }
  0x49   :  { %s5724_s26 = scalar_lea.hbm %s6848_s2, 64 }
  0x4a   :  { %p5725_p4 = scmp.ne.s32.totalorder %s6848_s2, %s5724_s26  ;;  %p5728_p5 = scmp.lt.u32.totalorder %s5724_s26, %s6848_s2 }
  0x4c   :  { %p5730_p6 = pnand %p5728_p5, %p5725_p4 }
  0x4e   :  { %5733 = shalt.err (!%p5730_p6)
}
  0x4f   :  { %s5734_s0 = scalar_lea.vmem %s51_s18, 64  ;;  %p5739_p8 = scmp.lt.s32.totalorder %s51_s18, %s51_s18 }
  0x50   :  { %p5735_p7 = scmp.ne.s32.totalorder %s51_s18, %s5734_s0  ;;  %p5740_p9 = scmp.lt.s32.totalorder %s5734_s0, %s5734_s0 }
  0x52   :  { %p5741_p10 = por %p5740_p9, %p5739_p8 }
  0x54   :  { %p5742_p11 = pnand %p5741_p10, %p5735_p7 }
  0x56   :  { %5745 = shalt.err (!%p5742_p11)
}
  0x57   :  { %53 = dma.hbm_to_vmem [thread:$0]  %s6848_s2, 64, %s51_s18, [#allocation8]  }
  0x58   :  { %s5746_s11 = scalar_lea.hbm %s6850_s4, 64 }
  0x59   :  { %p5747_p12 = scmp.ne.s32.totalorder %s6850_s4, %s5746_s11  ;;  %p5750_p13 = scmp.lt.u32.totalorder %s5746_s11, %s6850_s4 }
  0x5b   :  { %p5752_p0 = pnand %p5750_p13, %p5747_p12 }
  0x5d   :  { %5755 = shalt.err (!%p5752_p0)
}
  0x5e   :  { %s5756_s15 = scalar_lea.vmem %s73_s22, 64  ;;  %p5761_p2 = scmp.lt.s32.totalorder %s73_s22, %s73_s22 }
  0x5f   :  { %p5757_p1 = scmp.ne.s32.totalorder %s73_s22, %s5756_s15  ;;  %p5762_p3 = scmp.lt.s32.totalorder %s5756_s15, %s5756_s15 }
  0x61   :  { %p5763_p4 = por %p5762_p3, %p5761_p2 }
  0x63   :  { %p5764_p5 = pnand %p5763_p4, %p5757_p1 }
  0x65   :  { %5767 = shalt.err (!%p5764_p5)
}
  0x66   :  { %75 = dma.hbm_to_vmem [thread:$0]  %s6850_s4, 64, %s73_s22, [#allocation11]  }
  0x67   :  { %s5856_s14 = smov [#allocation15]   ;;  %s5857_s18 = smov [#allocation16]  }
  0x68   :  { %s94_s17 = sshll.u32 %s5856_s14, 4  ;;  %s106_s21 = sshll.u32 %s5857_s18, 4  ;;  %s95_s17 = int_to_ptr.vmem [resolvable:$true] %s94_s17  ;;  %s107_s21 = int_to_ptr.vmem [resolvable:$true] %s106_s21 }
  0x69   :  { %s5768_s26 = scalar_lea.hbm %s6852_s6, 16 }
  0x6a   :  { %p5769_p6 = scmp.ne.s32.totalorder %s6852_s6, %s5768_s26  ;;  %p5772_p7 = scmp.lt.u32.totalorder %s5768_s26, %s6852_s6 }
  0x6c   :  { %p5774_p8 = pnand %p5772_p7, %p5769_p6 }
  0x6e   :  { %5777 = shalt.err (!%p5774_p8)
}
  0x6f   :  { %s5778_s4 = scalar_lea.vmem %s95_s17, 16  ;;  %s5782_s22 = scalar_lea.vmem %s95_s17, 32 }
  0x70   :  { %p5779_p9 = scmp.ne.s32.totalorder %s95_s17, %s5778_s4  ;;  %p5783_p10 = scmp.lt.s32.totalorder %s95_s17, %s95_s17 }
  0x71   :  { %p5784_p11 = scmp.lt.s32.totalorder %s5782_s22, %s5778_s4 }
  0x73   :  { %p5785_p12 = por %p5784_p11, %p5783_p10 }
  0x75   :  { %p5786_p13 = pnand %p5785_p12, %p5779_p9 }
  0x77   :  { %5789 = shalt.err (!%p5786_p13)
}
  0x78   :  { %97 = dma.hbm_to_vmem [thread:$0]  %s6852_s6, 16, %s95_s17, [#allocation14]  }
  0x79   :  { %s5790_s30 = scalar_lea.hbm %s6854_s8, 16 }
  0x7a   :  { %p5791_p0 = scmp.ne.s32.totalorder %s6854_s8, %s5790_s30  ;;  %p5794_p1 = scmp.lt.u32.totalorder %s5790_s30, %s6854_s8 }
  0x7c   :  { %p5796_p2 = pnand %p5794_p1, %p5791_p0 }
  0x7e   :  { %5799 = shalt.err (!%p5796_p2)
}
  0x7f   :  { %s5800_s13 = scalar_lea.vmem %s107_s21, 16  ;;  %s5804_s15 = scalar_lea.vmem %s107_s21, 32 }
  0x80   :  { %p5801_p3 = scmp.ne.s32.totalorder %s107_s21, %s5800_s13  ;;  %p5805_p4 = scmp.lt.s32.totalorder %s107_s21, %s107_s21 }
  0x81   :  { %p5806_p5 = scmp.lt.s32.totalorder %s5804_s15, %s5800_s13 }
  0x83   :  { %p5807_p6 = por %p5806_p5, %p5805_p4 }
  0x85   :  { %p5808_p7 = pnand %p5807_p6, %p5801_p3 }
  0x87   :  { %5811 = shalt.err (!%p5808_p7)
}
  0x88   :  { %109 = dma.hbm_to_vmem [thread:$0]  %s6854_s8, 16, %s107_s21, [#allocation17]  }
  0x89   :  { %5834 = dma.done.wait [#allocation5], 512  }
  0x8a   :  { %5835 = vsyncadd [#allocation5], 4294966784 }
  0x8b   :  { %5836 = dma.done.wait [#allocation8], 3136  }
  0x8c   :  { %5837 = vsyncadd [#allocation8], 4294964160 }
  0x8d   :  { %5838 = dma.done.wait [#allocation11], 98368  }
  0x8e   :  { %5839 = vsyncadd [#allocation11], 4294868928 }
  0x8f   :  { %5840 = dma.done.wait [#allocation14], 32784  }
  0x90   :  { %5841 = vsyncadd [#allocation14], 4294934512 }
  0x91   :  { %5842 = dma.done.wait [#allocation17], 16  }
  0x92   :  { %5843 = vsyncadd [#allocation17], 4294967280  ;;  %vm134_vm0 = vcmask 130048   ;;  %vm137_vm1 = vcmask 123904   ;;  %v6856_v0 = vmov 0.0   ;;  %v142_v1 = vld [vmem:[#allocation4] sm:$0xff] }
  0x93   :  { %135 = vst.msk [vmem:[#allocation2] sm:$0xff] %vm134_vm0, %v6856_v0  ;;  %136 = vst.msk [vmem:[#allocation2 + $0x8] sm:$0xff] %vm134_vm0, %v6856_v0  ;;  %340 = vmatprep.mubr.f32.mxu1 %v6856_v0  ;;  %v143_v2 = vld [vmem:[#allocation4 + $0x8] sm:$0xff]  ;;  %v144_v3 = vld [vmem:[#allocation4 + $0x10] sm:$0xff]  ;;  %vm162_vm2 = vcmask 1046528   ;;  %vm173_vm3 = vcmask 1045504  }
  0x94   :  { %138 = vst.msk [vmem:[#allocation2 + $0x10] sm:$0x3] %vm137_vm1, %v6856_v0  ;;  %141 = vst.msk [vmem:[#allocation2 + $0x28] sm:$0x3] %vm137_vm1, %v6856_v0  ;;  %v145_v4 = vld [vmem:[#allocation4 + $0x18] sm:$0xff]  ;;  %v218_v5 = vld [vmem:[#allocation7 + $0x8] sm:$0xff] }
  0x95   :  { %139 = vst.msk [vmem:[#allocation2 + $0x18] sm:$0xff] %vm134_vm0, %v6856_v0  ;;  %140 = vst.msk [vmem:[#allocation2 + $0x20] sm:$0xff] %vm134_vm0, %v6856_v0  ;;  %v222_v6 = vld [vmem:[#allocation7 + $0x28] sm:$0xff]  ;;  %v217_v8 = vld [vmem:[#allocation7] sm:$0xff]  ;;  %s5859_s8 = smov 16   ;;  %vm212_vm4 = vcmask 261120  }
  0x96   :  { %470 = vst [vmem:[#allocation3] sm:$0xff] %v6856_v0  ;;  %471 = vst [vmem:[#allocation3 + $0x8] sm:$0xff] %v6856_v0  ;;  %v4444_v7 = vpack.c.bf16 %v222_v6, %v218_v5  ;;  %v221_v9 = vld [vmem:[#allocation7 + $0x20] sm:$0xff]  ;;  %v226_v10 = vld [vmem:[#allocation7 + $0x48] sm:$0xff]  ;;  %vm263_vm5 = vcmask 392192   ;;  %vm510_vm6 = vcmask 1040384  }
  0x97   :  { %472 = vst [vmem:[#allocation3 + $0x10] sm:$0xff] %v6856_v0  ;;  %473 = vst [vmem:[#allocation3 + $0x18] sm:$0xff] %v6856_v0  ;;  %v4446_v11 = vpack.c.bf16 %v221_v9, %v217_v8  ;;  %v230_v12 = vld [vmem:[#allocation7 + $0x68] sm:$0xff]  ;;  %v225_v13 = vld [vmem:[#allocation7 + $0x40] sm:$0xff]  ;;  %s5860_s5 = smov 96   ;;  %s5861_s14 = smov 64  }
  0x98   :  { %478 = vst [vmem:[#allocation3 + $0x40] sm:$0x3] %v6856_v0  ;;  %479 = vst [vmem:[#allocation3 + $0x48] sm:$0x3] %v6856_v0  ;;  %v229_v14 = vld [vmem:[#allocation7 + $0x60] sm:$0xff]  ;;  %4445 = vmatprep.subr.bf16.mxu1 %v4444_v7  ;;  %v4448_v15 = vpack.c.bf16 %v230_v12, %v226_v10  ;;  %v234_v16 = vld [vmem:[#allocation7 + $0x88] sm:$0xff] }
  0x99   :  { %480 = vst [vmem:[#allocation3 + $0x50] sm:$0x3] %v6856_v0  ;;  %481 = vst [vmem:[#allocation3 + $0x58] sm:$0x3] %v6856_v0  ;;  %v238_v17 = vld [vmem:[#allocation7 + $0xa8] sm:$0xff]  ;;  %4447 = vmatpush1.bf16.msra.mxu1 %v4446_v11  ;;  %v4450_v18 = vpack.c.bf16 %v229_v14, %v225_v13  ;;  %v233_v19 = vld [vmem:[#allocation7 + $0x80] sm:$0xff] }
  0x9a   :  { %482 = vst [vmem:[#allocation3 + $0x60] sm:$0xff] %v6856_v0  ;;  %483 = vst [vmem:[#allocation3 + $0x68] sm:$0xff] %v6856_v0  ;;  %v237_v20 = vld [vmem:[#allocation7 + $0xa0] sm:$0xff]  ;;  %4449 = vmatprep.subr.bf16.mxu1 %v4448_v15  ;;  %v4452_v21 = vpack.c.bf16 %v238_v17, %v234_v16  ;;  %v220_v22 = vld [vmem:[#allocation7 + $0x18] sm:$0xff]  ;;  %vm2789_vm7 = vcmask 523264   ;;  %vm2794_vm8 = vcmask 785408  }
  0x9b   :  { %484 = vst [vmem:[#allocation3 + $0x70] sm:$0xff] %v6856_v0  ;;  %485 = vst [vmem:[#allocation3 + $0x78] sm:$0xff] %v6856_v0  ;;  %v224_v23 = vld [vmem:[#allocation7 + $0x38] sm:$0xff]  ;;  %v4454_v27 = vpack.c.bf16 %v237_v20, %v233_v19  ;;  %v744_v52 = vld [vmem:[#allocation10 + $0x8] sm:$0xff]  ;;  %vm2989_vm9 = vcmask 1041409   ;;  %vm5864_vm10 = vmmov 0  }
  0x9c   :  { %490 = vst [vmem:[#allocation3 + $0xa0] sm:$0x3] %v6856_v0  ;;  %491 = vst [vmem:[#allocation3 + $0xa8] sm:$0x3] %v6856_v0  ;;  %v4456_v36 = vpack.c.bf16 %v224_v23, %v220_v22  ;;  %v748_v53 = vld [vmem:[#allocation10 + $0x28] sm:$0xff]  ;;  %v743_v55 = vld [vmem:[#allocation10] sm:$0xff] }
  0x9d   :  { %492 = vst [vmem:[#allocation3 + $0xb0] sm:$0x3] %v6856_v0  ;;  %493 = vst [vmem:[#allocation3 + $0xb8] sm:$0x3] %v6856_v0  ;;  %4451 = vmatpush1.bf16.msra.mxu1 %v4450_v18  ;;  %v4468_v54 = vpack.c.bf16 %v748_v53, %v744_v52  ;;  %v747_v56 = vld [vmem:[#allocation10 + $0x20] sm:$0xff]  ;;  %v752_v58 = vld [vmem:[#allocation10 + $0x48] sm:$0xff] }
  0x9e   :  { %146 = vst.msk [vmem:[#allocation2 + $0x1] sm:$0xff] %vm134_vm0, %v142_v1  ;;  %147 = vst.msk [vmem:[#allocation2 + $0x9] sm:$0xff] %vm134_vm0, %v143_v2  ;;  %4453 = vmatprep.subr.bf16.mxu1 %v4452_v21  ;;  %v4470_v57 = vpack.c.bf16 %v747_v56, %v743_v55  ;;  %v756_v59 = vld [vmem:[#allocation10 + $0x68] sm:$0xff]  ;;  %v751_v61 = vld [vmem:[#allocation10 + $0x40] sm:$0xff]  ;;  %vm4065_vm11 = vcmask 74752  }
  0x9f   :  { %148 = vst.msk [vmem:[#allocation2 + $0x19] sm:$0xff] %vm134_vm0, %v144_v3  ;;  %149 = vst.msk [vmem:[#allocation2 + $0x21] sm:$0xff] %vm134_vm0, %v145_v4  ;;  %4469 = vmatprep.subr.bf16.mxu0 %v4468_v54  ;;  %v4472_v60 = vpack.c.bf16 %v756_v59, %v752_v58  ;;  %v755_v62 = vld [vmem:[#allocation10 + $0x60] sm:$0xff]  ;;  %v760_v1 = vld [vmem:[#allocation10 + $0x88] sm:$0xff] }
  0xa0   :  { %4471 = vmatpush1.bf16.msra.mxu0 %v4470_v57  ;;  %v4474_v63 = vpack.c.bf16 %v755_v62, %v751_v61  ;;  %v764_v2 = vld [vmem:[#allocation10 + $0xa8] sm:$0xff]  ;;  %v759_v4 = vld [vmem:[#allocation10 + $0x80] sm:$0xff] }
  0xa1   :  { %4455 = vmatpush1.bf16.msra.mxu1 %v4454_v27  ;;  %4473 = vmatprep.subr.bf16.mxu0 %v4472_v60  ;;  %v4476_v3 = vpack.c.bf16 %v764_v2, %v760_v1  ;;  %v763_v5 = vld [vmem:[#allocation10 + $0xa0] sm:$0xff]  ;;  %v768_v7 = vld [vmem:[#allocation10 + $0xc8] sm:$0xff] }
  0xa2   :  { %4457 = vmatprep.subr.bf16.mxu1 %v4456_v36  ;;  %v4478_v6 = vpack.c.bf16 %v763_v5, %v759_v4  ;;  %v772_v8 = vld [vmem:[#allocation10 + $0xe8] sm:$0xff]  ;;  %v767_v10 = vld [vmem:[#allocation10 + $0xc0] sm:$0xff] }
  0xa3   :  { %v4480_v9 = vpack.c.bf16 %v772_v8, %v768_v7  ;;  %v771_v11 = vld [vmem:[#allocation10 + $0xe0] sm:$0xff]  ;;  %v776_v12 = vld [vmem:[#allocation10 + $0x108] sm:$0xff]  ;;  %v232_v7 = vld [vmem:[#allocation7 + $0x78] sm:$0xff] }
  0xa4   :  { %4475 = vmatpush1.bf16.msra.mxu0 %v4474_v63  ;;  %v780_v13 = vld [vmem:[#allocation10 + $0x128] sm:$0xff]  ;;  %v4482_v14 = vpack.c.bf16 %v771_v11, %v767_v10  ;;  %v775_v16 = vld [vmem:[#allocation10 + $0x100] sm:$0xff] }
  0xa5   :  { %v6052_v24 = vld [vmem:[#allocation2] sm:$0xff]  ;;  %v6054_v25 = vld [vmem:[#allocation2 + $0x8] sm:$0xff]  ;;  %v152_v26 = vld [vmem:[#allocation2 + $0x10] sm:$0x3]  ;;  %4477 = vmatprep.subr.bf16.mxu0 %v4476_v3  ;;  %v4484_v15 = vpack.c.bf16 %v780_v13, %v776_v12 }
  0xa6   :  { %v163_v28 = vrot.slane %v6052_v24, 1  ;;  %v164_v29 = vrot.slane %v6054_v25, 1  ;;  %v166_v30 = vrot.slane %v152_v26, 1  ;;  %v174_v31 = vrot.slane %v6052_v24, 2  ;;  %v6059_v32 = vld [vmem:[#allocation2 + $0x18] sm:$0xff]  ;;  %v6061_v33 = vld [vmem:[#allocation2 + $0x20] sm:$0xff] }
  0xa7   :  { %v175_v34 = vrot.slane %v6054_v25, 2  ;;  %v177_v35 = vrot.slane %v152_v26, 2  ;;  %v168_v39 = vrot.slane %v6059_v32, 1  ;;  %v169_v40 = vrot.slane %v6061_v33, 1  ;;  %v155_v45 = vld [vmem:[#allocation2 + $0x28] sm:$0x3] }
  0xa8   :  { %v165_v37 = vsel %vm162_vm2, %v163_v28, %v164_v29  ;;  %v167_v38 = vsel %vm162_vm2, %v164_v29, %v166_v30  ;;  %v179_v43 = vrot.slane %v6059_v32, 2  ;;  %v180_v44 = vrot.slane %v6061_v33, 2  ;;  %4479 = vmatpush1.bf16.msra.mxu0 %v4478_v6  ;;  %v779_v17 = vld [vmem:[#allocation10 + $0x120] sm:$0xff]  ;;  %v784_v18 = vld [vmem:[#allocation10 + $0x148] sm:$0xff]  ;;  %v228_v6 = vld [vmem:[#allocation7 + $0x58] sm:$0xff] }
  0xa9   :  { %184 = vrot.lane.b32.xlu0 %v165_v37, %s5859_s8  ;;  %186 = vrot.lane.b32.xlu1 %v167_v38, %s5859_s8  ;;  %v176_v41 = vsel %vm173_vm3, %v174_v31, %v175_v34  ;;  %v178_v42 = vsel %vm173_vm3, %v175_v34, %v177_v35  ;;  %v170_v46 = vsel %vm162_vm2, %v168_v39, %v169_v40  ;;  %v171_v48 = vrot.slane %v155_v45, 1  ;;  %v788_v19 = vld [vmem:[#allocation10 + $0x168] sm:$0xff]  ;;  %v783_v22 = vld [vmem:[#allocation10 + $0x140] sm:$0xff] }
  0xaa   :  { %v181_v47 = vsel %vm173_vm3, %v179_v43, %v180_v44  ;;  %v182_v49 = vrot.slane %v155_v45, 2  ;;  %4481 = vmatprep.subr.bf16.mxu0 %v4480_v9  ;;  %v4486_v20 = vpack.c.bf16 %v779_v17, %v775_v16  ;;  %v4488_v21 = vpack.c.bf16 %v788_v19, %v784_v18  ;;  %v787_v23 = vld [vmem:[#allocation10 + $0x160] sm:$0xff]  ;;  %v792_v26 = vld [vmem:[#allocation10 + $0x188] sm:$0xff]  ;;  %v236_v17 = vld [vmem:[#allocation7 + $0x98] sm:$0xff] }
  0xab   :  { %v172_v50 = vsel %vm162_vm2, %v169_v40, %v171_v48  ;;  %v796_v27 = vld [vmem:[#allocation10 + $0x1a8] sm:$0xff]  ;;  %v4490_v28 = vpack.c.bf16 %v787_v23, %v783_v22  ;;  %v791_v30 = vld [vmem:[#allocation10 + $0x180] sm:$0xff]  ;;  %v4460_v13 = vpack.c.bf16 %v232_v7, %v228_v6  ;;  %v240_v18 = vld [vmem:[#allocation7 + $0xb8] sm:$0xff] }
  0xac   :  { %v183_v51 = vsel %vm173_vm3, %v180_v44, %v182_v49  ;;  %4483 = vmatpush1.bf16.msra.mxu0 %v4482_v14  ;;  %v4492_v29 = vpack.c.bf16 %v796_v27, %v792_v26  ;;  %v795_v31 = vld [vmem:[#allocation10 + $0x1a0] sm:$0xff]  ;;  %v800_v34 = vld [vmem:[#allocation10 + $0x1c8] sm:$0xff]  ;;  %v746_v27 = vld [vmem:[#allocation10 + $0x18] sm:$0xff] }
  0xad   :  { %196 = vrot.lane.b32.xlu0 %v176_v41, %s5848_s20  ;;  %198 = vrot.lane.b32.xlu1 %v178_v42, %s5848_s20  ;;  %v804_v35 = vld [vmem:[#allocation10 + $0x1e8] sm:$0xff]  ;;  %v4494_v36 = vpack.c.bf16 %v795_v31, %v791_v30  ;;  %v799_v38 = vld [vmem:[#allocation10 + $0x1c0] sm:$0xff]  ;;  %v798_v6 = vld [vmem:[#allocation10 + $0x1b8] sm:$0xff] }
  0xae   :  { %4485 = vmatprep.subr.bf16.mxu0 %v4484_v15  ;;  %v4496_v37 = vpack.c.bf16 %v804_v35, %v800_v34  ;;  %v803_v39 = vld [vmem:[#allocation10 + $0x1e0] sm:$0xff]  ;;  %v808_v40 = vld [vmem:[#allocation10 + $0x208] sm:$0xff] }
  0xaf   :  { %v812_v41 = vld [vmem:[#allocation10 + $0x228] sm:$0xff]  ;;  %v4498_v42 = vpack.c.bf16 %v803_v39, %v799_v38  ;;  %v807_v44 = vld [vmem:[#allocation10 + $0x200] sm:$0xff]  ;;  %v749_v38 = vld [vmem:[#allocation10 + $0x30] sm:$0xff] }
  0xb0   :  { %4487 = vmatpush1.bf16.msra.mxu0 %v4486_v20  ;;  %v4500_v43 = vpack.c.bf16 %v812_v41, %v808_v40  ;;  %v811_v45 = vld [vmem:[#allocation10 + $0x220] sm:$0xff]  ;;  %v824_v52 = vld [vmem:[#allocation10 + $0x288] sm:$0xff]  ;;  %v754_v39 = vld [vmem:[#allocation10 + $0x58] sm:$0xff] }
  0xb1   :  { %188 = vrot.lane.b32.xlu0 %v170_v46, %s5859_s8  ;;  %200 = vrot.lane.b32.xlu1 %v181_v47, %s5848_s20  ;;  %v816_v46 = vld [vmem:[#allocation10 + $0x248] sm:$0xff]  ;;  %v4502_v48 = vpack.c.bf16 %v811_v45, %v807_v44  ;;  %v823_v56 = vld [vmem:[#allocation10 + $0x280] sm:$0xff]  ;;  %v758_v40 = vld [vmem:[#allocation10 + $0x78] sm:$0xff] }
  0xb2   :  { %4489 = vmatprep.subr.bf16.mxu0 %v4488_v21  ;;  %v820_v47 = vld [vmem:[#allocation10 + $0x268] sm:$0xff]  ;;  %v827_v57 = vld [vmem:[#allocation10 + $0x2a0] sm:$0xff]  ;;  %v762_v44 = vld [vmem:[#allocation10 + $0x98] sm:$0xff] }
  0xb3   :  { %v4504_v49 = vpack.c.bf16 %v820_v47, %v816_v46  ;;  %v828_v53 = vld [vmem:[#allocation10 + $0x2a8] sm:$0xff]  ;;  %v4510_v60 = vpack.c.bf16 %v827_v57, %v823_v56  ;;  %v831_v62 = vld [vmem:[#allocation10 + $0x2c0] sm:$0xff]  ;;  %v766_v45 = vld [vmem:[#allocation10 + $0xb8] sm:$0xff] }
  0xb4   :  { %4491 = vmatpush1.bf16.msra.mxu0 %v4490_v28  ;;  %v4508_v55 = vpack.c.bf16 %v828_v53, %v824_v52  ;;  %v832_v58 = vld [vmem:[#allocation10 + $0x2c8] sm:$0xff]  ;;  %v835_v63 = vld [vmem:[#allocation10 + $0x2e0] sm:$0xff]  ;;  %v750_v28 = vld [vmem:[#allocation10 + $0x38] sm:$0xff]  ;;  %v4860_v47 = vpack.c.bf16 %v766_v45, %v762_v44 }
  0xb5   :  { %190 = vrot.lane.b32.xlu0 %v172_v50, %s5859_s8  ;;  %202 = vrot.lane.b32.xlu1 %v183_v51, %s5848_s20  ;;  %v815_v50 = vld [vmem:[#allocation10 + $0x240] sm:$0xff]  ;;  %v836_v59 = vld [vmem:[#allocation10 + $0x2e8] sm:$0xff]  ;;  %v4514_v1 = vpack.c.bf16 %v835_v63, %v831_v62  ;;  %v4852_v35 = vpack.c.bf16 %v750_v28, %v746_v27  ;;  %v778_v56 = vld [vmem:[#allocation10 + $0x118] sm:$0xff] }
  0xb6   :  { %4493 = vmatprep.subr.bf16.mxu0 %v4492_v29  ;;  %v819_v51 = vld [vmem:[#allocation10 + $0x260] sm:$0xff]  ;;  %v4512_v61 = vpack.c.bf16 %v836_v59, %v832_v58  ;;  %v219_v4 = vld [vmem:[#allocation7 + $0x10] sm:$0xff]  ;;  %v782_v57 = vld [vmem:[#allocation10 + $0x138] sm:$0xff] }
  0xb7   :  { %v4506_v54 = vpack.c.bf16 %v819_v51, %v815_v50  ;;  %v223_v5 = vld [vmem:[#allocation7 + $0x30] sm:$0xff]  ;;  %v770_v50 = vld [vmem:[#allocation10 + $0xd8] sm:$0xff]  ;;  %v4868_v59 = vpack.c.bf16 %v782_v57, %v778_v56 }
  0xb8   :  { %4495 = vmatpush1.bf16.msra.mxu0 %v4494_v36  ;;  %v4458_v8 = vpack.c.bf16 %v223_v5, %v219_v4  ;;  %v227_v14 = vld [vmem:[#allocation7 + $0x50] sm:$0xff]  ;;  %v774_v51 = vld [vmem:[#allocation10 + $0xf8] sm:$0xff] }
  0xb9   :  { %4497 = vmatprep.subr.bf16.mxu0 %v4496_v37  ;;  %v231_v15 = vld [vmem:[#allocation7 + $0x70] sm:$0xff]  ;;  %v4864_v53 = vpack.c.bf16 %v774_v51, %v770_v50  ;;  %v786_v62 = vld [vmem:[#allocation10 + $0x158] sm:$0xff] }
  0xba   :  { %v235_v22 = vld [vmem:[#allocation7 + $0x90] sm:$0xff]  ;;  %v790_v63 = vld [vmem:[#allocation10 + $0x178] sm:$0xff] }
  0xbb   :  { %v239_v23 = vld [vmem:[#allocation7 + $0xb0] sm:$0xff]  ;;  %v794_v5 = vld [vmem:[#allocation10 + $0x198] sm:$0xff] }
  0xbc   :  { %4499 = vmatpush1.bf16.msra.mxu0 %v4498_v42  ;;  %v4466_v30 = vpack.c.bf16 %v239_v23, %v235_v22  ;;  %v745_v37 = vld [vmem:[#allocation10 + $0x10] sm:$0xff]  ;;  %v4856_v42 = vpack.c.bf16 %v758_v40, %v754_v39  ;;  %v822_v22 = vld [vmem:[#allocation10 + $0x278] sm:$0xff] }
  0xbd   :  { %4501 = vmatprep.subr.bf16.mxu0 %v4500_v43  ;;  %v4854_v41 = vpack.c.bf16 %v749_v38, %v745_v37  ;;  %v753_v43 = vld [vmem:[#allocation10 + $0x50] sm:$0xff]  ;;  %v838_v37 = vld [vmem:[#allocation10 + $0x2f8] sm:$0xff] }
  0xbe   :  { %v789_v4 = vld [vmem:[#allocation10 + $0x170] sm:$0xff]  ;;  %v842_v44 = vld [vmem:[#allocation10 + $0x318] sm:$0xff] }
  0xbf   :  { %v817_v27 = vld [vmem:[#allocation10 + $0x250] sm:$0xff]  ;;  %v850_v56 = vld [vmem:[#allocation10 + $0x358] sm:$0xff] }
  0xc0   :  { %4503 = vmatpush1.bf16.msra.mxu0 %v4502_v48  ;;  %v761_v48 = vld [vmem:[#allocation10 + $0x90] sm:$0xff] }
  0xc1   :  { %4505 = vmatprep.subr.bf16.mxu0 %v4504_v49  ;;  %v765_v49 = vld [vmem:[#allocation10 + $0xb0] sm:$0xff] }
  0xc2   :  { %v4862_v52 = vpack.c.bf16 %v765_v49, %v761_v48  ;;  %v821_v28 = vld [vmem:[#allocation10 + $0x270] sm:$0xff]  ;;  %v843_v48 = vld [vmem:[#allocation10 + $0x320] sm:$0xff] }
  0xc3   :  { %v833_v40 = vld [vmem:[#allocation10 + $0x2d0] sm:$0xff] }
  0xc4   :  { %4507 = vmatpush1.bf16.msra.mxu0 %v4506_v54  ;;  %v769_v54 = vld [vmem:[#allocation10 + $0xd0] sm:$0xff] }
  0xc5   :  { %4509 = vmatprep.subr.bf16.mxu0 %v4508_v55  ;;  %v773_v55 = vld [vmem:[#allocation10 + $0xf0] sm:$0xff] }
  0xc6   :  { %v4866_v58 = vpack.c.bf16 %v773_v55, %v769_v54  ;;  %v841_v51 = vld [vmem:[#allocation10 + $0x310] sm:$0xff]  ;;  %v848_v54 = vld [vmem:[#allocation10 + $0x348] sm:$0xff] }
  0xc7   :  { %v852_v55 = vld [vmem:[#allocation10 + $0x368] sm:$0xff] }
  0xc8   :  { %4511 = vmatpush1.bf16.msra.mxu0 %v4510_v60  ;;  %v777_v60 = vld [vmem:[#allocation10 + $0x110] sm:$0xff]  ;;  %v4520_v57 = vpack.c.bf16 %v852_v55, %v848_v54 }
  0xc9   :  { %4513 = vmatprep.subr.bf16.mxu0 %v4512_v61  ;;  %v781_v61 = vld [vmem:[#allocation10 + $0x130] sm:$0xff] }
  0xcc   :  { %4515 = vmatpush1.bf16.msra.mxu0 %v4514_v1  ;;  %v4870_v1 = vpack.c.bf16 %v781_v61, %v777_v60  ;;  %v851_v60 = vld [vmem:[#allocation10 + $0x360] sm:$0xff] }
 0x11b   :  { %v185_v2 = vpop.permute.xlu0 %184  ;;  %v187_v3 = vpop.permute.xlu1 %186 }
 0x11c   :  { %v208_v9 = vsel %vm134_vm0, %v6052_v24, %v185_v2  ;;  %v209_v10 = vsel %vm134_vm0, %v6054_v25, %v187_v3  ;;  %v4462_v24 = vpack.c.bf16 %v231_v15, %v227_v14  ;;  %v4464_v25 = vpack.c.bf16 %v240_v18, %v236_v17  ;;  %v785_v3 = vld [vmem:[#allocation10 + $0x150] sm:$0xff]  ;;  %v810_v17 = vld [vmem:[#allocation10 + $0x218] sm:$0xff] }
 0x11d   :  { %v4872_v2 = vpack.c.bf16 %v790_v63, %v786_v62  ;;  %v4874_v7 = vpack.c.bf16 %v789_v4, %v785_v3  ;;  %v801_v15 = vld [vmem:[#allocation10 + $0x1d0] sm:$0xff]  ;;  %v814_v18 = vld [vmem:[#allocation10 + $0x238] sm:$0xff]  ;;  %v856_v3 = vld [vmem:[#allocation10 + $0x388] sm:$0xff] }
 0x11e   :  { %v849_v63 = vld [vmem:[#allocation10 + $0x350] sm:$0xff]  ;;  %v860_v4 = vld [vmem:[#allocation10 + $0x3a8] sm:$0xff] }
 0x11f   :  { %v197_v11 = vpop.permute.xlu0 %196  ;;  %v199_v12 = vpop.permute.xlu1 %198 }
 0x120   :  { %v213_v16 = vsel %vm212_vm4, %v208_v9, %v197_v11  ;;  %v214_v19 = vsel %vm212_vm4, %v209_v10, %v199_v12  ;;  %v793_v9 = vld [vmem:[#allocation10 + $0x190] sm:$0xff]  ;;  %v802_v11 = vld [vmem:[#allocation10 + $0x1d8] sm:$0xff] }
 0x121   :  { %4086 = vmatmul.mubr.msk.f32.vlgmr.msra.gmra.mrb[0].mxu1 %vm263_vm5, %v213_v16  ;;  %v797_v10 = vld [vmem:[#allocation10 + $0x1b0] sm:$0xff]  ;;  %v806_v12 = vld [vmem:[#allocation10 + $0x1f8] sm:$0xff] }
 0x122   :  { %346 = vmatprep.mubr.f32.mxu1 %v6856_v0  ;;  %4459 = vmatpush1.bf16.msra.mxu1 %v4458_v8  ;;  %v4876_v8 = vpack.c.bf16 %v798_v6, %v794_v5  ;;  %v4880_v14 = vpack.c.bf16 %v806_v12, %v802_v11  ;;  %v858_v5 = vld [vmem:[#allocation10 + $0x398] sm:$0xff]  ;;  %v4524_v6 = vpack.c.bf16 %v860_v4, %v856_v3  ;;  %v857_v12 = vld [vmem:[#allocation10 + $0x390] sm:$0xff]  ;;  %v6120_v3 = vld [vmem:[#allocation10 + $0x448] sm:$0xff] }
 0x123   :  { %v189_v20 = vpop.permute.xlu0 %188  ;;  %v201_v21 = vpop.permute.xlu1 %200  ;;  %4461 = vmatprep.subr.bf16.mxu1 %v4460_v13  ;;  %v4878_v13 = vpack.c.bf16 %v797_v10, %v793_v9  ;;  %v859_v9 = vld [vmem:[#allocation10 + $0x3a0] sm:$0xff] }
 0x124   :  { %v210_v26 = vsel %vm134_vm0, %v6059_v32, %v189_v20  ;;  %v809_v20 = vld [vmem:[#allocation10 + $0x210] sm:$0xff] }
 0x125   :  { %4087 = vmatmul.mubr.msk.f32.gmra.mrb[2].mxu1 %vm263_vm5, %v214_v19  ;;  %v215_v29 = vsel %vm212_vm4, %v210_v26, %v201_v21  ;;  %v813_v21 = vld [vmem:[#allocation10 + $0x230] sm:$0xff] }
 0x126   :  { %352 = vmatprep.mubr.f32.mxu1 %v6856_v0  ;;  %4463 = vmatpush1.bf16.msra.mxu1 %v4462_v24  ;;  %v4884_v24 = vpack.c.bf16 %v814_v18, %v810_v17  ;;  %v4886_v23 = vpack.c.bf16 %v813_v21, %v809_v20  ;;  %v866_v17 = vld [vmem:[#allocation10 + $0x3d8] sm:$0xff]  ;;  %v867_v20 = vld [vmem:[#allocation10 + $0x3e0] sm:$0xff] }
 0x127   :  { %v191_v31 = vpop.permute.xlu0 %190  ;;  %v203_v34 = vpop.permute.xlu1 %202  ;;  %4465 = vmatprep.subr.bf16.mxu1 %v4464_v25  ;;  %v818_v25 = vld [vmem:[#allocation10 + $0x258] sm:$0xff] }
 0x128   :  { %v211_v36 = vsel %vm134_vm0, %v6061_v33, %v191_v31  ;;  %v757_v33 = vld [vmem:[#allocation10 + $0x70] sm:$0xff]  ;;  %v4888_v26 = vpack.c.bf16 %v822_v22, %v818_v25  ;;  %v4890_v31 = vpack.c.bf16 %v821_v28, %v817_v27  ;;  %v872_v27 = vld [vmem:[#allocation10 + $0x408] sm:$0xff] }
 0x129   :  { %4088 = vmatmul.mubr.msk.f32.gmra.mrb[4].mxu1 %vm263_vm5, %v215_v29  ;;  %v216_v32 = vsel %vm212_vm4, %v211_v36, %v203_v34  ;;  %v4858_v46 = vpack.c.bf16 %v757_v33, %v753_v43  ;;  %v829_v36 = vld [vmem:[#allocation10 + $0x2b0] sm:$0xff]  ;;  %v840_v43 = vld [vmem:[#allocation10 + $0x308] sm:$0xff] }
 0x12a   :  { %358 = vmatprep.mubr.f32.mxu1 %v6856_v0  ;;  %4467 = vmatpush1.bf16.msra.mxu1 %v4466_v30  ;;  %v830_v30 = vld [vmem:[#allocation10 + $0x2b8] sm:$0xff]  ;;  %v844_v33 = vld [vmem:[#allocation10 + $0x328] sm:$0xff]  ;;  %v865_v22 = vld [vmem:[#allocation10 + $0x3d0] sm:$0xff] }
 0x12b   :  { %4853 = vmatprep.subr.bf16.mxu1 %v4852_v35  ;;  %v825_v35 = vld [vmem:[#allocation10 + $0x290] sm:$0xff]  ;;  %v4516_v45 = vpack.c.bf16 %v844_v33, %v840_v43  ;;  %v876_v28 = vld [vmem:[#allocation10 + $0x428] sm:$0xff] }
 0x12c   :  { %v4894_v38 = vpack.c.bf16 %v829_v36, %v825_v35  ;;  %v243_v35 = vlaneseq }
 0x12d   :  { %4089 = vmatmul.mubr.msk.f32.gmra.mrb[6].mxu1 %vm263_vm5, %v216_v32  ;;  %4517 = vmatprep.subr.bf16.mxu0 %v4516_v45 }
 0x12e   :  { %429 = vmatprep.mubr.f32.mxu1 %v6856_v0  ;;  %v6107_v36 = vshrl.u32 %v243_v35, 7 }
 0x130   :  { %6875 = vst [vmem:[#allocation25_spill] sm:$0xff] %v6107_v36  ;;  %v6117_v55 = vsub.s32 2, %v6107_v36 }
 0x131   :  { %4090 = vmatmul.mubr.msk.f32.vlgmr.msra.gmra.mrb[8].mxu1 %vm263_vm5, %v213_v16  ;;  %v805_v16 = vld [vmem:[#allocation10 + $0x1f0] sm:$0xff] }
 0x132   :  { %435 = vmatprep.mubr.f32.mxu1 %v6856_v0  ;;  %4855 = vmatpush1.bf16.msra.mxu1 %v4854_v41  ;;  %v837_v41 = vld [vmem:[#allocation10 + $0x2f0] sm:$0xff]  ;;  %6877 = vst [vmem:[#allocation27_spill] sm:$0xff] %v6117_v55 }
 0x133   :  { %4857 = vmatprep.subr.bf16.mxu1 %v4856_v42  ;;  %v4898_v42 = vpack.c.bf16 %v837_v41, %v833_v40 }
 0x135   :  { %4091 = vmatmul.mubr.msk.f32.gmra.mrb[10].mxu1 %vm263_vm5, %v214_v19  ;;  %v4882_v19 = vpack.c.bf16 %v805_v16, %v801_v15  ;;  %v864_v15 = vld [vmem:[#allocation10 + $0x3c8] sm:$0xff] }
 0x136   :  { %441 = vmatprep.mubr.f32.mxu1 %v6856_v0  ;;  %4859 = vmatpush1.bf16.msra.mxu1 %v4858_v46  ;;  %v846_v46 = vld [vmem:[#allocation10 + $0x338] sm:$0xff]  ;;  %v868_v16 = vld [vmem:[#allocation10 + $0x3e8] sm:$0xff] }
 0x137   :  { %4861 = vmatprep.subr.bf16.mxu1 %v4860_v47  ;;  %v839_v47 = vld [vmem:[#allocation10 + $0x300] sm:$0xff]  ;;  %v4900_v49 = vpack.c.bf16 %v846_v46, %v842_v44  ;;  %v4528_v18 = vpack.c.bf16 %v868_v16, %v864_v15 }
 0x138   :  { %v4518_v50 = vpack.c.bf16 %v843_v48, %v839_v47  ;;  %v6133_v15 = vld [vmem:[#allocation10 + $0x460] sm:$0xff] }
 0x139   :  { %4092 = vmatmul.mubr.msk.f32.gmra.mrb[12].mxu1 %vm263_vm5, %v215_v29  ;;  %v826_v29 = vld [vmem:[#allocation10 + $0x298] sm:$0xff] }
 0x13a   :  { %447 = vmatprep.mubr.f32.mxu1 %v6856_v0  ;;  %4863 = vmatpush1.bf16.msra.mxu1 %v4862_v52  ;;  %v4892_v34 = vpack.c.bf16 %v830_v30, %v826_v29  ;;  %v845_v52 = vld [vmem:[#allocation10 + $0x330] sm:$0xff]  ;;  %v874_v29 = vld [vmem:[#allocation10 + $0x418] sm:$0xff]  ;;  %v4532_v30 = vpack.c.bf16 %v876_v28, %v872_v27  ;;  %v6144_v28 = vld [vmem:[#allocation10 + $0x488] sm:$0xff] }
 0x13b   :  { %4865 = vmatprep.subr.bf16.mxu1 %v4864_v53  ;;  %v4902_v53 = vpack.c.bf16 %v845_v52, %v841_v51  ;;  %4519 = vmatpush1.bf16.msra.mxu0 %v4518_v50  ;;  %v6142_v27 = vld [vmem:[#allocation10 + $0x470] sm:$0xff] }
 0x13c   :  { %4521 = vmatprep.subr.bf16.mxu0 %v4520_v57 }
 0x13d   :  { %4093 = vmatmul.mubr.msk.f32.gmra.mrb[14].mxu1 %vm263_vm5, %v216_v32  ;;  %v834_v32 = vld [vmem:[#allocation10 + $0x2d8] sm:$0xff] }
 0x13e   :  { %4867 = vmatpush1.bf16.msra.mxu1 %v4866_v58  ;;  %v4896_v39 = vpack.c.bf16 %v838_v37, %v834_v32  ;;  %v854_v58 = vld [vmem:[#allocation10 + $0x378] sm:$0xff]  ;;  %v6110_v32 = vsub.s32 0, %v6107_v36 }
 0x13f   :  { %4869 = vmatprep.subr.bf16.mxu1 %v4868_v59  ;;  %v847_v59 = vld [vmem:[#allocation10 + $0x340] sm:$0xff]  ;;  %v4904_v61 = vpack.c.bf16 %v854_v58, %v850_v56  ;;  %v241_v37 = vld [vmem:[#allocation9] sm:$0xf] }
 0x140   :  { %v4522_v62 = vpack.c.bf16 %v851_v60, %v847_v59  ;;  %6876 = vst [vmem:[#allocation26_spill] sm:$0xff] %v6110_v32  ;;  %v6857_v59 = vsub.s32 3, %v6107_v36  ;;  %v871_v60 = vld [vmem:[#allocation10 + $0x400] sm:$0xff] }
 0x142   :  { %4871 = vmatpush1.bf16.msra.mxu1 %v4870_v1  ;;  %v853_v1 = vld [vmem:[#allocation10 + $0x370] sm:$0xff]  ;;  %4523 = vmatpush1.bf16.msra.mxu0 %v4522_v62 }
 0x143   :  { %4873 = vmatprep.subr.bf16.mxu1 %v4872_v2  ;;  %v4906_v2 = vpack.c.bf16 %v853_v1, %v849_v63  ;;  %4525 = vmatprep.subr.bf16.mxu0 %v4524_v6  ;;  %v873_v1 = vld [vmem:[#allocation10 + $0x410] sm:$0xff]  ;;  %v884_v6 = vld [vmem:[#allocation10 + $0x468] sm:$0xff] }
 0x146   :  { %4875 = vmatpush1.bf16.msra.mxu1 %v4874_v7  ;;  %v862_v7 = vld [vmem:[#allocation10 + $0x3b8] sm:$0xff] }
 0x147   :  { %4877 = vmatprep.subr.bf16.mxu1 %v4876_v8  ;;  %v855_v8 = vld [vmem:[#allocation10 + $0x380] sm:$0xff]  ;;  %v4908_v10 = vpack.c.bf16 %v862_v7, %v858_v5  ;;  %v882_v7 = vld [vmem:[#allocation10 + $0x458] sm:$0xff] }
 0x148   :  { %v4526_v11 = vpack.c.bf16 %v859_v9, %v855_v8  ;;  %v886_v8 = vld [vmem:[#allocation10 + $0x478] sm:$0xff] }
 0x14a   :  { %4879 = vmatpush1.bf16.msra.mxu1 %v4878_v13  ;;  %v861_v13 = vld [vmem:[#allocation10 + $0x3b0] sm:$0xff]  ;;  %4527 = vmatpush1.bf16.msra.mxu0 %v4526_v11 }
 0x14b   :  { %4881 = vmatprep.subr.bf16.mxu1 %v4880_v14  ;;  %v4910_v14 = vpack.c.bf16 %v861_v13, %v857_v12  ;;  %4529 = vmatprep.subr.bf16.mxu0 %v4528_v18  ;;  %v6129_v12 = vrot.slane %v241_v37, %v6117_v55  ;;  %v956_v55 = vld [vmem:[#allocation10 + $0x6a8] sm:$0xff] }
 0x14e   :  { %4883 = vmatpush1.bf16.msra.mxu1 %v4882_v19  ;;  %v870_v19 = vld [vmem:[#allocation10 + $0x3f8] sm:$0xff] }
 0x14f   :  { %4885 = vmatprep.subr.bf16.mxu1 %v4884_v24  ;;  %v863_v24 = vld [vmem:[#allocation10 + $0x3c0] sm:$0xff]  ;;  %v4912_v21 = vpack.c.bf16 %v870_v19, %v866_v17  ;;  %v6137_v19 = vrot.slane %v241_v37, %v6857_v59  ;;  %v937_v59 = vld [vmem:[#allocation10 + $0x610] sm:$0xff] }
 0x150   :  { %v4530_v25 = vpack.c.bf16 %v867_v20, %v863_v24  ;;  %v6139_v20 = vld [vmem:[#allocation10 + $0x450] sm:$0xff] }
 0x152   :  { %4887 = vmatpush1.bf16.msra.mxu1 %v4886_v23  ;;  %v869_v23 = vld [vmem:[#allocation10 + $0x3f0] sm:$0xff]  ;;  %4531 = vmatpush1.bf16.msra.mxu0 %v4530_v25 }
 0x153   :  { %4889 = vmatprep.subr.bf16.mxu1 %v4888_v26  ;;  %v4914_v26 = vpack.c.bf16 %v869_v23, %v865_v22  ;;  %4533 = vmatprep.subr.bf16.mxu0 %v4532_v30  ;;  %v4536_v23 = vpack.c.bf16 %v884_v6, %v6120_v3  ;;  %v900_v6 = vld [vmem:[#allocation10 + $0x4e8] sm:$0xff] }
 0x156   :  { %4891 = vmatpush1.bf16.msra.mxu1 %v4890_v31  ;;  %v878_v31 = vld [vmem:[#allocation10 + $0x438] sm:$0xff] }
 0x157   :  { %4893 = vmatprep.subr.bf16.mxu1 %v4892_v34  ;;  %v4916_v34 = vpack.c.bf16 %v878_v31, %v874_v29 }
 0x15a   :  { %4895 = vmatpush1.bf16.msra.mxu1 %v4894_v38  ;;  %v6858_v38 = vsub.s32 1, %v6107_v36 }
 0x15b   :  { %4897 = vmatprep.subr.bf16.mxu1 %v4896_v39  ;;  %v246_v39 = vrot.slane %v241_v37, %v6110_v32  ;;  %v954_v32 = vld [vmem:[#allocation10 + $0x698] sm:$0xff] }
 0x15c   :  { %v250_v40 = vrot.slane %v241_v37, %v6858_v38  ;;  %v6151_v37 = vld [vmem:[#allocation10 + $0x4a8] sm:$0xff] }
 0x15e   :  { %4899 = vmatpush1.bf16.msra.mxu1 %v4898_v42 }
 0x15f   :  { %4901 = vmatprep.subr.bf16.mxu1 %v4900_v49 }
 0x162   :  { %4903 = vmatpush1.bf16.msra.mxu1 %v4902_v53 }
 0x163   :  { %4905 = vmatprep.subr.bf16.mxu1 %v4904_v61  ;;  %v875_v61 = vld [vmem:[#allocation10 + $0x420] sm:$0xff] }
 0x164   :  { %v4534_v13 = vpack.c.bf16 %v875_v61, %v871_v60  ;;  %v4540_v60 = vpack.c.bf16 %v6151_v37, %v6144_v28 }
 0x166   :  { %4907 = vmatpush1.bf16.msra.mxu1 %v4906_v2  ;;  %v877_v2 = vld [vmem:[#allocation10 + $0x430] sm:$0xff] }
 0x167   :  { %4909 = vmatprep.subr.bf16.mxu1 %v4908_v10  ;;  %v4918_v24 = vpack.c.bf16 %v877_v2, %v873_v1  ;;  %v6184_v1 = vld [vmem:[#allocation10 + $0x4c8] sm:$0xff] }
 0x168   :  { %v4544_v28 = vpack.c.bf16 %v900_v6, %v6184_v1  ;;  %v912_v6 = vld [vmem:[#allocation10 + $0x548] sm:$0xff] }
 0x16a   :  { %4911 = vmatpush1.bf16.msra.mxu1 %v4910_v14  ;;  %v6131_v14 = vld [vmem:[#allocation10 + $0x440] sm:$0xff] }
 0x16b   :  { %4913 = vmatprep.subr.bf16.mxu1 %v4912_v21 }
 0x16e   :  { %4915 = vmatpush1.bf16.msra.mxu1 %v4914_v26  ;;  %v4920_v26 = vpack.c.bf16 %v886_v8, %v882_v7  ;;  %v898_v7 = vld [vmem:[#allocation10 + $0x4d8] sm:$0xff] }
 0x16f   :  { %4917 = vmatprep.subr.bf16.mxu1 %v4916_v34  ;;  %v4538_v34 = vpack.c.bf16 %v6133_v15, %v6131_v14  ;;  %v902_v8 = vld [vmem:[#allocation10 + $0x4f8] sm:$0xff]  ;;  %v6199_v15 = vld [vmem:[#allocation10 + $0x4c0] sm:$0xff] }
 0x1f4   :  { %v342_v41 = vpop.f32.mrb[0].mxu1 }
 0x1f5   :  { %v343_v42 = vadd.f32 %v342_v41, %v246_v39  ;;  %v344_v43 = vpop.f32.mrb[1].mxu1 }
 0x1f6   :  { %v345_v33 = vadd.f32 %v344_v43, %v250_v40  ;;  %v894_v43 = vld [vmem:[#allocation10 + $0x4b8] sm:$0xff] }
 0x1f7   :  { %v454_v44 = vmax.f32 %v343_v42, 0.0 }
 0x1f8   :  { %v455_v45 = vmax.f32 %v345_v33, 0.0  ;;  %v348_v46 = vpop.f32.mrb[2].mxu1 }
 0x1f9   :  { %v511_v47 = vrot.slane %v454_v44, 7  ;;  %v349_v48 = vadd.f32 %v348_v46, %v246_v39  ;;  %v350_v49 = vpop.f32.mrb[3].mxu1 }
 0x1fa   :  { %v512_v50 = vrot.slane %v455_v45, 7  ;;  %v351_v51 = vadd.f32 %v350_v49, %v250_v40 }
 0x1fb   :  { %559 = vst [vmem:[#allocation3] sm:$0xfe] %v511_v47  ;;  %v458_v52 = vmax.f32 %v349_v48, 0.0  ;;  %v4922_v48 = vpack.c.bf16 %v6142_v27, %v6139_v20 }
 0x1fc   :  { %560 = vst [vmem:[#allocation3 + $0x8] sm:$0xfe] %v512_v50  ;;  %v459_v53 = vmax.f32 %v351_v51, 0.0  ;;  %v354_v54 = vpop.f32.mrb[4].mxu1 }
 0x1fd   :  { %v515_v56 = vrot.slane %v458_v52, 7  ;;  %v355_v57 = vadd.f32 %v354_v54, %v246_v39  ;;  %v356_v58 = vpop.f32.mrb[5].mxu1  ;;  %v6171_v54 = vld [vmem:[#allocation10 + $0x4a0] sm:$0xff] }
 0x1fe   :  { %v517_v62 = vrot.slane %v459_v53, 7  ;;  %v357_v63 = vadd.f32 %v356_v58, %v250_v40  ;;  %v6169_v53 = vld [vmem:[#allocation10 + $0x480] sm:$0xff] }
 0x1ff   :  { %v6123_v4 = vsel %vm510_vm6, %v511_v47, %v515_v56  ;;  %567 = vst [vmem:[#allocation3 + $0x40] sm:$0x1] %v515_v56  ;;  %v462_v5 = vmax.f32 %v355_v57, 0.0  ;;  %v4542_v20 = vpack.c.bf16 %v6171_v54, %v6169_v53  ;;  %v903_v53 = vld [vmem:[#allocation10 + $0x500] sm:$0xff] }
 0x200   :  { %v6126_v9 = vsel %vm510_vm6, %v512_v50, %v517_v62  ;;  %568 = vst [vmem:[#allocation3 + $0x48] sm:$0x1] %v517_v62  ;;  %v463_v10 = vmax.f32 %v357_v63, 0.0  ;;  %v360_v11 = vpop.f32.mrb[6].mxu1  ;;  %v6865_v35 = vrot.slane %v6123_v4, 1  ;;  %v688_v52 = vrot.slane %v6123_v4, 2 }
 0x201   :  { %v523_v16 = vrot.slane %v462_v5, 7  ;;  %v361_v17 = vadd.f32 %v360_v11, %v246_v39  ;;  %v362_v18 = vpop.f32.mrb[7].mxu1  ;;  %v6153_v39 = vld [vmem:[#allocation10 + $0x498] sm:$0xff]  ;;  %v6866_v44 = vrot.slane %v6126_v9, 1  ;;  %v889_v62 = vld [vmem:[#allocation10 + $0x490] sm:$0xff]  ;;  %v907_v54 = vld [vmem:[#allocation10 + $0x520] sm:$0xff] }
 0x202   :  { %v524_v21 = vrot.slane %v463_v10, 7  ;;  %v363_v25 = vadd.f32 %v362_v18, %v250_v40  ;;  %v583_v22 = vld [vmem:[#allocation3] sm:$0xff]  ;;  %v4924_v61 = vpack.c.bf16 %v894_v43, %v6153_v39  ;;  %v893_v63 = vld [vmem:[#allocation10 + $0x4b0] sm:$0xff] }
 0x203   :  { %571 = vst [vmem:[#allocation3 + $0x60] sm:$0xfe] %v523_v16  ;;  %v466_v29 = vmax.f32 %v361_v17, 0.0  ;;  %v6146_v30 = vld [vmem:[#allocation3 + $0x8] sm:$0xff]  ;;  %v631_v31 = vrot.slane %v583_v22, 1  ;;  %v687_v42 = vrot.slane %v583_v22, 2 }
 0x204   :  { %572 = vst [vmem:[#allocation3 + $0x68] sm:$0xfe] %v524_v21  ;;  %v467_v40 = vmax.f32 %v363_v25, 0.0  ;;  %v431_v41 = vpop.f32.mrb[8].mxu1  ;;  %1597 = vmatprep.mubr.f32.mxu0 %v6146_v30  ;;  %2131 = vmatprep.mubr.f32.mxu1 %v6146_v30  ;;  %v634_v33 = vrot.slane %v6146_v30, 1  ;;  %v6203_v17 = vld [vmem:[#allocation10 + $0x4d0] sm:$0xff] }
 0x205   :  { %v527_v45 = vrot.slane %v466_v29, 7  ;;  %v432_v46 = vadd.f32 %v431_v41, %v6129_v12  ;;  %v433_v47 = vpop.f32.mrb[9].mxu1  ;;  %1598 = vmatmul.mubr.f32.vlgmr.msra.gmra.mrb[0].mxu0 %v583_v22  ;;  %2132 = vmatmul.mubr.f32.vlgmr.msra.gmra.mrb[16].mxu1 %v583_v22  ;;  %v6165_v49 = vsel %vm162_vm2, %v631_v31, %v6865_v35  ;;  %v6194_v10 = vsel %vm173_vm3, %v687_v42, %v688_v52  ;;  %v6210_v22 = vld [vmem:[#allocation10 + $0x4f0] sm:$0xff]  ;;  %v908_v31 = vld [vmem:[#allocation10 + $0x528] sm:$0xff] }
 0x206   :  { %v529_v50 = vrot.slane %v467_v40, 7  ;;  %v434_v51 = vadd.f32 %v433_v47, %v6137_v19  ;;  %4535 = vmatpush1.bf16.msra.mxu0 %v4534_v13  ;;  %4919 = vmatpush1.bf16.msra.mxu1 %v4918_v24  ;;  %v6176_v56 = vsel %vm162_vm2, %v634_v33, %v6866_v44  ;;  %v4928_v29 = vpack.c.bf16 %v902_v8, %v898_v7  ;;  %v910_v40 = vld [vmem:[#allocation10 + $0x538] sm:$0xff]  ;;  %v949_v35 = vld [vmem:[#allocation10 + $0x670] sm:$0xff]  ;;  %v952_v44 = vld [vmem:[#allocation10 + $0x688] sm:$0xff] }
 0x207   :  { %v6179_v57 = vsel %vm510_vm6, %v523_v16, %v527_v45  ;;  %579 = vst [vmem:[#allocation3 + $0xa0] sm:$0x1] %v527_v45  ;;  %v456_v58 = vmax.f32 %v432_v46, 0.0  ;;  %4537 = vmatprep.subr.bf16.mxu0 %v4536_v23  ;;  %4921 = vmatprep.subr.bf16.mxu1 %v4920_v26  ;;  %v6201_v16 = vld [vmem:[#allocation10 + $0x4e0] sm:$0xff]  ;;  %v6212_v23 = vld [vmem:[#allocation10 + $0x508] sm:$0xff]  ;;  %v4930_v47 = vpack.c.bf16 %v6210_v22, %v6203_v17 }
 0x208   :  { %v6187_v2 = vsel %vm510_vm6, %v524_v21, %v529_v50  ;;  %580 = vst [vmem:[#allocation3 + $0xa8] sm:$0x1] %v529_v50  ;;  %v457_v3 = vmax.f32 %v434_v51, 0.0  ;;  %v437_v5 = vpop.f32.mrb[10].mxu1  ;;  %1603 = vmatprep.mubr.f32.mxu0 %v6126_v9  ;;  %2137 = vmatprep.mubr.f32.mxu1 %v6126_v9  ;;  %v4926_v21 = vpack.c.bf16 %v893_v63, %v889_v62  ;;  %v6863_v33 = vrot.slane %v6179_v57, 1  ;;  %v6255_v17 = vld [vmem:[#allocation10 + $0x540] sm:$0xff] }
 0x209   :  { %v513_v11 = vrot.slane %v456_v58, 7  ;;  %v438_v13 = vadd.f32 %v437_v5, %v6129_v12  ;;  %v439_v14 = vpop.f32.mrb[11].mxu1  ;;  %1604 = vmatmul.mubr.f32.gmra.mrb[2].mxu0 %v6123_v4  ;;  %2138 = vmatmul.mubr.f32.gmra.mrb[18].mxu1 %v6123_v4  ;;  %v6864_v37 = vrot.slane %v6187_v2, 1  ;;  %v4546_v46 = vpack.c.bf16 %v6201_v16, %v6199_v15  ;;  %v909_v5 = vld [vmem:[#allocation10 + $0x530] sm:$0xff] }
 0x20a   :  { %v514_v18 = vrot.slane %v457_v3, 7  ;;  %v440_v24 = vadd.f32 %v439_v14, %v6137_v19  ;;  %4539 = vmatpush1.bf16.msra.mxu0 %v4538_v34  ;;  %4923 = vmatpush1.bf16.msra.mxu1 %v4922_v48  ;;  %v6208_v25 = vld [vmem:[#allocation3 + $0x60] sm:$0xff]  ;;  %v4548_v63 = vpack.c.bf16 %v908_v31, %v6212_v23  ;;  %v905_v3 = vld [vmem:[#allocation10 + $0x510] sm:$0xff]  ;;  %v4550_v22 = vpack.c.bf16 %v907_v54, %v903_v53 }
 0x20b   :  { %561 = vst [vmem:[#allocation3 + $0x10] sm:$0xfe] %v513_v11  ;;  %v460_v26 = vmax.f32 %v438_v13, 0.0  ;;  %4541 = vmatprep.subr.bf16.mxu0 %v4540_v60  ;;  %4925 = vmatprep.subr.bf16.mxu1 %v4924_v61  ;;  %v6214_v27 = vld [vmem:[#allocation3 + $0x68] sm:$0xff]  ;;  %v6217_v34 = vld [vmem:[#allocation10 + $0x518] sm:$0xff]  ;;  %v651_v43 = vrot.slane %v6208_v25, 1  ;;  %v4934_v23 = vpack.c.bf16 %v909_v5, %v905_v3 }
 0x20c   :  { %562 = vst [vmem:[#allocation3 + $0x18] sm:$0xfe] %v514_v18  ;;  %v461_v39 = vmax.f32 %v440_v24, 0.0  ;;  %1609 = vmatprep.mubr.f32.mxu0 %v6214_v27  ;;  %2143 = vmatprep.mubr.f32.mxu1 %v6214_v27  ;;  %v443_v41 = vpop.f32.mrb[12].mxu1  ;;  %v654_v42 = vrot.slane %v6214_v27, 1  ;;  %v4932_v1 = vpack.c.bf16 %v910_v40, %v6217_v34  ;;  %v914_v13 = vld [vmem:[#allocation10 + $0x558] sm:$0xff] }
 0x20d   :  { %v519_v45 = vrot.slane %v460_v26, 7  ;;  %1610 = vmatmul.mubr.f32.gmra.mrb[4].mxu0 %v6208_v25  ;;  %2144 = vmatmul.mubr.f32.gmra.mrb[20].mxu1 %v6208_v25  ;;  %v444_v48 = vadd.f32 %v443_v41, %v6129_v12  ;;  %v445_v50 = vpop.f32.mrb[13].mxu1  ;;  %v6241_v61 = vsel %vm162_vm2, %v651_v43, %v6863_v33  ;;  %v918_v14 = vld [vmem:[#allocation10 + $0x578] sm:$0xff]  ;;  %v6257_v24 = vld [vmem:[#allocation10 + $0x560] sm:$0xff]  ;;  %v913_v26 = vld [vmem:[#allocation10 + $0x550] sm:$0xff] }
 0x20e   :  { %v521_v51 = vrot.slane %v461_v39, 7  ;;  %4543 = vmatpush1.bf16.msra.mxu0 %v4542_v20  ;;  %4927 = vmatpush1.bf16.msra.mxu1 %v4926_v21  ;;  %v446_v58 = vadd.f32 %v445_v50, %v6137_v19  ;;  %v6236_v60 = vsel %vm162_vm2, %v654_v42, %v6864_v37  ;;  %v4936_v41 = vpack.c.bf16 %v918_v14, %v914_v13  ;;  %v920_v42 = vld [vmem:[#allocation10 + $0x588] sm:$0xff]  ;;  %v6270_v50 = vld [vmem:[#allocation10 + $0x580] sm:$0xff]  ;;  %v921_v3 = vld [vmem:[#allocation10 + $0x590] sm:$0xff] }
 0x20f   :  { %v6244_v62 = vsel %vm510_vm6, %v513_v11, %v519_v45  ;;  %569 = vst [vmem:[#allocation3 + $0x50] sm:$0x1] %v519_v45  ;;  %4545 = vmatprep.subr.bf16.mxu0 %v4544_v28  ;;  %4929 = vmatprep.subr.bf16.mxu1 %v4928_v29  ;;  %v464_v7 = vmax.f32 %v444_v48, 0.0  ;;  %v916_v11 = vld [vmem:[#allocation10 + $0x568] sm:$0xff]  ;;  %v917_v28 = vld [vmem:[#allocation10 + $0x570] sm:$0xff]  ;;  %v922_v45 = vld [vmem:[#allocation10 + $0x598] sm:$0xff]  ;;  %v4554_v48 = vpack.c.bf16 %v6257_v24, %v6255_v17 }
 0x210   :  { %v6249_v8 = vsel %vm510_vm6, %v514_v18, %v521_v51  ;;  %570 = vst [vmem:[#allocation3 + $0x58] sm:$0x1] %v521_v51  ;;  %1615 = vmatprep.mubr.f32.mxu0 %v6187_v2  ;;  %2149 = vmatprep.mubr.f32.mxu1 %v6187_v2  ;;  %v465_v15 = vmax.f32 %v446_v58, 0.0  ;;  %v449_v16 = vpop.f32.mrb[14].mxu1  ;;  %v4552_v40 = vpack.c.bf16 %v916_v11, %v912_v6  ;;  %v6272_v51 = vld [vmem:[#allocation10 + $0x5a0] sm:$0xff]  ;;  %v925_v5 = vld [vmem:[#allocation10 + $0x5b0] sm:$0xff] }
 0x211   :  { %1616 = vmatmul.mubr.f32.gmra.mrb[6].mxu0 %v6179_v57  ;;  %2150 = vmatmul.mubr.f32.gmra.mrb[22].mxu1 %v6179_v57  ;;  %v525_v18 = vrot.slane %v464_v7, 7  ;;  %v450_v20 = vadd.f32 %v449_v16, %v6129_v12  ;;  %v451_v21 = vpop.f32.mrb[15].mxu1  ;;  %v924_v12 = vld [vmem:[#allocation10 + $0x5a8] sm:$0xff]  ;;  %v6861_v58 = vrot.slane %v6249_v8, 1  ;;  %v6860_v11 = vrot.slane %v6244_v62, 1  ;;  %v934_v16 = vld [vmem:[#allocation10 + $0x5f8] sm:$0xff] }
 0x212   :  { %4547 = vmatpush1.bf16.msra.mxu0 %v4546_v46  ;;  %4931 = vmatpush1.bf16.msra.mxu1 %v4930_v47  ;;  %v526_v29 = vrot.slane %v465_v15, 7  ;;  %v452_v31 = vadd.f32 %v451_v21, %v6137_v19  ;;  %v6261_v34 = vld [vmem:[#allocation3 + $0x10] sm:$0xff]  ;;  %v926_v46 = vld [vmem:[#allocation10 + $0x5b8] sm:$0xff]  ;;  %v6288_v21 = vld [vmem:[#allocation3 + $0x48] sm:$0x3]  ;;  %v694_v38 = vrot.slane %v6244_v62, 2 }
 0x213   :  { %4549 = vmatprep.subr.bf16.mxu0 %v4548_v63  ;;  %v6263_v39 = vld [vmem:[#allocation3 + $0x18] sm:$0xff]  ;;  %4933 = vmatprep.subr.bf16.mxu1 %v4932_v1  ;;  %573 = vst [vmem:[#allocation3 + $0x70] sm:$0xfe] %v525_v18  ;;  %v468_v43 = vmax.f32 %v450_v20, 0.0  ;;  %v637_v47 = vrot.slane %v6261_v34, 1  ;;  %v4938_v63 = vpack.c.bf16 %v917_v28, %v913_v26  ;;  %v4556_v1 = vpack.c.bf16 %v924_v12, %v920_v42  ;;  %v928_v6 = vld [vmem:[#allocation10 + $0x5c8] sm:$0xff] }
 0x214   :  { %1686 = vmatprep.mubr.f32.mxu0 %v6263_v39  ;;  %2220 = vmatprep.mubr.f32.mxu1 %v6263_v39  ;;  %574 = vst [vmem:[#allocation3 + $0x78] sm:$0xfe] %v526_v29  ;;  %v469_v19 = vmax.f32 %v452_v31, 0.0  ;;  %v640_v54 = vrot.slane %v6263_v39, 1  ;;  %v4940_v13 = vpack.c.bf16 %v926_v46, %v922_v45  ;;  %v932_v14 = vld [vmem:[#allocation10 + $0x5e8] sm:$0xff]  ;;  %v930_v15 = vld [vmem:[#allocation10 + $0x5d8] sm:$0xff]  ;;  %v4558_v26 = vpack.c.bf16 %v6272_v51, %v6270_v50 }
 0x215   :  { %v531_v53 = vrot.slane %v468_v43, 7  ;;  %v4942_v28 = vpack.c.bf16 %v925_v5, %v921_v3  ;;  %v927_v31 = vld [vmem:[#allocation10 + $0x5c0] sm:$0xff]  ;;  %v4944_v42 = vpack.c.bf16 %v934_v16, %v930_v15  ;;  %v929_v12 = vld [vmem:[#allocation10 + $0x5d0] sm:$0xff]  ;;  %v701_v51 = vrot.slane %v6288_v21, 2  ;;  %v942_v3 = vld [vmem:[#allocation10 + $0x638] sm:$0xff] }
 0x216   :  { %4551 = vmatpush1.bf16.msra.mxu0 %v4550_v22  ;;  %4935 = vmatpush1.bf16.msra.mxu1 %v4934_v23  ;;  %v533_v7 = vrot.slane %v469_v19, 7  ;;  %v6283_v24 = vsel %vm162_vm2, %v640_v54, %v6861_v58  ;;  %v6290_v22 = vld [vmem:[#allocation3 + $0x40] sm:$0x3]  ;;  %v6295_v23 = vsel %vm162_vm2, %v637_v47, %v6860_v11  ;;  %v933_v43 = vld [vmem:[#allocation10 + $0x5f0] sm:$0xff]  ;;  %v936_v19 = vld [vmem:[#allocation10 + $0x608] sm:$0xff]  ;;  %v693_v47 = vrot.slane %v6261_v34, 2 }
 0x217   :  { %4553 = vmatprep.subr.bf16.mxu0 %v4552_v40  ;;  %4937 = vmatprep.subr.bf16.mxu1 %v4936_v41  ;;  %v6278_v17 = vsel %vm510_vm6, %v525_v18, %v531_v53  ;;  %581 = vst [vmem:[#allocation3 + $0xb0] sm:$0x1] %v531_v53  ;;  %v690_v18 = vrot.slane %v6146_v30, 2  ;;  %v931_v40 = vld [vmem:[#allocation10 + $0x5e0] sm:$0xff]  ;;  %v4560_v41 = vpack.c.bf16 %v932_v14, %v928_v6  ;;  %v691_v30 = vrot.slane %v6126_v9, 2  ;;  %v940_v54 = vld [vmem:[#allocation10 + $0x628] sm:$0xff] }
 0x218   :  { %v6286_v20 = vsel %vm510_vm6, %v526_v29, %v533_v7  ;;  %582 = vst [vmem:[#allocation3 + $0xb8] sm:$0x1] %v533_v7  ;;  %v6859_v29 = vrot.slane %v6278_v17, 1  ;;  %v699_v53 = vrot.slane %v6290_v22, 2  ;;  %v711_v7 = vrot.slane %v6187_v2, 2  ;;  %v950_v11 = vld [vmem:[#allocation10 + $0x678] sm:$0xff] }
 0x219   :  { %v6862_v46 = vrot.slane %v6286_v20, 1  ;;  %v6313_v6 = vsel %vm173_vm3, %v690_v18, %v691_v30  ;;  %v6317_v14 = vld [vmem:[#allocation3 + $0xa8] sm:$0x3]  ;;  %v6319_v15 = vld [vmem:[#allocation3 + $0xa0] sm:$0x3]  ;;  %v6327_v0 = vsel %vm173_vm3, %v691_v30, %v701_v51  ;;  %v707_v30 = vrot.slane %v6208_v25, 2 }
 0x21a   :  { %4555 = vmatpush1.bf16.msra.mxu0 %v4554_v48  ;;  %4939 = vmatpush1.bf16.msra.mxu1 %v4938_v63  ;;  %v6301_v45 = vld [vmem:[#allocation3 + $0x70] sm:$0xff]  ;;  %v938_v63 = vld [vmem:[#allocation10 + $0x618] sm:$0xff]  ;;  %v6332_v18 = vsel %vm173_vm3, %v688_v52, %v699_v53  ;;  %v4564_v51 = vpack.c.bf16 %v940_v54, %v936_v19  ;;  %v594_v58 = vld [vmem:[#allocation3 + $0x58] sm:$0x3]  ;;  %v6348_v25 = vsel %vm173_vm3, %v693_v47, %v694_v38  ;;  %v697_v36 = vrot.slane %v6249_v8, 2 }
 0x21b   :  { %4557 = vmatprep.subr.bf16.mxu0 %v4556_v1  ;;  %4941 = vmatprep.subr.bf16.mxu1 %v4940_v13  ;;  %v6306_v50 = vld [vmem:[#allocation3 + $0x78] sm:$0xff]  ;;  %v657_v48 = vrot.slane %v6301_v45, 1  ;;  %v710_v1 = vrot.slane %v6214_v27, 2  ;;  %v4562_v13 = vpack.c.bf16 %v931_v40, %v927_v31  ;;  %v4946_v27 = vpack.c.bf16 %v933_v43, %v929_v12  ;;  %v935_v31 = vld [vmem:[#allocation10 + $0x600] sm:$0xff]  ;;  %6878 = vst [vmem:[#allocation28_spill] sm:$0xff] %v6348_v25 }
 0x21c   :  { %v660_v5 = vrot.slane %v6306_v50, 1  ;;  %v939_v40 = vld [vmem:[#allocation10 + $0x620] sm:$0xff]  ;;  %v4948_v52 = vpack.c.bf16 %v942_v3, %v938_v63  ;;  %v941_v53 = vld [vmem:[#allocation10 + $0x630] sm:$0xff]  ;;  %v708_v43 = vrot.slane %v6179_v57, 2  ;;  %v593_v19 = vld [vmem:[#allocation3 + $0x50] sm:$0x3] }
 0x21d   :  { %v6324_v16 = vsel %vm162_vm2, %v657_v48, %v6859_v29  ;;  %v6342_v12 = vsel %vm173_vm3, %v710_v1, %v711_v7  ;;  %v946_v29 = vld [vmem:[#allocation10 + $0x658] sm:$0xff]  ;;  %v696_v63 = vrot.slane %v6263_v39, 2  ;;  %v4566_v3 = vpack.c.bf16 %v939_v40, %v935_v31  ;;  %v945_v37 = vld [vmem:[#allocation10 + $0x650] sm:$0xff] }
 0x21e   :  { %4559 = vmatpush1.bf16.msra.mxu0 %v4558_v26  ;;  %4943 = vmatpush1.bf16.msra.mxu1 %v4942_v28  ;;  %v6338_v48 = vsel %vm162_vm2, %v660_v5, %v6862_v46  ;;  %v944_v26 = vld [vmem:[#allocation10 + $0x648] sm:$0xff]  ;;  %v721_v5 = vrot.slane %v6317_v14, 2  ;;  %v719_v46 = vrot.slane %v6319_v15, 2  ;;  %v6351_v54 = vsel %vm173_vm3, %v707_v30, %v708_v43 }
 0x21f   :  { %4561 = vmatprep.subr.bf16.mxu0 %v4560_v41  ;;  %4945 = vmatprep.subr.bf16.mxu1 %v4944_v42  ;;  %v948_v28 = vld [vmem:[#allocation10 + $0x668] sm:$0xff]  ;;  %v943_v41 = vld [vmem:[#allocation10 + $0x640] sm:$0xff]  ;;  %v4950_v1 = vpack.c.bf16 %v941_v53, %v937_v59  ;;  %v4952_v47 = vpack.c.bf16 %v950_v11, %v946_v29  ;;  %v606_v25 = vld [vmem:[#allocation3 + $0xb8] sm:$0x3]  ;;  %v6362_v31 = vsel %vm173_vm3, %v696_v63, %v697_v36  ;;  %v703_v40 = vrot.slane %v593_v19, 2 }
 0x220   :  { %v947_v42 = vld [vmem:[#allocation10 + $0x660] sm:$0xff]  ;;  %v4568_v33 = vpack.c.bf16 %v948_v28, %v944_v26  ;;  %v6356_v30 = vsel %vm173_vm3, %v711_v7, %v721_v5  ;;  %v6359_v39 = vsel %vm173_vm3, %v708_v43, %v719_v46  ;;  %v958_v59 = vld [vmem:[#allocation10 + $0x6b8] sm:$0xff]  ;;  %v717_v11 = vrot.slane %v6286_v20, 2  ;;  %v960_v19 = vld [vmem:[#allocation10 + $0x6c8] sm:$0xff] }
 0x221   :  { %v4570_v29 = vpack.c.bf16 %v947_v42, %v943_v41  ;;  %v713_v7 = vrot.slane %v6301_v45, 2  ;;  %v714_v46 = vrot.slane %v6278_v17, 2  ;;  %v4572_v53 = vpack.c.bf16 %v956_v55, %v952_v44  ;;  %v951_v26 = vld [vmem:[#allocation10 + $0x680] sm:$0xff]  ;;  %v953_v42 = vld [vmem:[#allocation10 + $0x690] sm:$0xff]  ;;  %v964_v55 = vld [vmem:[#allocation10 + $0x6e8] sm:$0xff] }
 0x222   :  { %4563 = vmatpush1.bf16.msra.mxu0 %v4562_v13  ;;  %4947 = vmatpush1.bf16.msra.mxu1 %v4946_v27  ;;  %v705_v13 = vrot.slane %v594_v58, 2  ;;  %v605_v27 = vld [vmem:[#allocation3 + $0xb0] sm:$0x3]  ;;  %v4954_v58 = vpack.c.bf16 %v949_v35, %v945_v37  ;;  %v955_v28 = vld [vmem:[#allocation10 + $0x6a0] sm:$0xff]  ;;  %v6372_v43 = vsel %vm173_vm3, %v694_v38, %v703_v40  ;;  %v725_v5 = vrot.slane %v606_v25, 2  ;;  %v962_v44 = vld [vmem:[#allocation10 + $0x6d8] sm:$0xff] }
 0x223   :  { %4565 = vmatprep.subr.bf16.mxu0 %v4564_v51  ;;  %4949 = vmatprep.subr.bf16.mxu1 %v4948_v52  ;;  %v716_v51 = vrot.slane %v6306_v50, 2  ;;  %v4956_v41 = vpack.c.bf16 %v958_v59, %v954_v32  ;;  %v723_v35 = vrot.slane %v605_v27, 2  ;;  %v966_v37 = vld [vmem:[#allocation10 + $0x6f8] sm:$0xff]  ;;  %v4574_v32 = vpack.c.bf16 %v955_v28, %v951_v26  ;;  %v961_v27 = vld [vmem:[#allocation10 + $0x6d0] sm:$0xff] }
 0x224   :  { %v6367_v52 = vsel %vm173_vm3, %v697_v36, %v705_v13  ;;  %v957_v36 = vld [vmem:[#allocation10 + $0x6b0] sm:$0xff]  ;;  %v6381_v38 = vsel %vm173_vm3, %v717_v11, %v725_v5  ;;  %v4576_v13 = vpack.c.bf16 %v964_v55, %v960_v19  ;;  %v4960_v59 = vpack.c.bf16 %v966_v37, %v962_v44  ;;  %v978_v19 = vld [vmem:[#allocation10 + $0x758] sm:$0xff]  ;;  %v975_v37 = vld [vmem:[#allocation10 + $0x740] sm:$0xff] }
 0x225   :  { %v6375_v63 = vsel %vm173_vm3, %v716_v51, %v717_v11  ;;  %v4958_v25 = vpack.c.bf16 %v957_v36, %v953_v42  ;;  %v965_v40 = vld [vmem:[#allocation10 + $0x6f0] sm:$0xff]  ;;  %v968_v51 = vld [vmem:[#allocation10 + $0x708] sm:$0xff]  ;;  %v974_v11 = vld [vmem:[#allocation10 + $0x738] sm:$0xff] }
 0x226   :  { %4567 = vmatpush1.bf16.msra.mxu0 %v4566_v3  ;;  %4951 = vmatpush1.bf16.msra.mxu1 %v4950_v1  ;;  %v6378_v3 = vsel %vm173_vm3, %v713_v7, %v714_v46  ;;  %v959_v1 = vld [vmem:[#allocation10 + $0x6c0] sm:$0xff]  ;;  %v972_v7 = vld [vmem:[#allocation10 + $0x728] sm:$0xff]  ;;  %v4962_v5 = vpack.c.bf16 %v965_v40, %v961_v27  ;;  %v986_v27 = vld [vmem:[#allocation10 + $0x798] sm:$0xff] }
 0x227   :  { %4569 = vmatprep.subr.bf16.mxu0 %v4568_v33  ;;  %4953 = vmatprep.subr.bf16.mxu1 %v4952_v47  ;;  %6879 = vst [vmem:[#allocation29_spill] sm:$0xff] %v6378_v3  ;;  %v6384_v33 = vsel %vm173_vm3, %v714_v46, %v723_v35  ;;  %v963_v47 = vld [vmem:[#allocation10 + $0x6e0] sm:$0xff]  ;;  %v970_v3 = vld [vmem:[#allocation10 + $0x718] sm:$0xff]  ;;  %v4580_v26 = vpack.c.bf16 %v972_v7, %v968_v51  ;;  %v976_v42 = vld [vmem:[#allocation10 + $0x748] sm:$0xff] }
 0x228   :  { %v4578_v46 = vpack.c.bf16 %v963_v47, %v959_v1  ;;  %v4964_v28 = vpack.c.bf16 %v974_v11, %v970_v3  ;;  %v980_v36 = vld [vmem:[#allocation10 + $0x768] sm:$0xff]  ;;  %v982_v35 = vld [vmem:[#allocation10 + $0x778] sm:$0xff]  ;;  %v977_v47 = vld [vmem:[#allocation10 + $0x750] sm:$0xff] }
 0x229   :  { %v4968_v1 = vpack.c.bf16 %v982_v35, %v978_v19  ;;  %v988_v3 = vld [vmem:[#allocation10 + $0x7a8] sm:$0xff]  ;;  %v990_v40 = vld [vmem:[#allocation10 + $0x7b8] sm:$0xff]  ;;  %v983_v11 = vld [vmem:[#allocation10 + $0x780] sm:$0xff] }
 0x22a   :  { %4571 = vmatpush1.bf16.msra.mxu0 %v4570_v29  ;;  %4955 = vmatpush1.bf16.msra.mxu1 %v4954_v58  ;;  %v967_v29 = vld [vmem:[#allocation10 + $0x700] sm:$0xff] }
 0x22b   :  { %4573 = vmatprep.subr.bf16.mxu0 %v4572_v53  ;;  %4957 = vmatprep.subr.bf16.mxu1 %v4956_v41  ;;  %v971_v58 = vld [vmem:[#allocation10 + $0x720] sm:$0xff]  ;;  %v969_v53 = vld [vmem:[#allocation10 + $0x710] sm:$0xff] }
 0x22c   :  { %v973_v41 = vld [vmem:[#allocation10 + $0x730] sm:$0xff]  ;;  %v4582_v55 = vpack.c.bf16 %v971_v58, %v967_v29  ;;  %v4972_v29 = vpack.c.bf16 %v990_v40, %v986_v27  ;;  %v991_v35 = vld [vmem:[#allocation10 + $0x7c0] sm:$0xff] }
 0x22d   :  { %v4966_v44 = vpack.c.bf16 %v973_v41, %v969_v53  ;;  %v985_v58 = vld [vmem:[#allocation10 + $0x790] sm:$0xff]  ;;  %v996_v53 = vld [vmem:[#allocation10 + $0x7e8] sm:$0xff]  ;;  %v994_v41 = vld [vmem:[#allocation10 + $0x7d8] sm:$0xff] }
 0x22e   :  { %4575 = vmatpush1.bf16.msra.mxu0 %v4574_v32  ;;  %4959 = vmatpush1.bf16.msra.mxu1 %v4958_v25  ;;  %v979_v32 = vld [vmem:[#allocation10 + $0x760] sm:$0xff]  ;;  %v4584_v25 = vpack.c.bf16 %v980_v36, %v976_v42  ;;  %v998_v42 = vld [vmem:[#allocation10 + $0x7f8] sm:$0xff] }
 0x22f   :  { %4577 = vmatprep.subr.bf16.mxu0 %v4576_v13  ;;  %4961 = vmatprep.subr.bf16.mxu1 %v4960_v59  ;;  %v981_v13 = vld [vmem:[#allocation10 + $0x770] sm:$0xff]  ;;  %v984_v59 = vld [vmem:[#allocation10 + $0x788] sm:$0xff]  ;;  %v4586_v51 = vpack.c.bf16 %v979_v32, %v975_v37  ;;  %v4976_v37 = vpack.c.bf16 %v998_v42, %v994_v41  ;;  %v1007_v42 = vld [vmem:[#allocation10 + $0x840] sm:$0xff] }
 0x230   :  { %v4970_v7 = vpack.c.bf16 %v981_v13, %v977_v47  ;;  %v993_v32 = vld [vmem:[#allocation10 + $0x7d0] sm:$0xff]  ;;  %v1004_v47 = vld [vmem:[#allocation10 + $0x828] sm:$0xff]  ;;  %v1002_v13 = vld [vmem:[#allocation10 + $0x818] sm:$0xff] }
 0x232   :  { %4579 = vmatpush1.bf16.msra.mxu0 %v4578_v46  ;;  %4963 = vmatpush1.bf16.msra.mxu1 %v4962_v5  ;;  %v987_v46 = vld [vmem:[#allocation10 + $0x7a0] sm:$0xff]  ;;  %v4588_v5 = vpack.c.bf16 %v988_v3, %v984_v59  ;;  %v1006_v59 = vld [vmem:[#allocation10 + $0x838] sm:$0xff] }
 0x233   :  { %4581 = vmatprep.subr.bf16.mxu0 %v4580_v26  ;;  %4965 = vmatprep.subr.bf16.mxu1 %v4964_v28  ;;  %v989_v26 = vld [vmem:[#allocation10 + $0x7b0] sm:$0xff]  ;;  %v992_v28 = vld [vmem:[#allocation10 + $0x7c8] sm:$0xff]  ;;  %v4590_v36 = vpack.c.bf16 %v987_v46, %v983_v11  ;;  %v1003_v11 = vld [vmem:[#allocation10 + $0x820] sm:$0xff] }
 0x234   :  { %v4974_v19 = vpack.c.bf16 %v989_v26, %v985_v58  ;;  %v1001_v46 = vld [vmem:[#allocation10 + $0x810] sm:$0xff]  ;;  %v1012_v58 = vld [vmem:[#allocation10 + $0x868] sm:$0xff]  ;;  %v1010_v26 = vld [vmem:[#allocation10 + $0x858] sm:$0xff] }
 0x236   :  { %4583 = vmatpush1.bf16.msra.mxu0 %v4582_v55  ;;  %4967 = vmatpush1.bf16.msra.mxu1 %v4966_v44  ;;  %v995_v55 = vld [vmem:[#allocation10 + $0x7e0] sm:$0xff]  ;;  %v4592_v44 = vpack.c.bf16 %v996_v53, %v992_v28  ;;  %v1014_v28 = vld [vmem:[#allocation10 + $0x878] sm:$0xff] }
 0x237   :  { %4585 = vmatprep.subr.bf16.mxu0 %v4584_v25  ;;  %4969 = vmatprep.subr.bf16.mxu1 %v4968_v1  ;;  %v997_v25 = vld [vmem:[#allocation10 + $0x7f0] sm:$0xff]  ;;  %v1000_v1 = vld [vmem:[#allocation10 + $0x808] sm:$0xff]  ;;  %v4594_v3 = vpack.c.bf16 %v995_v55, %v991_v35  ;;  %v4984_v35 = vpack.c.bf16 %v1014_v28, %v1010_v26  ;;  %v1023_v26 = vld [vmem:[#allocation10 + $0x8c0] sm:$0xff] }
 0x238   :  { %v4978_v27 = vpack.c.bf16 %v997_v25, %v993_v32  ;;  %v4596_v40 = vpack.c.bf16 %v1004_v47, %v1000_v1  ;;  %v1009_v55 = vld [vmem:[#allocation10 + $0x850] sm:$0xff]  ;;  %v1020_v32 = vld [vmem:[#allocation10 + $0x8a8] sm:$0xff]  ;;  %v1018_v25 = vld [vmem:[#allocation10 + $0x898] sm:$0xff] }
 0x239   :  { %v1022_v1 = vld [vmem:[#allocation10 + $0x8b8] sm:$0xff]  ;;  %v1027_v28 = vld [vmem:[#allocation10 + $0x8e0] sm:$0xff] }
 0x23a   :  { %4587 = vmatpush1.bf16.msra.mxu0 %v4586_v51  ;;  %4971 = vmatpush1.bf16.msra.mxu1 %v4970_v7  ;;  %v4980_v51 = vpack.c.bf16 %v1006_v59, %v1002_v13  ;;  %v999_v7 = vld [vmem:[#allocation10 + $0x800] sm:$0xff] }
 0x23b   :  { %4589 = vmatprep.subr.bf16.mxu0 %v4588_v5  ;;  %4973 = vmatprep.subr.bf16.mxu1 %v4972_v29  ;;  %v1005_v5 = vld [vmem:[#allocation10 + $0x830] sm:$0xff]  ;;  %v1008_v29 = vld [vmem:[#allocation10 + $0x848] sm:$0xff]  ;;  %v4598_v53 = vpack.c.bf16 %v1003_v11, %v999_v7  ;;  %v1015_v59 = vld [vmem:[#allocation10 + $0x880] sm:$0xff] }
 0x23c   :  { %v4982_v41 = vpack.c.bf16 %v1005_v5, %v1001_v46  ;;  %v1021_v7 = vld [vmem:[#allocation10 + $0x8b0] sm:$0xff]  ;;  %v1028_v11 = vld [vmem:[#allocation10 + $0x8e8] sm:$0xff]  ;;  %v1026_v46 = vld [vmem:[#allocation10 + $0x8d8] sm:$0xff] }
 0x23d   :  { %v1030_v5 = vld [vmem:[#allocation10 + $0x8f8] sm:$0xff] }
 0x23e   :  { %4591 = vmatpush1.bf16.msra.mxu0 %v4590_v36  ;;  %4975 = vmatpush1.bf16.msra.mxu1 %v4974_v19  ;;  %v1011_v36 = vld [vmem:[#allocation10 + $0x860] sm:$0xff]  ;;  %v4600_v19 = vpack.c.bf16 %v1012_v58, %v1008_v29 }
 0x23f   :  { %4593 = vmatprep.subr.bf16.mxu0 %v4592_v44  ;;  %4977 = vmatprep.subr.bf16.mxu1 %v4976_v37  ;;  %v1013_v44 = vld [vmem:[#allocation10 + $0x870] sm:$0xff]  ;;  %v1016_v37 = vld [vmem:[#allocation10 + $0x888] sm:$0xff]  ;;  %v4602_v47 = vpack.c.bf16 %v1011_v36, %v1007_v42 }
 0x240   :  { %v4986_v13 = vpack.c.bf16 %v1013_v44, %v1009_v55  ;;  %v1025_v42 = vld [vmem:[#allocation10 + $0x8d0] sm:$0xff]  ;;  %v1034_v55 = vld [vmem:[#allocation10 + $0x918] sm:$0xff] }
 0x241   :  { %v1029_v36 = vld [vmem:[#allocation10 + $0x8f0] sm:$0xff]  ;;  %v1038_v44 = vld [vmem:[#allocation10 + $0x938] sm:$0xff] }
 0x242   :  { %4595 = vmatpush1.bf16.msra.mxu0 %v4594_v3  ;;  %4979 = vmatpush1.bf16.msra.mxu1 %v4978_v27  ;;  %v1019_v3 = vld [vmem:[#allocation10 + $0x8a0] sm:$0xff]  ;;  %v4604_v27 = vpack.c.bf16 %v1020_v32, %v1016_v37  ;;  %v4994_v37 = vpack.c.bf16 %v1029_v36, %v1025_v42 }
 0x243   :  { %4597 = vmatprep.subr.bf16.mxu0 %v4596_v40  ;;  %4981 = vmatprep.subr.bf16.mxu1 %v4980_v51  ;;  %v4988_v40 = vpack.c.bf16 %v1022_v1, %v1018_v25  ;;  %v1017_v51 = vld [vmem:[#allocation10 + $0x890] sm:$0xff]  ;;  %v4606_v29 = vpack.c.bf16 %v1019_v3, %v1015_v59  ;;  %v1031_v32 = vld [vmem:[#allocation10 + $0x900] sm:$0xff]  ;;  %v1044_v3 = vld [vmem:[#allocation10 + $0x968] sm:$0xff] }
 0x244   :  { %v4990_v58 = vpack.c.bf16 %v1021_v7, %v1017_v51  ;;  %v1035_v25 = vld [vmem:[#allocation10 + $0x920] sm:$0xff]  ;;  %v1033_v1 = vld [vmem:[#allocation10 + $0x910] sm:$0xff] }
 0x245   :  { %1687 = vmatmul.mubr.f32.vlgmr.msra.gmra.mrb[0].mxu0 %v6261_v34  ;;  %2221 = vmatmul.mubr.f32.vlgmr.msra.gmra.mrb[16].mxu1 %v6261_v34  ;;  %v1024_v34 = vld [vmem:[#allocation10 + $0x8c8] sm:$0xff]  ;;  %v1037_v59 = vld [vmem:[#allocation10 + $0x930] sm:$0xff]  ;;  %v4614_v51 = vpack.c.bf16 %v1035_v25, %v1031_v32  ;;  %v1058_v25 = vld [vmem:[#allocation10 + $0x9d8] sm:$0xff] }
 0x246   :  { %1692 = vmatprep.mubr.f32.mxu0 %v6249_v8  ;;  %4599 = vmatpush1.bf16.msra.mxu0 %v4598_v53  ;;  %v4608_v53 = vpack.c.bf16 %v1028_v11, %v1024_v34  ;;  %v4998_v7 = vpack.c.bf16 %v1037_v59, %v1033_v1  ;;  %v1039_v11 = vld [vmem:[#allocation10 + $0x940] sm:$0xff]  ;;  %v1060_v32 = vld [vmem:[#allocation10 + $0x9e8] sm:$0xff]  ;;  %v1062_v1 = vld [vmem:[#allocation10 + $0x9f8] sm:$0xff] }
 0x247   :  { %2226 = vmatprep.mubr.f32.mxu1 %v6249_v8  ;;  %4983 = vmatpush1.bf16.msra.mxu1 %v4982_v41  ;;  %v4992_v41 = vpack.c.bf16 %v1030_v5, %v1026_v46  ;;  %v1043_v46 = vld [vmem:[#allocation10 + $0x960] sm:$0xff]  ;;  %v1041_v5 = vld [vmem:[#allocation10 + $0x950] sm:$0xff] }
 0x248   :  { %4601 = vmatprep.subr.bf16.mxu0 %v4600_v19  ;;  %4985 = vmatprep.subr.bf16.mxu1 %v4984_v35  ;;  %v1032_v19 = vld [vmem:[#allocation10 + $0x908] sm:$0xff]  ;;  %v4618_v42 = vpack.c.bf16 %v1043_v46, %v1039_v11  ;;  %v1066_v11 = vld [vmem:[#allocation10 + $0xa18] sm:$0xff] }
 0x249   :  { %1693 = vmatmul.mubr.f32.gmra.mrb[2].mxu0 %v6244_v62  ;;  %2227 = vmatmul.mubr.f32.gmra.mrb[18].mxu1 %v6244_v62  ;;  %v1036_v35 = vld [vmem:[#allocation10 + $0x928] sm:$0xff]  ;;  %v1070_v46 = vld [vmem:[#allocation10 + $0xa38] sm:$0xff] }
 0x24a   :  { %1698 = vmatprep.mubr.f32.mxu0 %v6306_v50  ;;  %4603 = vmatpush1.bf16.msra.mxu0 %v4602_v47  ;;  %v4612_v47 = vpack.c.bf16 %v1036_v35, %v1032_v19  ;;  %v1051_v35 = vld [vmem:[#allocation10 + $0x9a0] sm:$0xff] }
 0x24b   :  { %2232 = vmatprep.mubr.f32.mxu1 %v6306_v50  ;;  %4987 = vmatpush1.bf16.msra.mxu1 %v4986_v13  ;;  %v4610_v50 = vpack.c.bf16 %v1027_v28, %v1023_v26  ;;  %v4996_v13 = vpack.c.bf16 %v1038_v44, %v1034_v55  ;;  %v1048_v26 = vld [vmem:[#allocation10 + $0x988] sm:$0xff]  ;;  %v1049_v55 = vld [vmem:[#allocation10 + $0x990] sm:$0xff] }
 0x24c   :  { %4605 = vmatprep.subr.bf16.mxu0 %v4604_v27  ;;  %4989 = vmatprep.subr.bf16.mxu1 %v4988_v40  ;;  %v1042_v27 = vld [vmem:[#allocation10 + $0x958] sm:$0xff]  ;;  %v1052_v28 = vld [vmem:[#allocation10 + $0x9a8] sm:$0xff] }
 0x24d   :  { %1699 = vmatmul.mubr.f32.gmra.mrb[4].mxu0 %v6301_v45  ;;  %2233 = vmatmul.mubr.f32.gmra.mrb[20].mxu1 %v6301_v45  ;;  %v1040_v45 = vld [vmem:[#allocation10 + $0x948] sm:$0xff]  ;;  %v1046_v40 = vld [vmem:[#allocation10 + $0x978] sm:$0xff]  ;;  %v4620_v19 = vpack.c.bf16 %v1052_v28, %v1048_v26  ;;  %v1063_v26 = vld [vmem:[#allocation10 + $0xa00] sm:$0xff] }
 0x24e   :  { %1704 = vmatprep.mubr.f32.mxu0 %v6286_v20  ;;  %4607 = vmatpush1.bf16.msra.mxu0 %v4606_v29  ;;  %v4616_v34 = vpack.c.bf16 %v1044_v3, %v1040_v45  ;;  %v5000_v29 = vpack.c.bf16 %v1046_v40, %v1042_v27  ;;  %v1055_v45 = vld [vmem:[#allocation10 + $0x9c0] sm:$0xff]  ;;  %v1057_v27 = vld [vmem:[#allocation10 + $0x9d0] sm:$0xff]  ;;  %v5008_v40 = vpack.c.bf16 %v1062_v1, %v1058_v25 }
 0x24f   :  { %2238 = vmatprep.mubr.f32.mxu1 %v6286_v20  ;;  %4991 = vmatpush1.bf16.msra.mxu1 %v4990_v58  ;;  %v1045_v58 = vld [vmem:[#allocation10 + $0x970] sm:$0xff]  ;;  %v1059_v3 = vld [vmem:[#allocation10 + $0x9e0] sm:$0xff] }
 0x250   :  { %4609 = vmatprep.subr.bf16.mxu0 %v4608_v53  ;;  %4993 = vmatprep.subr.bf16.mxu1 %v4992_v41  ;;  %v1050_v53 = vld [vmem:[#allocation10 + $0x998] sm:$0xff]  ;;  %v5002_v36 = vpack.c.bf16 %v1045_v58, %v1041_v5  ;;  %v4626_v5 = vpack.c.bf16 %v1059_v3, %v1055_v45  ;;  %v1067_v28 = vld [vmem:[#allocation10 + $0xa20] sm:$0xff]  ;;  %v1073_v25 = vld [vmem:[#allocation10 + $0xa50] sm:$0xff] }
 0x251   :  { %1705 = vmatmul.mubr.f32.gmra.mrb[6].mxu0 %v6278_v17  ;;  %2239 = vmatmul.mubr.f32.gmra.mrb[22].mxu1 %v6278_v17  ;;  %v1054_v41 = vld [vmem:[#allocation10 + $0x9b8] sm:$0xff] }
 0x252   :  { %4611 = vmatpush1.bf16.msra.mxu0 %v4610_v50  ;;  %1775 = vmatprep.mubr.f32.mxu0 %v6176_v56  ;;  %v5004_v44 = vpack.c.bf16 %v1054_v41, %v1050_v53  ;;  %v1053_v50 = vld [vmem:[#allocation10 + $0x9b0] sm:$0xff]  ;;  %v5012_v41 = vpack.c.bf16 %v1070_v46, %v1066_v11  ;;  %v1082_v45 = vld [vmem:[#allocation10 + $0xa98] sm:$0xff] }
 0x253   :  { %4995 = vmatpush1.bf16.msra.mxu1 %v4994_v37  ;;  %2309 = vmatprep.mubr.f32.mxu1 %v6176_v56  ;;  %v1047_v56 = vld [vmem:[#allocation10 + $0x980] sm:$0xff]  ;;  %v1056_v37 = vld [vmem:[#allocation10 + $0x9c8] sm:$0xff]  ;;  %v1065_v53 = vld [vmem:[#allocation10 + $0xa10] sm:$0xff] }
 0x254   :  { %4613 = vmatprep.subr.bf16.mxu0 %v4612_v47  ;;  %4997 = vmatprep.subr.bf16.mxu1 %v4996_v13  ;;  %v4622_v47 = vpack.c.bf16 %v1051_v35, %v1047_v56  ;;  %v5006_v13 = vpack.c.bf16 %v1053_v50, %v1049_v55  ;;  %v4624_v59 = vpack.c.bf16 %v1060_v32, %v1056_v37  ;;  %v1074_v56 = vld [vmem:[#allocation10 + $0xa58] sm:$0xff]  ;;  %v1071_v37 = vld [vmem:[#allocation10 + $0xa40] sm:$0xff]  ;;  %v1081_v11 = vld [vmem:[#allocation10 + $0xa90] sm:$0xff] }
 0x255   :  { %v1078_v35 = vld [vmem:[#allocation10 + $0xa78] sm:$0xff]  ;;  %v4630_v55 = vpack.c.bf16 %v1067_v28, %v1063_v26  ;;  %v1075_v32 = vld [vmem:[#allocation10 + $0xa60] sm:$0xff] }
 0x256   :  { %4615 = vmatpush1.bf16.msra.mxu0 %v4614_v51  ;;  %v1061_v51 = vld [vmem:[#allocation10 + $0x9f0] sm:$0xff]  ;;  %v5016_v1 = vpack.c.bf16 %v1078_v35, %v1074_v56  ;;  %v1086_v3 = vld [vmem:[#allocation10 + $0xab8] sm:$0xff] }
 0x257   :  { %4999 = vmatpush1.bf16.msra.mxu1 %v4998_v7  ;;  %4617 = vmatprep.subr.bf16.mxu0 %v4616_v34  ;;  %v1064_v7 = vld [vmem:[#allocation10 + $0xa08] sm:$0xff]  ;;  %v5020_v46 = vpack.c.bf16 %v1086_v3, %v1082_v45  ;;  %v1090_v26 = vld [vmem:[#allocation10 + $0xad8] sm:$0xff]  ;;  %v1089_v56 = vld [vmem:[#allocation10 + $0xad0] sm:$0xff] }
 0x258   :  { %5001 = vmatprep.subr.bf16.mxu1 %v5000_v29  ;;  %v1068_v34 = vld [vmem:[#allocation10 + $0xa28] sm:$0xff]  ;;  %v5010_v29 = vpack.c.bf16 %v1061_v51, %v1057_v27  ;;  %v4634_v27 = vpack.c.bf16 %v1075_v32, %v1071_v37  ;;  %v1094_v28 = vld [vmem:[#allocation10 + $0xaf8] sm:$0xff]  ;;  %v1097_v45 = vld [vmem:[#allocation10 + $0xb10] sm:$0xff] }
 0x259   :  { %v4628_v58 = vpack.c.bf16 %v1068_v34, %v1064_v7  ;;  %v1079_v7 = vld [vmem:[#allocation10 + $0xa80] sm:$0xff]  ;;  %v5024_v35 = vpack.c.bf16 %v1094_v28, %v1090_v26  ;;  %v1098_v37 = vld [vmem:[#allocation10 + $0xb18] sm:$0xff]  ;;  %v1105_v26 = vld [vmem:[#allocation10 + $0xb50] sm:$0xff] }
 0x25a   :  { %4619 = vmatpush1.bf16.msra.mxu0 %v4618_v42  ;;  %v1069_v42 = vld [vmem:[#allocation10 + $0xa30] sm:$0xff]  ;;  %v1083_v34 = vld [vmem:[#allocation10 + $0xaa0] sm:$0xff]  ;;  %v1102_v32 = vld [vmem:[#allocation10 + $0xb38] sm:$0xff] }
 0x25b   :  { %5003 = vmatpush1.bf16.msra.mxu1 %v5002_v36  ;;  %4621 = vmatprep.subr.bf16.mxu0 %v4620_v19  ;;  %v1072_v36 = vld [vmem:[#allocation10 + $0xa48] sm:$0xff]  ;;  %v5028_v3 = vpack.c.bf16 %v1102_v32, %v1098_v37  ;;  %v1113_v37 = vld [vmem:[#allocation10 + $0xb90] sm:$0xff] }
 0x25c   :  { %5005 = vmatprep.subr.bf16.mxu1 %v5004_v44  ;;  %v1076_v19 = vld [vmem:[#allocation10 + $0xa68] sm:$0xff]  ;;  %v5014_v44 = vpack.c.bf16 %v1069_v42, %v1065_v53  ;;  %v4638_v53 = vpack.c.bf16 %v1083_v34, %v1079_v7  ;;  %v1106_v7 = vld [vmem:[#allocation10 + $0xb58] sm:$0xff] }
 0x25d   :  { %v4632_v50 = vpack.c.bf16 %v1076_v19, %v1072_v36  ;;  %v1087_v36 = vld [vmem:[#allocation10 + $0xac0] sm:$0xff]  ;;  %v1110_v34 = vld [vmem:[#allocation10 + $0xb78] sm:$0xff] }
 0x25e   :  { %4623 = vmatpush1.bf16.msra.mxu0 %v4622_v47  ;;  %v1077_v47 = vld [vmem:[#allocation10 + $0xa70] sm:$0xff]  ;;  %v1091_v19 = vld [vmem:[#allocation10 + $0xae0] sm:$0xff]  ;;  %v5032_v28 = vpack.c.bf16 %v1110_v34, %v1106_v7 }
 0x25f   :  { %5007 = vmatpush1.bf16.msra.mxu1 %v5006_v13  ;;  %4625 = vmatprep.subr.bf16.mxu0 %v4624_v59  ;;  %v1080_v13 = vld [vmem:[#allocation10 + $0xa88] sm:$0xff]  ;;  %v1121_v7 = vld [vmem:[#allocation10 + $0xbd0] sm:$0xff] }
 0x260   :  { %5009 = vmatprep.subr.bf16.mxu1 %v5008_v40  ;;  %v1084_v59 = vld [vmem:[#allocation10 + $0xaa8] sm:$0xff]  ;;  %v5018_v40 = vpack.c.bf16 %v1077_v47, %v1073_v25  ;;  %v4642_v25 = vpack.c.bf16 %v1091_v19, %v1087_v36  ;;  %v1114_v36 = vld [vmem:[#allocation10 + $0xb98] sm:$0xff] }
 0x261   :  { %v4636_v51 = vpack.c.bf16 %v1084_v59, %v1080_v13  ;;  %v1095_v13 = vld [vmem:[#allocation10 + $0xb00] sm:$0xff]  ;;  %v1118_v19 = vld [vmem:[#allocation10 + $0xbb8] sm:$0xff] }
 0x262   :  { %4627 = vmatpush1.bf16.msra.mxu0 %v4626_v5  ;;  %v1085_v5 = vld [vmem:[#allocation10 + $0xab0] sm:$0xff]  ;;  %v1099_v59 = vld [vmem:[#allocation10 + $0xb20] sm:$0xff]  ;;  %v5036_v32 = vpack.c.bf16 %v1118_v19, %v1114_v36 }
 0x263   :  { %5011 = vmatpush1.bf16.msra.mxu1 %v5010_v29  ;;  %4629 = vmatprep.subr.bf16.mxu0 %v4628_v58  ;;  %v1088_v29 = vld [vmem:[#allocation10 + $0xac8] sm:$0xff]  ;;  %v1131_v36 = vld [vmem:[#allocation10 + $0xc20] sm:$0xff]  ;;  %v1129_v19 = vld [vmem:[#allocation10 + $0xc10] sm:$0xff] }
 0x264   :  { %5013 = vmatprep.subr.bf16.mxu1 %v5012_v41  ;;  %v1092_v58 = vld [vmem:[#allocation10 + $0xae8] sm:$0xff]  ;;  %v5022_v41 = vpack.c.bf16 %v1085_v5, %v1081_v11  ;;  %v4646_v11 = vpack.c.bf16 %v1099_v59, %v1095_v13  ;;  %v1122_v13 = vld [vmem:[#allocation10 + $0xbd8] sm:$0xff] }
 0x265   :  { %v4640_v42 = vpack.c.bf16 %v1092_v58, %v1088_v29  ;;  %v1103_v29 = vld [vmem:[#allocation10 + $0xb40] sm:$0xff]  ;;  %v1126_v59 = vld [vmem:[#allocation10 + $0xbf8] sm:$0xff] }
 0x266   :  { %4631 = vmatpush1.bf16.msra.mxu0 %v4630_v55  ;;  %v1093_v55 = vld [vmem:[#allocation10 + $0xaf0] sm:$0xff]  ;;  %v1107_v58 = vld [vmem:[#allocation10 + $0xb60] sm:$0xff]  ;;  %v5040_v34 = vpack.c.bf16 %v1126_v59, %v1122_v13 }
 0x267   :  { %5015 = vmatpush1.bf16.msra.mxu1 %v5014_v44  ;;  %4633 = vmatprep.subr.bf16.mxu0 %v4632_v50  ;;  %v1096_v44 = vld [vmem:[#allocation10 + $0xb08] sm:$0xff]  ;;  %v1135_v13 = vld [vmem:[#allocation10 + $0xc40] sm:$0xff] }
 0x268   :  { %5017 = vmatprep.subr.bf16.mxu1 %v5016_v1  ;;  %v1100_v50 = vld [vmem:[#allocation10 + $0xb28] sm:$0xff]  ;;  %v5026_v1 = vpack.c.bf16 %v1093_v55, %v1089_v56  ;;  %v4650_v56 = vpack.c.bf16 %v1107_v58, %v1103_v29  ;;  %v1130_v29 = vld [vmem:[#allocation10 + $0xc18] sm:$0xff]  ;;  %v1139_v59 = vld [vmem:[#allocation10 + $0xc60] sm:$0xff] }
 0x269   :  { %v4644_v47 = vpack.c.bf16 %v1100_v50, %v1096_v44  ;;  %v1111_v44 = vld [vmem:[#allocation10 + $0xb80] sm:$0xff]  ;;  %v1134_v58 = vld [vmem:[#allocation10 + $0xc38] sm:$0xff] }
 0x26a   :  { %4635 = vmatpush1.bf16.msra.mxu0 %v4634_v27  ;;  %v1101_v27 = vld [vmem:[#allocation10 + $0xb30] sm:$0xff]  ;;  %v1115_v50 = vld [vmem:[#allocation10 + $0xba0] sm:$0xff] }
 0x26b   :  { %5019 = vmatpush1.bf16.msra.mxu1 %v5018_v40  ;;  %4637 = vmatprep.subr.bf16.mxu0 %v4636_v51  ;;  %v1104_v40 = vld [vmem:[#allocation10 + $0xb48] sm:$0xff] }
 0x26c   :  { %5021 = vmatprep.subr.bf16.mxu1 %v5020_v46  ;;  %v1108_v51 = vld [vmem:[#allocation10 + $0xb68] sm:$0xff]  ;;  %v5030_v46 = vpack.c.bf16 %v1101_v27, %v1097_v45  ;;  %v4654_v45 = vpack.c.bf16 %v1115_v50, %v1111_v44  ;;  %v1138_v50 = vld [vmem:[#allocation10 + $0xc58] sm:$0xff] }
 0x26d   :  { %v4648_v5 = vpack.c.bf16 %v1108_v51, %v1104_v40  ;;  %v1119_v40 = vld [vmem:[#allocation10 + $0xbc0] sm:$0xff]  ;;  %v1140_v44 = vld [vmem:[#allocation10 + $0xc68] sm:$0xff] }
 0x26e   :  { %4639 = vmatpush1.bf16.msra.mxu0 %v4638_v53  ;;  %v1109_v53 = vld [vmem:[#allocation10 + $0xb70] sm:$0xff]  ;;  %v1123_v51 = vld [vmem:[#allocation10 + $0xbe0] sm:$0xff] }
 0x26f   :  { %5023 = vmatpush1.bf16.msra.mxu1 %v5022_v41  ;;  %4641 = vmatprep.subr.bf16.mxu0 %v4640_v42  ;;  %v1112_v41 = vld [vmem:[#allocation10 + $0xb88] sm:$0xff] }
 0x270   :  { %5025 = vmatprep.subr.bf16.mxu1 %v5024_v35  ;;  %v1116_v42 = vld [vmem:[#allocation10 + $0xba8] sm:$0xff]  ;;  %v5034_v35 = vpack.c.bf16 %v1109_v53, %v1105_v26  ;;  %v4658_v26 = vpack.c.bf16 %v1123_v51, %v1119_v40  ;;  %v1141_v40 = vld [vmem:[#allocation10 + $0xc70] sm:$0xff] }
 0x271   :  { %v4652_v55 = vpack.c.bf16 %v1116_v42, %v1112_v41  ;;  %v5044_v41 = vpack.c.bf16 %v1134_v58, %v1130_v29  ;;  %v1127_v42 = vld [vmem:[#allocation10 + $0xc00] sm:$0xff]  ;;  %v1144_v51 = vld [vmem:[#allocation10 + $0xc88] sm:$0xff] }
 0x272   :  { %4643 = vmatpush1.bf16.msra.mxu0 %v4642_v25  ;;  %v1117_v25 = vld [vmem:[#allocation10 + $0xbb0] sm:$0xff]  ;;  %v1143_v58 = vld [vmem:[#allocation10 + $0xc80] sm:$0xff] }
 0x273   :  { %5027 = vmatpush1.bf16.msra.mxu1 %v5026_v1  ;;  %4645 = vmatprep.subr.bf16.mxu0 %v4644_v47  ;;  %v1120_v1 = vld [vmem:[#allocation10 + $0xbc8] sm:$0xff] }
 0x274   :  { %5029 = vmatprep.subr.bf16.mxu1 %v5028_v3  ;;  %v1124_v47 = vld [vmem:[#allocation10 + $0xbe8] sm:$0xff]  ;;  %v5038_v3 = vpack.c.bf16 %v1117_v25, %v1113_v37  ;;  %v1142_v37 = vld [vmem:[#allocation10 + $0xc78] sm:$0xff] }
 0x275   :  { %v4656_v27 = vpack.c.bf16 %v1124_v47, %v1120_v1  ;;  %v643_v1 = vrot.slane %v6290_v22, 1  ;;  %v4666_v22 = vpack.c.bf16 %v1139_v59, %v1135_v13  ;;  %v1164_v13 = vld [vmem:[#allocation10 + $0xd28] sm:$0xff]  ;;  %v1162_v59 = vld [vmem:[#allocation10 + $0xd18] sm:$0xff] }
 0x276   :  { %4647 = vmatpush1.bf16.msra.mxu0 %v4646_v11  ;;  %v1125_v11 = vld [vmem:[#allocation10 + $0xbf0] sm:$0xff] }
 0x277   :  { %5031 = vmatpush1.bf16.msra.mxu1 %v5030_v46  ;;  %4649 = vmatprep.subr.bf16.mxu0 %v4648_v5  ;;  %v1128_v46 = vld [vmem:[#allocation10 + $0xc08] sm:$0xff] }
 0x278   :  { %5033 = vmatprep.subr.bf16.mxu1 %v5032_v28  ;;  %v1132_v5 = vld [vmem:[#allocation10 + $0xc28] sm:$0xff]  ;;  %v5042_v28 = vpack.c.bf16 %v1125_v11, %v1121_v7  ;;  %v1150_v11 = vld [vmem:[#allocation10 + $0xcb8] sm:$0xff] }
 0x279   :  { %v4660_v53 = vpack.c.bf16 %v1132_v5, %v1128_v46  ;;  %v1148_v7 = vld [vmem:[#allocation10 + $0xca8] sm:$0xff]  ;;  %v6881_v46 = vrot.slane %v6123_v4, 1  ;;  %v1154_v4 = vld [vmem:[#allocation10 + $0xcd8] sm:$0xff] }
 0x27a   :  { %4651 = vmatpush1.bf16.msra.mxu0 %v4650_v56  ;;  %v645_v56 = vrot.slane %v6288_v21, 1  ;;  %v6880_v21 = vrot.slane %v6126_v9, 1  ;;  %v4668_v29 = vpack.c.bf16 %v1148_v7, %v1144_v51  ;;  %v1163_v51 = vld [vmem:[#allocation10 + $0xd20] sm:$0xff]  ;;  %v1161_v7 = vld [vmem:[#allocation10 + $0xd10] sm:$0xff] }
 0x27b   :  { %5035 = vmatpush1.bf16.msra.mxu1 %v5034_v35  ;;  %4653 = vmatprep.subr.bf16.mxu0 %v4652_v55  ;;  %v1133_v35 = vld [vmem:[#allocation10 + $0xc30] sm:$0xff]  ;;  %v1136_v55 = vld [vmem:[#allocation10 + $0xc48] sm:$0xff]  ;;  %v644_v5 = vsel %vm162_vm2, %v6881_v46, %v643_v1  ;;  %v1170_v46 = vld [vmem:[#allocation10 + $0xd58] sm:$0xff] }
 0x27c   :  { %5037 = vmatprep.subr.bf16.mxu1 %v5036_v32  ;;  %v4662_v32 = vpack.c.bf16 %v1131_v36, %v1127_v42  ;;  %v5046_v25 = vpack.c.bf16 %v1133_v35, %v1129_v19  ;;  %v4664_v47 = vpack.c.bf16 %v1140_v44, %v1136_v55  ;;  %v1152_v42 = vld [vmem:[#allocation10 + $0xcc8] sm:$0xff]  ;;  %v1158_v19 = vld [vmem:[#allocation10 + $0xcf8] sm:$0xff]  ;;  %v663_v55 = vrot.slane %v6319_v15, 1 }
 0x27d   :  { %v1156_v36 = vld [vmem:[#allocation10 + $0xce8] sm:$0xff]  ;;  %v5056_v1 = vpack.c.bf16 %v1158_v19, %v1154_v4  ;;  %v1166_v15 = vld [vmem:[#allocation10 + $0xd38] sm:$0xff] }
 0x27e   :  { %4655 = vmatpush1.bf16.msra.mxu0 %v4654_v45  ;;  %v1137_v45 = vld [vmem:[#allocation10 + $0xc50] sm:$0xff]  ;;  %v4672_v44 = vpack.c.bf16 %v1156_v36, %v1152_v42  ;;  %v1180_v42 = vld [vmem:[#allocation10 + $0xda8] sm:$0xff]  ;;  %v1178_v36 = vld [vmem:[#allocation10 + $0xd98] sm:$0xff] }
 0x27f   :  { %5039 = vmatpush1.bf16.msra.mxu1 %v5038_v3  ;;  %4657 = vmatprep.subr.bf16.mxu0 %v4656_v27  ;;  %v646_v3 = vsel %vm162_vm2, %v6880_v21, %v645_v56  ;;  %v5048_v27 = vpack.c.bf16 %v1142_v37, %v1138_v50  ;;  %v5050_v9 = vpack.c.bf16 %v1141_v40, %v1137_v45  ;;  %v1151_v50 = vld [vmem:[#allocation10 + $0xcc0] sm:$0xff]  ;;  %v1153_v37 = vld [vmem:[#allocation10 + $0xcd0] sm:$0xff]  ;;  %v6883_v21 = vrot.slane %v6179_v57, 1  ;;  %v1182_v4 = vld [vmem:[#allocation10 + $0xdb8] sm:$0xff] }
 0x280   :  { %5041 = vmatprep.subr.bf16.mxu1 %v5040_v34  ;;  %v1146_v34 = vld [vmem:[#allocation10 + $0xc98] sm:$0xff]  ;;  %v1159_v40 = vld [vmem:[#allocation10 + $0xd00] sm:$0xff] }
 0x281   :  { %v4678_v57 = vpack.c.bf16 %v1163_v51, %v1159_v40  ;;  %v1194_v40 = vld [vmem:[#allocation10 + $0xe18] sm:$0xff] }
 0x282   :  { %4659 = vmatpush1.bf16.msra.mxu0 %v4658_v26  ;;  %v1147_v26 = vld [vmem:[#allocation10 + $0xca0] sm:$0xff]  ;;  %v1198_v51 = vld [vmem:[#allocation10 + $0xe38] sm:$0xff] }
 0x283   :  { %5043 = vmatpush1.bf16.msra.mxu1 %v5042_v28  ;;  %4661 = vmatprep.subr.bf16.mxu0 %v4660_v53  ;;  %v1145_v28 = vld [vmem:[#allocation10 + $0xc90] sm:$0xff]  ;;  %v665_v53 = vrot.slane %v6317_v14, 1  ;;  %v4670_v56 = vpack.c.bf16 %v1147_v26, %v1143_v58  ;;  %v1155_v14 = vld [vmem:[#allocation10 + $0xce0] sm:$0xff] }
 0x284   :  { %5045 = vmatprep.subr.bf16.mxu1 %v5044_v41  ;;  %v1149_v41 = vld [vmem:[#allocation10 + $0xcb0] sm:$0xff]  ;;  %v4674_v45 = vpack.c.bf16 %v1155_v14, %v1151_v50  ;;  %v1167_v58 = vld [vmem:[#allocation10 + $0xd40] sm:$0xff]  ;;  %v5068_v50 = vpack.c.bf16 %v1182_v4, %v1178_v36 }
 0x285   :  { %1776 = vmatmul.mubr.f32.vlgmr.msra.gmra.mrb[0].mxu0 %v6165_v49  ;;  %v5054_v35 = vpack.c.bf16 %v1149_v41, %v1145_v28  ;;  %v1171_v26 = vld [vmem:[#allocation10 + $0xd60] sm:$0xff]  ;;  %v1169_v28 = vld [vmem:[#allocation10 + $0xd50] sm:$0xff]  ;;  %v1176_v41 = vld [vmem:[#allocation10 + $0xd88] sm:$0xff] }
 0x286   :  { %2310 = vmatmul.mubr.f32.vlgmr.msra.gmra.mrb[16].mxu1 %v6165_v49  ;;  %1781 = vmatprep.mubr.f32.mxu0 %v646_v3  ;;  %v5052_v49 = vpack.c.bf16 %v1150_v11, %v1146_v34  ;;  %v1165_v34 = vld [vmem:[#allocation10 + $0xd30] sm:$0xff]  ;;  %v1168_v11 = vld [vmem:[#allocation10 + $0xd48] sm:$0xff]  ;;  %v4682_v19 = vpack.c.bf16 %v1171_v26, %v1167_v58  ;;  %v1202_v58 = vld [vmem:[#allocation10 + $0xe58] sm:$0xff] }
 0x287   :  { %4663 = vmatpush1.bf16.msra.mxu0 %v4662_v32  ;;  %2315 = vmatprep.mubr.f32.mxu1 %v646_v3  ;;  %v6882_v32 = vrot.slane %v6187_v2, 1  ;;  %v664_v3 = vsel %vm162_vm2, %v6883_v21, %v663_v55  ;;  %v1179_v55 = vld [vmem:[#allocation10 + $0xda0] sm:$0xff]  ;;  %v1181_v14 = vld [vmem:[#allocation10 + $0xdb0] sm:$0xff]  ;;  %v1206_v26 = vld [vmem:[#allocation10 + $0xe78] sm:$0xff] }
 0x288   :  { %5047 = vmatpush1.bf16.msra.mxu1 %v5046_v25  ;;  %4665 = vmatprep.subr.bf16.mxu0 %v4664_v47  ;;  %v1157_v47 = vld [vmem:[#allocation10 + $0xcf0] sm:$0xff]  ;;  %v5080_v4 = vpack.c.bf16 %v1206_v26, %v1202_v58 }
 0x289   :  { %1782 = vmatmul.mubr.f32.gmra.mrb[2].mxu0 %v644_v5  ;;  %5049 = vmatprep.subr.bf16.mxu1 %v5048_v27  ;;  %v666_v25 = vsel %vm162_vm2, %v6882_v32, %v665_v53  ;;  %v5058_v2 = vpack.c.bf16 %v1157_v47, %v1153_v37  ;;  %v1173_v53 = vld [vmem:[#allocation10 + $0xd70] sm:$0xff]  ;;  %v1184_v37 = vld [vmem:[#allocation10 + $0xdc8] sm:$0xff] }
 0x28a   :  { %2316 = vmatmul.mubr.f32.gmra.mrb[18].mxu1 %v644_v5  ;;  %1787 = vmatprep.mubr.f32.mxu0 %v6236_v60  ;;  %v1174_v5 = vld [vmem:[#allocation10 + $0xd78] sm:$0xff]  ;;  %v1188_v32 = vld [vmem:[#allocation10 + $0xde8] sm:$0xff]  ;;  %v1201_v36 = vld [vmem:[#allocation10 + $0xe50] sm:$0xff] }
 0x28b   :  { %4667 = vmatpush1.bf16.msra.mxu0 %v4666_v22  ;;  %2321 = vmatprep.mubr.f32.mxu1 %v6236_v60  ;;  %v1160_v60 = vld [vmem:[#allocation10 + $0xd08] sm:$0xff]  ;;  %v1225_v58 = vld [vmem:[#allocation10 + $0xf10] sm:$0xff] }
 0x28c   :  { %5051 = vmatpush1.bf16.msra.mxu1 %v5050_v9  ;;  %4669 = vmatprep.subr.bf16.mxu0 %v4668_v29  ;;  %v4676_v27 = vpack.c.bf16 %v1164_v13, %v1160_v60  ;;  %v1172_v22 = vld [vmem:[#allocation10 + $0xd68] sm:$0xff]  ;;  %v5062_v9 = vpack.c.bf16 %v1165_v34, %v1161_v7  ;;  %v4688_v13 = vpack.c.bf16 %v1188_v32, %v1184_v37  ;;  %v1207_v37 = vld [vmem:[#allocation10 + $0xe80] sm:$0xff] }
 0x28d   :  { %1788 = vmatmul.mubr.f32.gmra.mrb[4].mxu0 %v6241_v61  ;;  %5053 = vmatprep.subr.bf16.mxu1 %v5052_v49  ;;  %v4680_v29 = vpack.c.bf16 %v1172_v22, %v1168_v11  ;;  %v5064_v49 = vpack.c.bf16 %v1174_v5, %v1170_v46  ;;  %v1191_v11 = vld [vmem:[#allocation10 + $0xe00] sm:$0xff]  ;;  %v1193_v46 = vld [vmem:[#allocation10 + $0xe10] sm:$0xff]  ;;  %v5076_v5 = vpack.c.bf16 %v1198_v51, %v1194_v40 }
 0x28e   :  { %2322 = vmatmul.mubr.f32.gmra.mrb[20].mxu1 %v6241_v61  ;;  %1793 = vmatprep.mubr.f32.mxu0 %v666_v25  ;;  %v5060_v61 = vpack.c.bf16 %v1166_v15, %v1162_v59  ;;  %v1183_v59 = vld [vmem:[#allocation10 + $0xdc0] sm:$0xff]  ;;  %v1217_v40 = vld [vmem:[#allocation10 + $0xed0] sm:$0xff] }
 0x28f   :  { %4671 = vmatpush1.bf16.msra.mxu0 %v4670_v56  ;;  %2327 = vmatprep.mubr.f32.mxu1 %v666_v25  ;;  %v4684_v56 = vpack.c.bf16 %v1180_v42, %v1176_v41  ;;  %v1186_v25 = vld [vmem:[#allocation10 + $0xdd8] sm:$0xff]  ;;  %v1187_v15 = vld [vmem:[#allocation10 + $0xde0] sm:$0xff] }
 0x290   :  { %5055 = vmatpush1.bf16.msra.mxu1 %v5054_v35  ;;  %4673 = vmatprep.subr.bf16.mxu0 %v4672_v44  ;;  %v1175_v35 = vld [vmem:[#allocation10 + $0xd80] sm:$0xff]  ;;  %v1177_v44 = vld [vmem:[#allocation10 + $0xd90] sm:$0xff]  ;;  %v4690_v7 = vpack.c.bf16 %v1187_v15, %v1183_v59  ;;  %v1218_v59 = vld [vmem:[#allocation10 + $0xed8] sm:$0xff] }
 0x291   :  { %1794 = vmatmul.mubr.f32.gmra.mrb[6].mxu0 %v664_v3  ;;  %5057 = vmatprep.subr.bf16.mxu1 %v5056_v1  ;;  %v1190_v1 = vld [vmem:[#allocation10 + $0xdf8] sm:$0xff]  ;;  %v4686_v47 = vpack.c.bf16 %v1179_v55, %v1175_v35  ;;  %v5070_v60 = vpack.c.bf16 %v1181_v14, %v1177_v44  ;;  %v1195_v22 = vld [vmem:[#allocation10 + $0xe20] sm:$0xff] }
 0x292   :  { %2328 = vmatmul.mubr.f32.gmra.mrb[22].mxu1 %v664_v3  ;;  %1864 = vmatprep.mubr.f32.mxu0 %v6283_v24  ;;  %v5072_v21 = vpack.c.bf16 %v1190_v1, %v1186_v25  ;;  %v1189_v3 = vld [vmem:[#allocation10 + $0xdf0] sm:$0xff]  ;;  %v1199_v41 = vld [vmem:[#allocation10 + $0xe40] sm:$0xff]  ;;  %v1210_v35 = vld [vmem:[#allocation10 + $0xe98] sm:$0xff] }
 0x293   :  { %4675 = vmatpush1.bf16.msra.mxu0 %v4674_v45  ;;  %2398 = vmatprep.mubr.f32.mxu1 %v6283_v24  ;;  %v5066_v24 = vpack.c.bf16 %v1173_v53, %v1169_v28  ;;  %v1185_v45 = vld [vmem:[#allocation10 + $0xdd0] sm:$0xff]  ;;  %v4694_v28 = vpack.c.bf16 %v1195_v22, %v1191_v11  ;;  %v1203_v42 = vld [vmem:[#allocation10 + $0xe60] sm:$0xff]  ;;  %v1214_v55 = vld [vmem:[#allocation10 + $0xeb8] sm:$0xff] }
 0x294   :  { %5059 = vmatpush1.bf16.msra.mxu1 %v5058_v2  ;;  %4677 = vmatprep.subr.bf16.mxu0 %v4676_v27  ;;  %v1192_v2 = vld [vmem:[#allocation10 + $0xe08] sm:$0xff]  ;;  %v4698_v44 = vpack.c.bf16 %v1203_v42, %v1199_v41  ;;  %v1211_v32 = vld [vmem:[#allocation10 + $0xea0] sm:$0xff]  ;;  %v1209_v25 = vld [vmem:[#allocation10 + $0xe90] sm:$0xff]  ;;  %v5084_v1 = vpack.c.bf16 %v1214_v55, %v1210_v35 }
 0x295   :  { %5061 = vmatprep.subr.bf16.mxu1 %v5060_v61  ;;  %v1196_v27 = vld [vmem:[#allocation10 + $0xe28] sm:$0xff]  ;;  %v5074_v61 = vpack.c.bf16 %v1189_v3, %v1185_v45  ;;  %v1222_v15 = vld [vmem:[#allocation10 + $0xef8] sm:$0xff]  ;;  %v4702_v45 = vpack.c.bf16 %v1211_v32, %v1207_v37  ;;  %v1233_v35 = vld [vmem:[#allocation10 + $0xf50] sm:$0xff] }
 0x296   :  { %v4692_v34 = vpack.c.bf16 %v1196_v27, %v1192_v2  ;;  %v1215_v2 = vld [vmem:[#allocation10 + $0xec0] sm:$0xff]  ;;  %v5088_v51 = vpack.c.bf16 %v1222_v15, %v1218_v59  ;;  %v1226_v11 = vld [vmem:[#allocation10 + $0xf18] sm:$0xff]  ;;  %v1241_v59 = vld [vmem:[#allocation10 + $0xf90] sm:$0xff] }
 0x297   :  { %4679 = vmatpush1.bf16.msra.mxu0 %v4678_v57  ;;  %v1197_v57 = vld [vmem:[#allocation10 + $0xe30] sm:$0xff]  ;;  %v1219_v27 = vld [vmem:[#allocation10 + $0xee0] sm:$0xff]  ;;  %v1230_v22 = vld [vmem:[#allocation10 + $0xf38] sm:$0xff] }
 0x298   :  { %5063 = vmatpush1.bf16.msra.mxu1 %v5062_v9  ;;  %4681 = vmatprep.subr.bf16.mxu0 %v4680_v29  ;;  %v1200_v9 = vld [vmem:[#allocation10 + $0xe48] sm:$0xff]  ;;  %v5092_v26 = vpack.c.bf16 %v1230_v22, %v1226_v11  ;;  %v1234_v41 = vld [vmem:[#allocation10 + $0xf58] sm:$0xff]  ;;  %v1249_v11 = vld [vmem:[#allocation10 + $0xfd0] sm:$0xff] }
 0x299   :  { %5065 = vmatprep.subr.bf16.mxu1 %v5064_v49  ;;  %v1204_v29 = vld [vmem:[#allocation10 + $0xe68] sm:$0xff]  ;;  %v5078_v49 = vpack.c.bf16 %v1197_v57, %v1193_v46  ;;  %v4706_v46 = vpack.c.bf16 %v1219_v27, %v1215_v2  ;;  %v1238_v42 = vld [vmem:[#allocation10 + $0xf78] sm:$0xff] }
 0x29a   :  { %v4696_v53 = vpack.c.bf16 %v1204_v29, %v1200_v9  ;;  %v1223_v9 = vld [vmem:[#allocation10 + $0xf00] sm:$0xff]  ;;  %v5096_v55 = vpack.c.bf16 %v1238_v42, %v1234_v41  ;;  %v1242_v37 = vld [vmem:[#allocation10 + $0xf98] sm:$0xff]  ;;  %v1257_v42 = vld [vmem:[#allocation10 + $0x1010] sm:$0xff] }
 0x29b   :  { %4683 = vmatpush1.bf16.msra.mxu0 %v4682_v19  ;;  %v1205_v19 = vld [vmem:[#allocation10 + $0xe70] sm:$0xff]  ;;  %v1227_v29 = vld [vmem:[#allocation10 + $0xf20] sm:$0xff]  ;;  %v1246_v32 = vld [vmem:[#allocation10 + $0xfb8] sm:$0xff] }
 0x29c   :  { %5067 = vmatpush1.bf16.msra.mxu1 %v5066_v24  ;;  %4685 = vmatprep.subr.bf16.mxu0 %v4684_v56  ;;  %v1208_v24 = vld [vmem:[#allocation10 + $0xe88] sm:$0xff]  ;;  %v5100_v15 = vpack.c.bf16 %v1246_v32, %v1242_v37  ;;  %v1250_v2 = vld [vmem:[#allocation10 + $0xfd8] sm:$0xff]  ;;  %v1259_v41 = vld [vmem:[#allocation10 + $0x1020] sm:$0xff] }
 0x29d   :  { %5069 = vmatprep.subr.bf16.mxu1 %v5068_v50  ;;  %v1212_v56 = vld [vmem:[#allocation10 + $0xea8] sm:$0xff]  ;;  %v5082_v50 = vpack.c.bf16 %v1205_v19, %v1201_v36  ;;  %v4710_v36 = vpack.c.bf16 %v1227_v29, %v1223_v9  ;;  %v1254_v27 = vld [vmem:[#allocation10 + $0xff8] sm:$0xff] }
 0x29e   :  { %v4700_v14 = vpack.c.bf16 %v1212_v56, %v1208_v24  ;;  %v1231_v24 = vld [vmem:[#allocation10 + $0xf40] sm:$0xff]  ;;  %v5104_v22 = vpack.c.bf16 %v1254_v27, %v1250_v2  ;;  %v1258_v9 = vld [vmem:[#allocation10 + $0x1018] sm:$0xff] }
 0x29f   :  { %4687 = vmatpush1.bf16.msra.mxu0 %v4686_v47  ;;  %v1213_v47 = vld [vmem:[#allocation10 + $0xeb0] sm:$0xff]  ;;  %v1235_v56 = vld [vmem:[#allocation10 + $0xf60] sm:$0xff]  ;;  %v1262_v29 = vld [vmem:[#allocation10 + $0x1038] sm:$0xff] }
 0x2a0   :  { %5071 = vmatpush1.bf16.msra.mxu1 %v5070_v60  ;;  %4689 = vmatprep.subr.bf16.mxu0 %v4688_v13  ;;  %v1216_v60 = vld [vmem:[#allocation10 + $0xec8] sm:$0xff]  ;;  %v1278_v2 = vld [vmem:[#allocation10 + $0x10b8] sm:$0xff] }
 0x2a1   :  { %5073 = vmatprep.subr.bf16.mxu1 %v5072_v21  ;;  %v1220_v13 = vld [vmem:[#allocation10 + $0xee8] sm:$0xff]  ;;  %v5086_v21 = vpack.c.bf16 %v1213_v47, %v1209_v25  ;;  %v4714_v25 = vpack.c.bf16 %v1235_v56, %v1231_v24 }
 0x2a2   :  { %v4704_v3 = vpack.c.bf16 %v1220_v13, %v1216_v60  ;;  %v1239_v60 = vld [vmem:[#allocation10 + $0xf80] sm:$0xff]  ;;  %v1264_v24 = vld [vmem:[#allocation10 + $0x1048] sm:$0xff] }
 0x2a3   :  { %4691 = vmatpush1.bf16.msra.mxu0 %v4690_v7  ;;  %v1221_v7 = vld [vmem:[#allocation10 + $0xef0] sm:$0xff]  ;;  %v1243_v13 = vld [vmem:[#allocation10 + $0xfa0] sm:$0xff]  ;;  %v1268_v56 = vld [vmem:[#allocation10 + $0x1068] sm:$0xff] }
 0x2a4   :  { %5075 = vmatpush1.bf16.msra.mxu1 %v5074_v61  ;;  %4693 = vmatprep.subr.bf16.mxu0 %v4692_v34  ;;  %v1224_v61 = vld [vmem:[#allocation10 + $0xf08] sm:$0xff]  ;;  %v4728_v32 = vpack.c.bf16 %v1268_v56, %v1264_v24  ;;  %v1285_v56 = vld [vmem:[#allocation10 + $0x10f0] sm:$0xff] }
 0x2a5   :  { %5077 = vmatprep.subr.bf16.mxu1 %v5076_v5  ;;  %v1228_v34 = vld [vmem:[#allocation10 + $0xf28] sm:$0xff]  ;;  %v5090_v5 = vpack.c.bf16 %v1221_v7, %v1217_v40  ;;  %v4718_v40 = vpack.c.bf16 %v1243_v13, %v1239_v60  ;;  %v6884_v60 = vrot.slane %v6249_v8, 1 }
 0x2a6   :  { %v4708_v57 = vpack.c.bf16 %v1228_v34, %v1224_v61  ;;  %v1247_v61 = vld [vmem:[#allocation10 + $0xfc0] sm:$0xff] }
 0x2a7   :  { %4695 = vmatpush1.bf16.msra.mxu0 %v4694_v28  ;;  %v1229_v28 = vld [vmem:[#allocation10 + $0xf30] sm:$0xff]  ;;  %v1251_v34 = vld [vmem:[#allocation10 + $0xfe0] sm:$0xff] }
 0x2a8   :  { %5079 = vmatpush1.bf16.msra.mxu1 %v5078_v49  ;;  %4697 = vmatprep.subr.bf16.mxu0 %v4696_v53  ;;  %v1232_v49 = vld [vmem:[#allocation10 + $0xf48] sm:$0xff] }
 0x2a9   :  { %5081 = vmatprep.subr.bf16.mxu1 %v5080_v4  ;;  %v1236_v53 = vld [vmem:[#allocation10 + $0xf68] sm:$0xff]  ;;  %v5094_v4 = vpack.c.bf16 %v1229_v28, %v1225_v58  ;;  %v4722_v58 = vpack.c.bf16 %v1251_v34, %v1247_v61  ;;  %v1271_v61 = vld [vmem:[#allocation10 + $0x1080] sm:$0xff] }
 0x2aa   :  { %v4712_v19 = vpack.c.bf16 %v1236_v53, %v1232_v49  ;;  %v5108_v49 = vpack.c.bf16 %v1262_v29, %v1258_v9  ;;  %v1255_v53 = vld [vmem:[#allocation10 + $0x1000] sm:$0xff]  ;;  %v1284_v9 = vld [vmem:[#allocation10 + $0x10e8] sm:$0xff]  ;;  %v1286_v29 = vld [vmem:[#allocation10 + $0x10f8] sm:$0xff] }
 0x2ab   :  { %4699 = vmatpush1.bf16.msra.mxu0 %v4698_v44  ;;  %v1237_v44 = vld [vmem:[#allocation10 + $0xf70] sm:$0xff]  ;;  %v1275_v34 = vld [vmem:[#allocation10 + $0x10a0] sm:$0xff] }
 0x2ac   :  { %5083 = vmatpush1.bf16.msra.mxu1 %v5082_v50  ;;  %4701 = vmatprep.subr.bf16.mxu0 %v4700_v14  ;;  %v1240_v50 = vld [vmem:[#allocation10 + $0xf88] sm:$0xff] }
 0x2ad   :  { %5085 = vmatprep.subr.bf16.mxu1 %v5084_v1  ;;  %v1244_v14 = vld [vmem:[#allocation10 + $0xfa8] sm:$0xff]  ;;  %v5098_v1 = vpack.c.bf16 %v1237_v44, %v1233_v35  ;;  %v1266_v35 = vld [vmem:[#allocation10 + $0x1058] sm:$0xff]  ;;  %v4726_v44 = vpack.c.bf16 %v1259_v41, %v1255_v53  ;;  %v1279_v41 = vld [vmem:[#allocation10 + $0x10c0] sm:$0xff] }
 0x2ae   :  { %v4716_v47 = vpack.c.bf16 %v1244_v14, %v1240_v50  ;;  %v5633_v14 = vld [vmem:[#allocation3 + $0x50] sm:$0x3] }
 0x2af   :  { %4703 = vmatpush1.bf16.msra.mxu0 %v4702_v45  ;;  %v1245_v45 = vld [vmem:[#allocation10 + $0xfb0] sm:$0xff]  ;;  %v647_v37 = vrot.slane %v5633_v14, 1  ;;  %v6887_v14 = vrot.slane %v6278_v17, 1 }
 0x2b0   :  { %5087 = vmatpush1.bf16.msra.mxu1 %v5086_v21  ;;  %4705 = vmatprep.subr.bf16.mxu0 %v4704_v3  ;;  %v1248_v21 = vld [vmem:[#allocation10 + $0xfc8] sm:$0xff] }
 0x2b1   :  { %5089 = vmatprep.subr.bf16.mxu1 %v5088_v51  ;;  %v1252_v3 = vld [vmem:[#allocation10 + $0xfe8] sm:$0xff]  ;;  %v5102_v51 = vpack.c.bf16 %v1245_v45, %v1241_v59 }
 0x2b2   :  { %v4720_v7 = vpack.c.bf16 %v1252_v3, %v1248_v21  ;;  %v1272_v45 = vld [vmem:[#allocation10 + $0x1088] sm:$0xff]  ;;  %v1274_v3 = vld [vmem:[#allocation10 + $0x1098] sm:$0xff] }
 0x2b3   :  { %4707 = vmatpush1.bf16.msra.mxu0 %v4706_v46  ;;  %v1253_v46 = vld [vmem:[#allocation10 + $0xff0] sm:$0xff]  ;;  %v1276_v21 = vld [vmem:[#allocation10 + $0x10a8] sm:$0xff] }
 0x2b4   :  { %5091 = vmatpush1.bf16.msra.mxu1 %v5090_v5  ;;  %4709 = vmatprep.subr.bf16.mxu0 %v4708_v57  ;;  %v1256_v5 = vld [vmem:[#allocation10 + $0x1008] sm:$0xff] }
 0x2b5   :  { %5093 = vmatprep.subr.bf16.mxu1 %v5092_v26  ;;  %v1260_v57 = vld [vmem:[#allocation10 + $0x1028] sm:$0xff]  ;;  %v5106_v26 = vpack.c.bf16 %v1253_v46, %v1249_v11  ;;  %v1273_v11 = vld [vmem:[#allocation10 + $0x1090] sm:$0xff] }
 0x2b6   :  { %v4724_v28 = vpack.c.bf16 %v1260_v57, %v1256_v5  ;;  %v1277_v5 = vld [vmem:[#allocation10 + $0x10b0] sm:$0xff]  ;;  %v1280_v57 = vld [vmem:[#allocation10 + $0x10c8] sm:$0xff] }
 0x2b7   :  { %4711 = vmatpush1.bf16.msra.mxu0 %v4710_v36  ;;  %v5632_v36 = vld [vmem:[#allocation3 + $0x58] sm:$0x3]  ;;  %v4736_v53 = vpack.c.bf16 %v1284_v9, %v1280_v57 }
 0x2b8   :  { %5095 = vmatpush1.bf16.msra.mxu1 %v5094_v4  ;;  %4713 = vmatprep.subr.bf16.mxu0 %v4712_v19  ;;  %v649_v4 = vrot.slane %v5632_v36, 1  ;;  %v1261_v19 = vld [vmem:[#allocation10 + $0x1030] sm:$0xff] }
 0x2b9   :  { %5097 = vmatprep.subr.bf16.mxu1 %v5096_v55  ;;  %v1270_v55 = vld [vmem:[#allocation10 + $0x1078] sm:$0xff]  ;;  %v5110_v50 = vpack.c.bf16 %v1261_v19, %v1257_v42  ;;  %v1283_v42 = vld [vmem:[#allocation10 + $0x10e0] sm:$0xff]  ;;  %v1281_v36 = vld [vmem:[#allocation10 + $0x10d0] sm:$0xff] }
 0x2ba   :  { %v650_v13 = vsel %vm162_vm2, %v6884_v60, %v649_v4  ;;  %v5112_v59 = vpack.c.bf16 %v1270_v55, %v1266_v35  ;;  %v6886_v4 = vrot.slane %v6286_v20, 1  ;;  %v1292_v35 = vld [vmem:[#allocation10 + $0x1128] sm:$0xff]  ;;  %v1290_v55 = vld [vmem:[#allocation10 + $0x1118] sm:$0xff]  ;;  %v5122_v20 = vpack.c.bf16 %v1285_v56, %v1281_v36  ;;  %v1293_v60 = vld [vmem:[#allocation10 + $0x1130] sm:$0xff] }
 0x2bb   :  { %4715 = vmatpush1.bf16.msra.mxu0 %v4714_v25  ;;  %v1263_v25 = vld [vmem:[#allocation10 + $0x1040] sm:$0xff]  ;;  %v1305_v57 = vld [vmem:[#allocation10 + $0x1190] sm:$0xff]  ;;  %v1320_v56 = vld [vmem:[#allocation10 + $0x1208] sm:$0xff] }
 0x2bc   :  { %5099 = vmatpush1.bf16.msra.mxu1 %v5098_v1  ;;  %4717 = vmatprep.subr.bf16.mxu0 %v4716_v47  ;;  %v1267_v1 = vld [vmem:[#allocation10 + $0x1060] sm:$0xff]  ;;  %v1265_v47 = vld [vmem:[#allocation10 + $0x1050] sm:$0xff] }
 0x2bd   :  { %5101 = vmatprep.subr.bf16.mxu1 %v5100_v15  ;;  %v1269_v15 = vld [vmem:[#allocation10 + $0x1070] sm:$0xff]  ;;  %v4730_v27 = vpack.c.bf16 %v1267_v1, %v1263_v25  ;;  %v1287_v25 = vld [vmem:[#allocation10 + $0x1100] sm:$0xff] }
 0x2be   :  { %v5114_v8 = vpack.c.bf16 %v1269_v15, %v1265_v47  ;;  %v1291_v1 = vld [vmem:[#allocation10 + $0x1120] sm:$0xff]  ;;  %v1289_v47 = vld [vmem:[#allocation10 + $0x1110] sm:$0xff]  ;;  %v1298_v15 = vld [vmem:[#allocation10 + $0x1158] sm:$0xff] }
 0x2bf   :  { %4719 = vmatpush1.bf16.msra.mxu0 %v4718_v40  ;;  %v6885_v40 = vrot.slane %v6244_v62, 1  ;;  %v1282_v62 = vld [vmem:[#allocation10 + $0x10d8] sm:$0xff]  ;;  %v4742_v17 = vpack.c.bf16 %v1291_v1, %v1287_v25  ;;  %v1315_v36 = vld [vmem:[#allocation10 + $0x11e0] sm:$0xff]  ;;  %v1325_v1 = vld [vmem:[#allocation10 + $0x1230] sm:$0xff] }
 0x2c0   :  { %5103 = vmatpush1.bf16.msra.mxu1 %v5102_v51  ;;  %4721 = vmatprep.subr.bf16.mxu0 %v4720_v7  ;;  %v4732_v7 = vpack.c.bf16 %v1276_v21, %v1272_v45  ;;  %v5120_v24 = vpack.c.bf16 %v1286_v29, %v1282_v62  ;;  %v1302_v45 = vld [vmem:[#allocation10 + $0x1178] sm:$0xff]  ;;  %v5126_v21 = vpack.c.bf16 %v1293_v60, %v1289_v47  ;;  %v1309_v62 = vld [vmem:[#allocation10 + $0x11b0] sm:$0xff]  ;;  %v1312_v29 = vld [vmem:[#allocation10 + $0x11c8] sm:$0xff] }
 0x2c1   :  { %5105 = vmatprep.subr.bf16.mxu1 %v5104_v22  ;;  %v648_v51 = vsel %vm162_vm2, %v6885_v40, %v647_v37  ;;  %v5634_v22 = vld [vmem:[#allocation3 + $0xb8] sm:$0x3]  ;;  %v1328_v47 = vld [vmem:[#allocation10 + $0x1248] sm:$0xff]  ;;  %v1330_v60 = vld [vmem:[#allocation10 + $0x1258] sm:$0xff] }
 0x2c2   :  { %v669_v46 = vrot.slane %v5634_v22, 1  ;;  %v1297_v40 = vld [vmem:[#allocation10 + $0x1150] sm:$0xff] }
 0x2c3   :  { %4723 = vmatpush1.bf16.msra.mxu0 %v4722_v58  ;;  %v4734_v58 = vpack.c.bf16 %v1275_v34, %v1271_v61  ;;  %v1308_v61 = vld [vmem:[#allocation10 + $0x11a8] sm:$0xff]  ;;  %v1306_v34 = vld [vmem:[#allocation10 + $0x1198] sm:$0xff] }
 0x2c4   :  { %5107 = vmatpush1.bf16.msra.mxu1 %v5106_v26  ;;  %4725 = vmatprep.subr.bf16.mxu0 %v4724_v28  ;;  %v5118_v26 = vpack.c.bf16 %v1277_v5, %v1273_v11  ;;  %v5635_v28 = vld [vmem:[#allocation3 + $0xb0] sm:$0x3]  ;;  %v670_v19 = vsel %vm162_vm2, %v6886_v4, %v669_v46  ;;  %v1310_v11 = vld [vmem:[#allocation10 + $0x11b8] sm:$0xff]  ;;  %v1303_v46 = vld [vmem:[#allocation10 + $0x1180] sm:$0xff] }
 0x2c5   :  { %5109 = vmatprep.subr.bf16.mxu1 %v5108_v49  ;;  %v667_v49 = vrot.slane %v5635_v28, 1  ;;  %v1307_v5 = vld [vmem:[#allocation10 + $0x11a0] sm:$0xff]  ;;  %v5132_v9 = vpack.c.bf16 %v1310_v11, %v1306_v34  ;;  %v1318_v28 = vld [vmem:[#allocation10 + $0x11f8] sm:$0xff]  ;;  %v1313_v4 = vld [vmem:[#allocation10 + $0x11d0] sm:$0xff] }
 0x2c6   :  { %1865 = vmatmul.mubr.f32.vlgmr.msra.gmra.mrb[0].mxu0 %v6295_v23 }
 0x2c7   :  { %2399 = vmatmul.mubr.f32.vlgmr.msra.gmra.mrb[16].mxu1 %v6295_v23  ;;  %1870 = vmatprep.mubr.f32.mxu0 %v650_v13  ;;  %v5116_v23 = vpack.c.bf16 %v1278_v2, %v1274_v3  ;;  %v668_v37 = vsel %vm162_vm2, %v6887_v14, %v667_v49  ;;  %v1295_v2 = vld [vmem:[#allocation10 + $0x1140] sm:$0xff]  ;;  %v4750_v49 = vpack.c.bf16 %v1307_v5, %v1303_v46  ;;  %v1341_v5 = vld [vmem:[#allocation10 + $0x12b0] sm:$0xff] }
 0x2c8   :  { %4727 = vmatpush1.bf16.msra.mxu0 %v4726_v44  ;;  %2404 = vmatprep.mubr.f32.mxu1 %v650_v13  ;;  %v1294_v44 = vld [vmem:[#allocation10 + $0x1138] sm:$0xff]  ;;  %v1296_v13 = vld [vmem:[#allocation10 + $0x1148] sm:$0xff] }
 0x2c9   :  { %5111 = vmatpush1.bf16.msra.mxu1 %v5110_v50  ;;  %4729 = vmatprep.subr.bf16.mxu0 %v4728_v32  ;;  %v4738_v50 = vpack.c.bf16 %v1283_v42, %v1279_v41  ;;  %v1311_v42 = vld [vmem:[#allocation10 + $0x11c0] sm:$0xff] }
 0x2ca   :  { %1871 = vmatmul.mubr.f32.gmra.mrb[2].mxu0 %v648_v51  ;;  %5113 = vmatprep.subr.bf16.mxu1 %v5112_v59  ;;  %v1300_v59 = vld [vmem:[#allocation10 + $0x1168] sm:$0xff] }
 0x2cb   :  { %2405 = vmatmul.mubr.f32.gmra.mrb[18].mxu1 %v648_v51  ;;  %1876 = vmatprep.mubr.f32.mxu0 %v6338_v48  ;;  %v4744_v3 = vpack.c.bf16 %v1300_v59, %v1296_v13  ;;  %v5128_v51 = vpack.c.bf16 %v1302_v45, %v1298_v15  ;;  %v1334_v13 = vld [vmem:[#allocation10 + $0x1278] sm:$0xff] }
 0x2cc   :  { %4731 = vmatpush1.bf16.msra.mxu0 %v4730_v27  ;;  %2410 = vmatprep.mubr.f32.mxu1 %v6338_v48  ;;  %v1288_v48 = vld [vmem:[#allocation10 + $0x1108] sm:$0xff]  ;;  %v1299_v27 = vld [vmem:[#allocation10 + $0x1160] sm:$0xff] }
 0x2cd   :  { %5115 = vmatpush1.bf16.msra.mxu1 %v5114_v8  ;;  %4733 = vmatprep.subr.bf16.mxu0 %v4732_v7  ;;  %v4740_v32 = vpack.c.bf16 %v1292_v35, %v1288_v48  ;;  %v1301_v8 = vld [vmem:[#allocation10 + $0x1170] sm:$0xff]  ;;  %v1304_v7 = vld [vmem:[#allocation10 + $0x1188] sm:$0xff]  ;;  %v1322_v35 = vld [vmem:[#allocation10 + $0x1218] sm:$0xff] }
 0x2ce   :  { %1877 = vmatmul.mubr.f32.gmra.mrb[4].mxu0 %v6324_v16  ;;  %5117 = vmatprep.subr.bf16.mxu1 %v5116_v23  ;;  %v4746_v23 = vpack.c.bf16 %v1299_v27, %v1295_v2  ;;  %v4748_v22 = vpack.c.bf16 %v1308_v61, %v1304_v7  ;;  %v1324_v48 = vld [vmem:[#allocation10 + $0x1228] sm:$0xff]  ;;  %v5144_v2 = vpack.c.bf16 %v1334_v13, %v1330_v60  ;;  %v1333_v27 = vld [vmem:[#allocation10 + $0x1270] sm:$0xff]  ;;  %v1342_v7 = vld [vmem:[#allocation10 + $0x12b8] sm:$0xff] }
 0x2cf   :  { %2411 = vmatmul.mubr.f32.gmra.mrb[20].mxu1 %v6324_v16  ;;  %1882 = vmatprep.mubr.f32.mxu0 %v670_v19  ;;  %v5124_v16 = vpack.c.bf16 %v1294_v44, %v1290_v55  ;;  %v1326_v55 = vld [vmem:[#allocation10 + $0x1238] sm:$0xff]  ;;  %v4754_v44 = vpack.c.bf16 %v1315_v36, %v1311_v42  ;;  %v4756_v14 = vpack.c.bf16 %v1324_v48, %v1320_v56  ;;  %v1349_v36 = vld [vmem:[#allocation10 + $0x12f0] sm:$0xff] }
 0x2d0   :  { %4735 = vmatpush1.bf16.msra.mxu0 %v4734_v58  ;;  %2416 = vmatprep.mubr.f32.mxu1 %v670_v19  ;;  %v1316_v58 = vld [vmem:[#allocation10 + $0x11e8] sm:$0xff]  ;;  %v5140_v25 = vpack.c.bf16 %v1326_v55, %v1322_v35  ;;  %v1358_v56 = vld [vmem:[#allocation10 + $0x1338] sm:$0xff] }
 0x2d1   :  { %5119 = vmatpush1.bf16.msra.mxu1 %v5118_v26  ;;  %4737 = vmatprep.subr.bf16.mxu0 %v4736_v53  ;;  %v1314_v26 = vld [vmem:[#allocation10 + $0x11d8] sm:$0xff]  ;;  %v5134_v53 = vpack.c.bf16 %v1309_v62, %v1305_v57  ;;  %v4752_v41 = vpack.c.bf16 %v1316_v58, %v1312_v29  ;;  %v1344_v57 = vld [vmem:[#allocation10 + $0x12c8] sm:$0xff] }
 0x2d2   :  { %1883 = vmatmul.mubr.f32.gmra.mrb[6].mxu0 %v668_v37  ;;  %5121 = vmatprep.subr.bf16.mxu1 %v5120_v24  ;;  %v5136_v19 = vpack.c.bf16 %v1318_v28, %v1314_v26  ;;  %v1317_v24 = vld [vmem:[#allocation10 + $0x11f0] sm:$0xff]  ;;  %v1346_v62 = vld [vmem:[#allocation10 + $0x12d8] sm:$0xff] }
 0x2d3   :  { %2417 = vmatmul.mubr.f32.gmra.mrb[22].mxu1 %v668_v37  ;;  %1953 = vmatprep.mubr.f32.mxu0 %v6313_v6  ;;  %v1319_v37 = vld [vmem:[#allocation10 + $0x1200] sm:$0xff]  ;;  %v1350_v29 = vld [vmem:[#allocation10 + $0x12f8] sm:$0xff] }
 0x2d4   :  { %4739 = vmatpush1.bf16.msra.mxu0 %v4738_v50  ;;  %2487 = vmatprep.mubr.f32.mxu1 %v6313_v6  ;;  %v5130_v6 = vpack.c.bf16 %v1301_v8, %v1297_v40  ;;  %v5138_v50 = vpack.c.bf16 %v1317_v24, %v1313_v4  ;;  %v1336_v40 = vld [vmem:[#allocation10 + $0x1288] sm:$0xff]  ;;  %v1338_v8 = vld [vmem:[#allocation10 + $0x1298] sm:$0xff]  ;;  %v5152_v42 = vpack.c.bf16 %v1350_v29, %v1346_v62 }
 0x2d5   :  { %5123 = vmatpush1.bf16.msra.mxu1 %v5122_v20  ;;  %4741 = vmatprep.subr.bf16.mxu0 %v4740_v32  ;;  %v1323_v20 = vld [vmem:[#allocation10 + $0x1220] sm:$0xff]  ;;  %v1321_v32 = vld [vmem:[#allocation10 + $0x1210] sm:$0xff]  ;;  %v5148_v46 = vpack.c.bf16 %v1342_v7, %v1338_v8  ;;  %v1352_v4 = vld [vmem:[#allocation10 + $0x1308] sm:$0xff] }
 0x2d6   :  { %5125 = vmatprep.subr.bf16.mxu1 %v5124_v16  ;;  %v1332_v16 = vld [vmem:[#allocation10 + $0x1268] sm:$0xff]  ;;  %v4758_v59 = vpack.c.bf16 %v1323_v20, %v1319_v37  ;;  %v5142_v15 = vpack.c.bf16 %v1325_v1, %v1321_v32  ;;  %v1354_v24 = vld [vmem:[#allocation10 + $0x1318] sm:$0xff]  ;;  %v1357_v20 = vld [vmem:[#allocation10 + $0x1330] sm:$0xff] }
 0x2d7   :  { %v4760_v45 = vpack.c.bf16 %v1332_v16, %v1328_v47  ;;  %v5156_v37 = vpack.c.bf16 %v1358_v56, %v1354_v24  ;;  %v1360_v32 = vld [vmem:[#allocation10 + $0x1348] sm:$0xff]  ;;  %v1362_v1 = vld [vmem:[#allocation10 + $0x1358] sm:$0xff] }
 0x2d8   :  { %4743 = vmatpush1.bf16.msra.mxu0 %v4742_v17  ;;  %v1327_v17 = vld [vmem:[#allocation10 + $0x1240] sm:$0xff]  ;;  %v1366_v47 = vld [vmem:[#allocation10 + $0x1378] sm:$0xff] }
 0x2d9   :  { %5127 = vmatpush1.bf16.msra.mxu1 %v5126_v21  ;;  %4745 = vmatprep.subr.bf16.mxu0 %v4744_v3  ;;  %v1331_v21 = vld [vmem:[#allocation10 + $0x1260] sm:$0xff]  ;;  %v1329_v3 = vld [vmem:[#allocation10 + $0x1250] sm:$0xff] }
 0x2da   :  { %5129 = vmatprep.subr.bf16.mxu1 %v5128_v51  ;;  %v1340_v51 = vld [vmem:[#allocation10 + $0x12a8] sm:$0xff]  ;;  %v4762_v61 = vpack.c.bf16 %v1331_v21, %v1327_v17  ;;  %v5146_v34 = vpack.c.bf16 %v1333_v27, %v1329_v3  ;;  %v5160_v17 = vpack.c.bf16 %v1366_v47, %v1362_v1  ;;  %v1365_v21 = vld [vmem:[#allocation10 + $0x1370] sm:$0xff]  ;;  %v1370_v27 = vld [vmem:[#allocation10 + $0x1398] sm:$0xff] }
 0x2db   :  { %v4764_v11 = vpack.c.bf16 %v1340_v51, %v1336_v40  ;;  %v1368_v3 = vld [vmem:[#allocation10 + $0x1388] sm:$0xff]  ;;  %v1374_v40 = vld [vmem:[#allocation10 + $0x13b8] sm:$0xff] }
 0x2dc   :  { %4747 = vmatpush1.bf16.msra.mxu0 %v4746_v23  ;;  %v1335_v23 = vld [vmem:[#allocation10 + $0x1280] sm:$0xff] }
 0x2dd   :  { %5131 = vmatpush1.bf16.msra.mxu1 %v5130_v6  ;;  %4749 = vmatprep.subr.bf16.mxu0 %v4748_v22  ;;  %v1339_v6 = vld [vmem:[#allocation10 + $0x12a0] sm:$0xff]  ;;  %v1337_v22 = vld [vmem:[#allocation10 + $0x1290] sm:$0xff] }
 0x2de   :  { %5133 = vmatprep.subr.bf16.mxu1 %v5132_v9  ;;  %v1348_v9 = vld [vmem:[#allocation10 + $0x12e8] sm:$0xff]  ;;  %v4766_v58 = vpack.c.bf16 %v1339_v6, %v1335_v23  ;;  %v5150_v26 = vpack.c.bf16 %v1341_v5, %v1337_v22  ;;  %v5164_v23 = vpack.c.bf16 %v1374_v40, %v1370_v27  ;;  %v1373_v6 = vld [vmem:[#allocation10 + $0x13b0] sm:$0xff]  ;;  %v1378_v5 = vld [vmem:[#allocation10 + $0x13d8] sm:$0xff] }
 0x2df   :  { %v4768_v28 = vpack.c.bf16 %v1348_v9, %v1344_v57  ;;  %v1376_v22 = vld [vmem:[#allocation10 + $0x13c8] sm:$0xff]  ;;  %v1382_v57 = vld [vmem:[#allocation10 + $0x13f8] sm:$0xff] }
 0x2e0   :  { %4751 = vmatpush1.bf16.msra.mxu0 %v4750_v49  ;;  %v1343_v49 = vld [vmem:[#allocation10 + $0x12c0] sm:$0xff] }
 0x2e1   :  { %5135 = vmatpush1.bf16.msra.mxu1 %v5134_v53  ;;  %4753 = vmatprep.subr.bf16.mxu0 %v4752_v41  ;;  %v1347_v53 = vld [vmem:[#allocation10 + $0x12e0] sm:$0xff]  ;;  %v1345_v41 = vld [vmem:[#allocation10 + $0x12d0] sm:$0xff] }
 0x2e2   :  { %5137 = vmatprep.subr.bf16.mxu1 %v5136_v19  ;;  %v1356_v19 = vld [vmem:[#allocation10 + $0x1328] sm:$0xff]  ;;  %v4770_v48 = vpack.c.bf16 %v1347_v53, %v1343_v49  ;;  %v5154_v35 = vpack.c.bf16 %v1349_v36, %v1345_v41  ;;  %v5168_v49 = vpack.c.bf16 %v1382_v57, %v1378_v5  ;;  %v1381_v53 = vld [vmem:[#allocation10 + $0x13f0] sm:$0xff]  ;;  %v1386_v36 = vld [vmem:[#allocation10 + $0x1418] sm:$0xff] }
 0x2e3   :  { %v4772_v55 = vpack.c.bf16 %v1356_v19, %v1352_v4  ;;  %v1384_v41 = vld [vmem:[#allocation10 + $0x1408] sm:$0xff]  ;;  %v1390_v4 = vld [vmem:[#allocation10 + $0x1438] sm:$0xff]  ;;  %v1407_v5 = vld [vmem:[#allocation10 + $0x14c0] sm:$0xff] }
 0x2e4   :  { %4755 = vmatpush1.bf16.msra.mxu0 %v4754_v44  ;;  %v1351_v44 = vld [vmem:[#allocation10 + $0x1300] sm:$0xff] }
 0x2e5   :  { %5139 = vmatpush1.bf16.msra.mxu1 %v5138_v50  ;;  %4757 = vmatprep.subr.bf16.mxu0 %v4756_v14  ;;  %v1355_v50 = vld [vmem:[#allocation10 + $0x1320] sm:$0xff]  ;;  %v1353_v14 = vld [vmem:[#allocation10 + $0x1310] sm:$0xff] }
 0x2e6   :  { %5141 = vmatprep.subr.bf16.mxu1 %v5140_v25  ;;  %v1364_v25 = vld [vmem:[#allocation10 + $0x1368] sm:$0xff]  ;;  %v4774_v16 = vpack.c.bf16 %v1355_v50, %v1351_v44  ;;  %v5158_v60 = vpack.c.bf16 %v1357_v20, %v1353_v14  ;;  %v1385_v44 = vld [vmem:[#allocation10 + $0x1410] sm:$0xff]  ;;  %v1394_v20 = vld [vmem:[#allocation10 + $0x1458] sm:$0xff] }
 0x2e7   :  { %v4776_v13 = vpack.c.bf16 %v1364_v25, %v1360_v32  ;;  %v1389_v50 = vld [vmem:[#allocation10 + $0x1430] sm:$0xff]  ;;  %v1392_v14 = vld [vmem:[#allocation10 + $0x1448] sm:$0xff]  ;;  %v1398_v32 = vld [vmem:[#allocation10 + $0x1478] sm:$0xff] }
 0x2e8   :  { %4759 = vmatpush1.bf16.msra.mxu0 %v4758_v59  ;;  %v1359_v59 = vld [vmem:[#allocation10 + $0x1340] sm:$0xff]  ;;  %v5174_v1 = vpack.c.bf16 %v1389_v50, %v1385_v44 }
 0x2e9   :  { %5143 = vmatpush1.bf16.msra.mxu1 %v5142_v15  ;;  %4761 = vmatprep.subr.bf16.mxu0 %v4760_v45  ;;  %v1363_v15 = vld [vmem:[#allocation10 + $0x1360] sm:$0xff]  ;;  %v1361_v45 = vld [vmem:[#allocation10 + $0x1350] sm:$0xff] }
 0x2ea   :  { %5145 = vmatprep.subr.bf16.mxu1 %v5144_v2  ;;  %v1372_v2 = vld [vmem:[#allocation10 + $0x13a8] sm:$0xff]  ;;  %v4778_v51 = vpack.c.bf16 %v1363_v15, %v1359_v59  ;;  %v5162_v8 = vpack.c.bf16 %v1365_v21, %v1361_v45  ;;  %v5176_v59 = vpack.c.bf16 %v1398_v32, %v1394_v20  ;;  %v1397_v15 = vld [vmem:[#allocation10 + $0x1470] sm:$0xff]  ;;  %v1402_v21 = vld [vmem:[#allocation10 + $0x1498] sm:$0xff] }
 0x2eb   :  { %v4780_v7 = vpack.c.bf16 %v1372_v2, %v1368_v3  ;;  %v1400_v45 = vld [vmem:[#allocation10 + $0x1488] sm:$0xff]  ;;  %v1406_v3 = vld [vmem:[#allocation10 + $0x14b8] sm:$0xff]  ;;  %v1411_v57 = vld [vmem:[#allocation10 + $0x14e0] sm:$0xff] }
 0x2ec   :  { %4763 = vmatpush1.bf16.msra.mxu0 %v4762_v61  ;;  %v1367_v61 = vld [vmem:[#allocation10 + $0x1380] sm:$0xff]  ;;  %v1429_v20 = vld [vmem:[#allocation10 + $0x1570] sm:$0xff]  ;;  %v1432_v32 = vld [vmem:[#allocation10 + $0x1588] sm:$0xff] }
 0x2ed   :  { %5147 = vmatpush1.bf16.msra.mxu1 %v5146_v34  ;;  %4765 = vmatprep.subr.bf16.mxu0 %v4764_v11  ;;  %v1371_v34 = vld [vmem:[#allocation10 + $0x13a0] sm:$0xff]  ;;  %v1369_v11 = vld [vmem:[#allocation10 + $0x1390] sm:$0xff] }
 0x2ee   :  { %5149 = vmatprep.subr.bf16.mxu1 %v5148_v46  ;;  %v1380_v46 = vld [vmem:[#allocation10 + $0x13e8] sm:$0xff]  ;;  %v4782_v9 = vpack.c.bf16 %v1371_v34, %v1367_v61  ;;  %v5166_v62 = vpack.c.bf16 %v1373_v6, %v1369_v11  ;;  %v5180_v61 = vpack.c.bf16 %v1406_v3, %v1402_v21  ;;  %v1423_v44 = vld [vmem:[#allocation10 + $0x1540] sm:$0xff]  ;;  %v1442_v3 = vld [vmem:[#allocation10 + $0x15d8] sm:$0xff] }
 0x2ef   :  { %v4784_v29 = vpack.c.bf16 %v1380_v46, %v1376_v22  ;;  %v1408_v34 = vld [vmem:[#allocation10 + $0x14c8] sm:$0xff]  ;;  %v1427_v50 = vld [vmem:[#allocation10 + $0x1560] sm:$0xff] }
 0x2f0   :  { %4767 = vmatpush1.bf16.msra.mxu0 %v4766_v58  ;;  %v1375_v58 = vld [vmem:[#allocation10 + $0x13c0] sm:$0xff]  ;;  %v1412_v11 = vld [vmem:[#allocation10 + $0x14e8] sm:$0xff] }
 0x2f1   :  { %5151 = vmatpush1.bf16.msra.mxu1 %v5150_v26  ;;  %4769 = vmatprep.subr.bf16.mxu0 %v4768_v28  ;;  %v1379_v26 = vld [vmem:[#allocation10 + $0x13e0] sm:$0xff]  ;;  %v1377_v28 = vld [vmem:[#allocation10 + $0x13d0] sm:$0xff]  ;;  %v4800_v46 = vpack.c.bf16 %v1412_v11, %v1408_v34  ;;  %v1444_v21 = vld [vmem:[#allocation10 + $0x15e8] sm:$0xff] }
 0x2f2   :  { %5153 = vmatprep.subr.bf16.mxu1 %v5152_v42  ;;  %v1388_v42 = vld [vmem:[#allocation10 + $0x1428] sm:$0xff]  ;;  %v4786_v19 = vpack.c.bf16 %v1379_v26, %v1375_v58  ;;  %v5170_v24 = vpack.c.bf16 %v1381_v53, %v1377_v28  ;;  %v1422_v26 = vld [vmem:[#allocation10 + $0x1538] sm:$0xff]  ;;  %v4802_v28 = vpack.c.bf16 %v1411_v57, %v1407_v5  ;;  %v1445_v34 = vld [vmem:[#allocation10 + $0x15f0] sm:$0xff] }
 0x2f3   :  { %v4788_v56 = vpack.c.bf16 %v1388_v42, %v1384_v41  ;;  %v1420_v58 = vld [vmem:[#allocation10 + $0x1528] sm:$0xff]  ;;  %v1415_v41 = vld [vmem:[#allocation10 + $0x1500] sm:$0xff] }
 0x2f4   :  { %4771 = vmatpush1.bf16.msra.mxu0 %v4770_v48  ;;  %v5172_v48 = vpack.c.bf16 %v1390_v4, %v1386_v36  ;;  %v1419_v42 = vld [vmem:[#allocation10 + $0x1520] sm:$0xff]  ;;  %v1417_v36 = vld [vmem:[#allocation10 + $0x1510] sm:$0xff]  ;;  %v1448_v11 = vld [vmem:[#allocation10 + $0x1608] sm:$0xff] }
 0x2f5   :  { %5155 = vmatpush1.bf16.msra.mxu1 %v5154_v35  ;;  %4773 = vmatprep.subr.bf16.mxu0 %v4772_v55  ;;  %v1383_v35 = vld [vmem:[#allocation10 + $0x1400] sm:$0xff] }
 0x2f6   :  { %5157 = vmatprep.subr.bf16.mxu1 %v5156_v37  ;;  %v1387_v55 = vld [vmem:[#allocation10 + $0x1420] sm:$0xff]  ;;  %v1396_v37 = vld [vmem:[#allocation10 + $0x1468] sm:$0xff] }
 0x2f7   :  { %v4790_v25 = vpack.c.bf16 %v1387_v55, %v1383_v35  ;;  %v4792_v47 = vpack.c.bf16 %v1396_v37, %v1392_v14  ;;  %v1425_v14 = vld [vmem:[#allocation10 + $0x1550] sm:$0xff]  ;;  %v1447_v57 = vld [vmem:[#allocation10 + $0x1600] sm:$0xff] }
 0x2f8   :  { %4775 = vmatpush1.bf16.msra.mxu0 %v4774_v16  ;;  %v1391_v16 = vld [vmem:[#allocation10 + $0x1440] sm:$0xff] }
 0x2f9   :  { %5159 = vmatpush1.bf16.msra.mxu1 %v5158_v60  ;;  %4777 = vmatprep.subr.bf16.mxu0 %v4776_v13  ;;  %v1395_v60 = vld [vmem:[#allocation10 + $0x1460] sm:$0xff]  ;;  %v1393_v13 = vld [vmem:[#allocation10 + $0x1450] sm:$0xff] }
 0x2fa   :  { %5161 = vmatprep.subr.bf16.mxu1 %v5160_v17  ;;  %v1404_v17 = vld [vmem:[#allocation10 + $0x14a8] sm:$0xff]  ;;  %v4794_v2 = vpack.c.bf16 %v1395_v60, %v1391_v16  ;;  %v5178_v27 = vpack.c.bf16 %v1397_v15, %v1393_v13  ;;  %v1431_v60 = vld [vmem:[#allocation10 + $0x1580] sm:$0xff] }
 0x2fb   :  { %v4796_v40 = vpack.c.bf16 %v1404_v17, %v1400_v45  ;;  %v1435_v13 = vld [vmem:[#allocation10 + $0x15a0] sm:$0xff]  ;;  %v1437_v45 = vld [vmem:[#allocation10 + $0x15b0] sm:$0xff]  ;;  %v1440_v17 = vld [vmem:[#allocation10 + $0x15c8] sm:$0xff] }
 0x2fc   :  { %4779 = vmatpush1.bf16.msra.mxu0 %v4778_v51  ;;  %v1399_v51 = vld [vmem:[#allocation10 + $0x1480] sm:$0xff] }
 0x2fd   :  { %5163 = vmatpush1.bf16.msra.mxu1 %v5162_v8  ;;  %4781 = vmatprep.subr.bf16.mxu0 %v4780_v7  ;;  %v1403_v8 = vld [vmem:[#allocation10 + $0x14a0] sm:$0xff]  ;;  %v1401_v7 = vld [vmem:[#allocation10 + $0x1490] sm:$0xff] }
 0x2fe   :  { %5165 = vmatprep.subr.bf16.mxu1 %v5164_v23  ;;  %v1414_v23 = vld [vmem:[#allocation10 + $0x14f8] sm:$0xff]  ;;  %v4798_v6 = vpack.c.bf16 %v1403_v8, %v1399_v51  ;;  %v4816_v51 = vpack.c.bf16 %v1444_v21, %v1440_v17  ;;  %v1439_v8 = vld [vmem:[#allocation10 + $0x15c0] sm:$0xff]  ;;  %v1477_v17 = vld [vmem:[#allocation10 + $0x16f0] sm:$0xff] }
 0x2ff   :  { %v1480_v21 = vld [vmem:[#allocation10 + $0x1708] sm:$0xff] }
 0x300   :  { %4783 = vmatpush1.bf16.msra.mxu0 %v4782_v9  ;;  %v1409_v9 = vld [vmem:[#allocation10 + $0x14d0] sm:$0xff] }
 0x301   :  { %5167 = vmatpush1.bf16.msra.mxu1 %v5166_v62  ;;  %4785 = vmatprep.subr.bf16.mxu0 %v4784_v29  ;;  %v1416_v29 = vld [vmem:[#allocation10 + $0x1508] sm:$0xff] }
 0x302   :  { %5169 = vmatprep.subr.bf16.mxu1 %v5168_v49  ;;  %v4804_v53 = vpack.c.bf16 %v1420_v58, %v1416_v29  ;;  %v1453_v29 = vld [vmem:[#allocation10 + $0x1630] sm:$0xff]  ;;  %v1456_v58 = vld [vmem:[#allocation10 + $0x1648] sm:$0xff] }
 0x304   :  { %4787 = vmatpush1.bf16.msra.mxu0 %v4786_v19  ;;  %v1424_v19 = vld [vmem:[#allocation10 + $0x1548] sm:$0xff] }
 0x305   :  { %5171 = vmatpush1.bf16.msra.mxu1 %v5170_v24  ;;  %4789 = vmatprep.subr.bf16.mxu0 %v4788_v56  ;;  %v1428_v24 = vld [vmem:[#allocation10 + $0x1568] sm:$0xff]  ;;  %v1430_v56 = vld [vmem:[#allocation10 + $0x1578] sm:$0xff] }
 0x306   :  { %5173 = vmatprep.subr.bf16.mxu1 %v5172_v48  ;;  %v4806_v48 = vpack.c.bf16 %v1419_v42, %v1415_v41  ;;  %v4808_v55 = vpack.c.bf16 %v1428_v24, %v1424_v19  ;;  %v1455_v42 = vld [vmem:[#allocation10 + $0x1640] sm:$0xff]  ;;  %v1461_v19 = vld [vmem:[#allocation10 + $0x1670] sm:$0xff]  ;;  %v1464_v24 = vld [vmem:[#allocation10 + $0x1688] sm:$0xff] }
 0x307   :  { %1954 = vmatmul.mubr.f32.vlgmr.msra.gmra.mrb[0].mxu0 %v6194_v10 }
 0x308   :  { %2488 = vmatmul.mubr.f32.vlgmr.msra.gmra.mrb[16].mxu1 %v6194_v10  ;;  %1959 = vmatprep.mubr.f32.mxu0 %v6327_v0  ;;  %v1405_v10 = vld [vmem:[#allocation10 + $0x14b0] sm:$0xff] }
 0x309   :  { %4791 = vmatpush1.bf16.msra.mxu0 %v4790_v25  ;;  %2493 = vmatprep.mubr.f32.mxu1 %v6327_v0  ;;  %v1410_v0 = vld [vmem:[#allocation10 + $0x14d8] sm:$0xff]  ;;  %v5182_v22 = vpack.c.bf16 %v1405_v10, %v1401_v7  ;;  %v1443_v7 = vld [vmem:[#allocation10 + $0x15e0] sm:$0xff] }
 0x30a   :  { %5175 = vmatpush1.bf16.msra.mxu1 %v5174_v1  ;;  %4793 = vmatprep.subr.bf16.mxu0 %v4792_v47  ;;  %v5184_v62 = vpack.c.bf16 %v1414_v23, %v1410_v0  ;;  %v1434_v25 = vld [vmem:[#allocation10 + $0x1598] sm:$0xff]  ;;  %v4810_v47 = vpack.c.bf16 %v1427_v50, %v1423_v44  ;;  %v1452_v0 = vld [vmem:[#allocation10 + $0x1628] sm:$0xff]  ;;  %v1463_v50 = vld [vmem:[#allocation10 + $0x1680] sm:$0xff] }
 0x30b   :  { %1960 = vmatmul.mubr.f32.gmra.mrb[2].mxu0 %v6332_v18  ;;  %5177 = vmatprep.subr.bf16.mxu1 %v5176_v59  ;;  %v1438_v1 = vld [vmem:[#allocation10 + $0x15b8] sm:$0xff]  ;;  %v1433_v59 = vld [vmem:[#allocation10 + $0x1590] sm:$0xff]  ;;  %v4820_v5 = vpack.c.bf16 %v1452_v0, %v1448_v11  ;;  %v1488_v0 = vld [vmem:[#allocation10 + $0x1748] sm:$0xff] }
 0x30c   :  { %2494 = vmatmul.mubr.f32.gmra.mrb[18].mxu1 %v6332_v18  ;;  %1965 = vmatprep.mubr.f32.mxu0 %v6342_v12  ;;  %v1413_v18 = vld [vmem:[#allocation10 + $0x14f0] sm:$0xff]  ;;  %v5196_v15 = vpack.c.bf16 %v1438_v1, %v1434_v25  ;;  %v1450_v23 = vld [vmem:[#allocation10 + $0x1618] sm:$0xff]  ;;  %v1476_v25 = vld [vmem:[#allocation10 + $0x16e8] sm:$0xff] }
 0x30d   :  { %4795 = vmatpush1.bf16.msra.mxu0 %v4794_v2  ;;  %2499 = vmatprep.mubr.f32.mxu1 %v6342_v12  ;;  %v1418_v12 = vld [vmem:[#allocation10 + $0x1518] sm:$0xff]  ;;  %v5186_v49 = vpack.c.bf16 %v1413_v18, %v1409_v9  ;;  %v1451_v9 = vld [vmem:[#allocation10 + $0x1620] sm:$0xff]  ;;  %v1485_v11 = vld [vmem:[#allocation10 + $0x1730] sm:$0xff] }
 0x30e   :  { %5179 = vmatpush1.bf16.msra.mxu1 %v5178_v27  ;;  %4797 = vmatprep.subr.bf16.mxu0 %v4796_v40  ;;  %v5188_v4 = vpack.c.bf16 %v1422_v26, %v1418_v12  ;;  %v1446_v2 = vld [vmem:[#allocation10 + $0x15f8] sm:$0xff]  ;;  %v4814_v27 = vpack.c.bf16 %v1435_v13, %v1431_v60  ;;  %v5198_v40 = vpack.c.bf16 %v1437_v45, %v1433_v59  ;;  %v1460_v12 = vld [vmem:[#allocation10 + $0x1668] sm:$0xff]  ;;  %v1471_v13 = vld [vmem:[#allocation10 + $0x16c0] sm:$0xff] }
 0x30f   :  { %1966 = vmatmul.mubr.f32.gmra.mrb[4].mxu0 %v6351_v54  ;;  %5181 = vmatprep.subr.bf16.mxu1 %v5180_v61  ;;  %v1441_v61 = vld [vmem:[#allocation10 + $0x15d0] sm:$0xff]  ;;  %v5200_v10 = vpack.c.bf16 %v1446_v2, %v1442_v3  ;;  %v1458_v26 = vld [vmem:[#allocation10 + $0x1658] sm:$0xff]  ;;  %v4824_v41 = vpack.c.bf16 %v1460_v12, %v1456_v58  ;;  %v1475_v59 = vld [vmem:[#allocation10 + $0x16e0] sm:$0xff] }
 0x310   :  { %2500 = vmatmul.mubr.f32.gmra.mrb[20].mxu1 %v6351_v54  ;;  %1971 = vmatprep.mubr.f32.mxu0 %v6356_v30  ;;  %v1421_v54 = vld [vmem:[#allocation10 + $0x1530] sm:$0xff]  ;;  %v1474_v1 = vld [vmem:[#allocation10 + $0x16d8] sm:$0xff]  ;;  %v1484_v3 = vld [vmem:[#allocation10 + $0x1728] sm:$0xff] }
 0x311   :  { %4799 = vmatpush1.bf16.msra.mxu0 %v4798_v6  ;;  %2505 = vmatprep.mubr.f32.mxu1 %v6356_v30  ;;  %v1426_v30 = vld [vmem:[#allocation10 + $0x1558] sm:$0xff]  ;;  %v5190_v35 = vpack.c.bf16 %v1421_v54, %v1417_v36  ;;  %v1459_v36 = vld [vmem:[#allocation10 + $0x1660] sm:$0xff]  ;;  %v1493_v58 = vld [vmem:[#allocation10 + $0x1770] sm:$0xff] }
 0x312   :  { %5183 = vmatpush1.bf16.msra.mxu1 %v5182_v22  ;;  %4801 = vmatprep.subr.bf16.mxu0 %v4800_v46  ;;  %v5192_v37 = vpack.c.bf16 %v1430_v56, %v1426_v30  ;;  %v1454_v6 = vld [vmem:[#allocation10 + $0x1638] sm:$0xff]  ;;  %v4818_v22 = vpack.c.bf16 %v1443_v7, %v1439_v8  ;;  %v5202_v46 = vpack.c.bf16 %v1445_v34, %v1441_v61  ;;  %v1468_v30 = vld [vmem:[#allocation10 + $0x16a8] sm:$0xff]  ;;  %v1479_v7 = vld [vmem:[#allocation10 + $0x1700] sm:$0xff] }
 0x313   :  { %1972 = vmatmul.mubr.f32.gmra.mrb[6].mxu0 %v6359_v39  ;;  %5185 = vmatprep.subr.bf16.mxu1 %v5184_v62  ;;  %v1449_v62 = vld [vmem:[#allocation10 + $0x1610] sm:$0xff]  ;;  %v5204_v18 = vpack.c.bf16 %v1454_v6, %v1450_v23  ;;  %v1466_v56 = vld [vmem:[#allocation10 + $0x1698] sm:$0xff]  ;;  %v4828_v44 = vpack.c.bf16 %v1468_v30, %v1464_v24  ;;  %v4836_v8 = vpack.c.bf16 %v1484_v3, %v1480_v21  ;;  %v1483_v61 = vld [vmem:[#allocation10 + $0x1720] sm:$0xff] }
 0x314   :  { %2506 = vmatmul.mubr.f32.gmra.mrb[22].mxu1 %v6359_v39  ;;  %2042 = vmatprep.mubr.f32.mxu0 %v6362_v31  ;;  %v1436_v39 = vld [vmem:[#allocation10 + $0x15a8] sm:$0xff]  ;;  %v1482_v2 = vld [vmem:[#allocation10 + $0x1718] sm:$0xff]  ;;  %v1501_v24 = vld [vmem:[#allocation10 + $0x17b0] sm:$0xff] }
 0x315   :  { %4803 = vmatpush1.bf16.msra.mxu0 %v4802_v28  ;;  %2576 = vmatprep.mubr.f32.mxu1 %v6362_v31  ;;  %v5194_v31 = vpack.c.bf16 %v1429_v20, %v1425_v14  ;;  %v4812_v16 = vpack.c.bf16 %v1436_v39, %v1432_v32  ;;  %v1462_v28 = vld [vmem:[#allocation10 + $0x1678] sm:$0xff]  ;;  %v1467_v14 = vld [vmem:[#allocation10 + $0x16a0] sm:$0xff]  ;;  %v1469_v32 = vld [vmem:[#allocation10 + $0x16b0] sm:$0xff] }
 0x316   :  { %5187 = vmatpush1.bf16.msra.mxu1 %v5186_v49  ;;  %4805 = vmatprep.subr.bf16.mxu0 %v4804_v53  ;;  %v4822_v49 = vpack.c.bf16 %v1451_v9, %v1447_v57  ;;  %v5206_v53 = vpack.c.bf16 %v1453_v29, %v1449_v62  ;;  %v5208_v54 = vpack.c.bf16 %v1462_v28, %v1458_v26  ;;  %v1472_v39 = vld [vmem:[#allocation10 + $0x16c8] sm:$0xff]  ;;  %v1490_v6 = vld [vmem:[#allocation10 + $0x1758] sm:$0xff]  ;;  %v1487_v9 = vld [vmem:[#allocation10 + $0x1740] sm:$0xff] }
 0x317   :  { %5189 = vmatprep.subr.bf16.mxu1 %v5188_v4  ;;  %v1457_v4 = vld [vmem:[#allocation10 + $0x1650] sm:$0xff]  ;;  %v4832_v60 = vpack.c.bf16 %v1476_v25, %v1472_v39  ;;  %v1492_v23 = vld [vmem:[#allocation10 + $0x1768] sm:$0xff]  ;;  %v1491_v62 = vld [vmem:[#allocation10 + $0x1760] sm:$0xff] }
 0x318   :  { %v4840_v57 = vpack.c.bf16 %v1492_v23, %v1488_v0  ;;  %v1496_v12 = vld [vmem:[#allocation10 + $0x1788] sm:$0xff]  ;;  %v1498_v28 = vld [vmem:[#allocation10 + $0x1798] sm:$0xff]  ;;  %v1509_v39 = vld [vmem:[#allocation10 + $0x17f0] sm:$0xff] }
 0x319   :  { %4807 = vmatpush1.bf16.msra.mxu0 %v4806_v48  ;;  %v1470_v48 = vld [vmem:[#allocation10 + $0x16b8] sm:$0xff]  ;;  %v1500_v26 = vld [vmem:[#allocation10 + $0x17a8] sm:$0xff] }
 0x31a   :  { %5191 = vmatpush1.bf16.msra.mxu1 %v5190_v35  ;;  %4809 = vmatprep.subr.bf16.mxu0 %v4808_v55  ;;  %v4826_v35 = vpack.c.bf16 %v1459_v36, %v1455_v42  ;;  %v5210_v55 = vpack.c.bf16 %v1461_v19, %v1457_v4  ;;  %v5212_v20 = vpack.c.bf16 %v1470_v48, %v1466_v56  ;;  %v1495_v36 = vld [vmem:[#allocation10 + $0x1780] sm:$0xff]  ;;  %v1504_v30 = vld [vmem:[#allocation10 + $0x17c8] sm:$0xff]  ;;  %v1506_v48 = vld [vmem:[#allocation10 + $0x17d8] sm:$0xff] }
 0x31b   :  { %5193 = vmatprep.subr.bf16.mxu1 %v5192_v37  ;;  %v1465_v37 = vld [vmem:[#allocation10 + $0x1690] sm:$0xff]  ;;  %v4844_v42 = vpack.c.bf16 %v1500_v26, %v1496_v12  ;;  %v1499_v4 = vld [vmem:[#allocation10 + $0x17a0] sm:$0xff]  ;;  %v1508_v56 = vld [vmem:[#allocation10 + $0x17e8] sm:$0xff] }
 0x31d   :  { %4811 = vmatpush1.bf16.msra.mxu0 %v4810_v47  ;;  %v1478_v47 = vld [vmem:[#allocation10 + $0x16f8] sm:$0xff] }
 0x31e   :  { %5195 = vmatpush1.bf16.msra.mxu1 %v5194_v31  ;;  %4813 = vmatprep.subr.bf16.mxu0 %v4812_v16  ;;  %v4830_v31 = vpack.c.bf16 %v1467_v14, %v1463_v50  ;;  %v5214_v16 = vpack.c.bf16 %v1469_v32, %v1465_v37  ;;  %v5216_v45 = vpack.c.bf16 %v1478_v47, %v1474_v1  ;;  %v1503_v14 = vld [vmem:[#allocation10 + $0x17c0] sm:$0xff]  ;;  %v1505_v32 = vld [vmem:[#allocation10 + $0x17d0] sm:$0xff] }
 0x31f   :  { %5197 = vmatprep.subr.bf16.mxu1 %v5196_v15  ;;  %v1473_v15 = vld [vmem:[#allocation10 + $0x16d0] sm:$0xff]  ;;  %v4848_v50 = vpack.c.bf16 %v1508_v56, %v1504_v30  ;;  %v1507_v37 = vld [vmem:[#allocation10 + $0x17e0] sm:$0xff]  ;;  %v5234_v1 = vpack.c.bf16 %v1509_v39, %v1505_v32 }
 0x320   :  { %v4850_v25 = vpack.c.bf16 %v1507_v37, %v1503_v14  ;;  %v6888_v47 = vld [vmem:[#allocation28_spill] sm:$0xff] }
 0x321   :  { %4815 = vmatpush1.bf16.msra.mxu0 %v4814_v27  ;;  %v1486_v27 = vld [vmem:[#allocation10 + $0x1738] sm:$0xff]  ;;  %v3164_v37 = vld [vmem:[#allocation13 + $0x80] sm:$0xff] }
 0x322   :  { %5199 = vmatpush1.bf16.msra.mxu1 %v5198_v40  ;;  %4817 = vmatprep.subr.bf16.mxu0 %v4816_v51  ;;  %v4834_v40 = vpack.c.bf16 %v1475_v59, %v1471_v13  ;;  %v5218_v51 = vpack.c.bf16 %v1477_v17, %v1473_v15  ;;  %v5220_v34 = vpack.c.bf16 %v1486_v27, %v1482_v2  ;;  %v3148_v32 = vld [vmem:[#allocation13] sm:$0xff] }
 0x323   :  { %5201 = vmatprep.subr.bf16.mxu1 %v5200_v10  ;;  %v1481_v10 = vld [vmem:[#allocation10 + $0x1710] sm:$0xff] }
 0x325   :  { %4819 = vmatpush1.bf16.msra.mxu0 %v4818_v22  ;;  %v1494_v22 = vld [vmem:[#allocation10 + $0x1778] sm:$0xff] }
 0x326   :  { %5203 = vmatpush1.bf16.msra.mxu1 %v5202_v46  ;;  %4821 = vmatprep.subr.bf16.mxu0 %v4820_v5  ;;  %v4838_v46 = vpack.c.bf16 %v1483_v61, %v1479_v7  ;;  %v5222_v5 = vpack.c.bf16 %v1485_v11, %v1481_v10  ;;  %v5224_v29 = vpack.c.bf16 %v1494_v22, %v1490_v6 }
 0x327   :  { %5205 = vmatprep.subr.bf16.mxu1 %v5204_v18  ;;  %v1489_v18 = vld [vmem:[#allocation10 + $0x1750] sm:$0xff] }
 0x329   :  { %4823 = vmatpush1.bf16.msra.mxu0 %v4822_v49  ;;  %v1502_v49 = vld [vmem:[#allocation10 + $0x17b8] sm:$0xff] }
 0x32a   :  { %5207 = vmatpush1.bf16.msra.mxu1 %v5206_v53  ;;  %4825 = vmatprep.subr.bf16.mxu0 %v4824_v41  ;;  %v4842_v53 = vpack.c.bf16 %v1491_v62, %v1487_v9  ;;  %v5226_v41 = vpack.c.bf16 %v1493_v58, %v1489_v18  ;;  %v5228_v19 = vpack.c.bf16 %v1502_v49, %v1498_v28 }
 0x32b   :  { %5209 = vmatprep.subr.bf16.mxu1 %v5208_v54  ;;  %v1497_v54 = vld [vmem:[#allocation10 + $0x1790] sm:$0xff] }
 0x32d   :  { %4827 = vmatpush1.bf16.msra.mxu0 %v4826_v35  ;;  %v1510_v35 = vld [vmem:[#allocation10 + $0x17f8] sm:$0xff] }
 0x32e   :  { %5211 = vmatpush1.bf16.msra.mxu1 %v5210_v55  ;;  %4829 = vmatprep.subr.bf16.mxu0 %v4828_v44  ;;  %v4846_v55 = vpack.c.bf16 %v1499_v4, %v1495_v36  ;;  %v5230_v44 = vpack.c.bf16 %v1501_v24, %v1497_v54 }
 0x32f   :  { %5213 = vmatprep.subr.bf16.mxu1 %v5212_v20  ;;  %v5232_v20 = vpack.c.bf16 %v1510_v35, %v1506_v48 }
 0x331   :  { %4831 = vmatpush1.bf16.msra.mxu0 %v4830_v31  ;;  %v6889_v31 = vld [vmem:[#allocation29_spill] sm:$0xff] }
 0x332   :  { %5215 = vmatpush1.bf16.msra.mxu1 %v5214_v16  ;;  %4833 = vmatprep.subr.bf16.mxu0 %v4832_v60  ;;  %v6890_v16 = vld [vmem:[#allocation26_spill] sm:$0xff] }
 0x333   :  { %5217 = vmatprep.subr.bf16.mxu1 %v5216_v45 }
 0x335   :  { %4835 = vmatpush1.bf16.msra.mxu0 %v4834_v40 }
 0x336   :  { %5219 = vmatpush1.bf16.msra.mxu1 %v5218_v51  ;;  %4837 = vmatprep.subr.bf16.mxu0 %v4836_v8 }
 0x337   :  { %5221 = vmatprep.subr.bf16.mxu1 %v5220_v34 }
 0x339   :  { %4839 = vmatpush1.bf16.msra.mxu0 %v4838_v46 }
 0x33a   :  { %5223 = vmatpush1.bf16.msra.mxu1 %v5222_v5  ;;  %4841 = vmatprep.subr.bf16.mxu0 %v4840_v57 }
 0x33b   :  { %5225 = vmatprep.subr.bf16.mxu1 %v5224_v29 }
 0x33d   :  { %4843 = vmatpush1.bf16.msra.mxu0 %v4842_v53 }
 0x33e   :  { %5227 = vmatpush1.bf16.msra.mxu1 %v5226_v41  ;;  %4845 = vmatprep.subr.bf16.mxu0 %v4844_v42 }
 0x33f   :  { %5229 = vmatprep.subr.bf16.mxu1 %v5228_v19 }
 0x341   :  { %4847 = vmatpush1.bf16.msra.mxu0 %v4846_v55 }
 0x342   :  { %5231 = vmatpush1.bf16.msra.mxu1 %v5230_v44  ;;  %4849 = vmatprep.subr.bf16.mxu0 %v4848_v50 }
 0x343   :  { %5233 = vmatprep.subr.bf16.mxu1 %v5232_v20  ;;  %v3165_v20 = vld [vmem:[#allocation13 + $0x88] sm:$0xff] }
 0x344   :  { %v5236_v39 = vpack.c.bf16 %v3165_v20, %v3164_v37  ;;  %v3200_v37 = vld [vmem:[#allocation13 + $0x1a0] sm:$0xff]  ;;  %v3201_v20 = vld [vmem:[#allocation13 + $0x1a8] sm:$0xff] }
 0x345   :  { %4851 = vmatpush1.bf16.msra.mxu0 %v4850_v25  ;;  %v3149_v25 = vld [vmem:[#allocation13 + $0x8] sm:$0xff] }
 0x346   :  { %5235 = vmatpush1.bf16.msra.mxu1 %v5234_v1  ;;  %v3196_v1 = vld [vmem:[#allocation13 + $0x180] sm:$0xff]  ;;  %5237 = vmatprep.subr.bf16.mxu0 %v5236_v39 }
 0x348   :  { %2043 = vmatmul.mubr.f32.vlgmr.msra.gmra.mrb[0].mxu0 %v6888_v47 }
 0x349   :  { %2577 = vmatmul.mubr.f32.vlgmr.msra.gmra.mrb[16].mxu1 %v6888_v47  ;;  %2048 = vmatprep.mubr.f32.mxu0 %v6367_v52  ;;  %v3197_v47 = vld [vmem:[#allocation13 + $0x188] sm:$0xff] }
 0x34a   :  { %2582 = vmatprep.mubr.f32.mxu1 %v6367_v52  ;;  %v1511_v52 = vld [vmem:[#allocation12] sm:$0xf] }
 0x34b   :  { %v1516_v60 = vrot.slane %v1511_v52, %v6890_v16 }
 0x34c   :  { %2049 = vmatmul.mubr.f32.gmra.mrb[2].mxu0 %v6372_v43 }
 0x34d   :  { %2583 = vmatmul.mubr.f32.gmra.mrb[18].mxu1 %v6372_v43  ;;  %2054 = vmatprep.mubr.f32.mxu0 %v6375_v63  ;;  %v6891_v43 = vld [vmem:[#allocation27_spill] sm:$0xff] }
 0x34e   :  { %2588 = vmatprep.mubr.f32.mxu1 %v6375_v63  ;;  %v1524_v13 = vrot.slane %v1511_v52, %v6891_v43 }
 0x350   :  { %2055 = vmatmul.mubr.f32.gmra.mrb[4].mxu0 %v6889_v31 }
 0x351   :  { %2589 = vmatmul.mubr.f32.gmra.mrb[20].mxu1 %v6889_v31  ;;  %2060 = vmatprep.mubr.f32.mxu0 %v6381_v38 }
 0x352   :  { %2594 = vmatprep.mubr.f32.mxu1 %v6381_v38  ;;  %v6892_v38 = vld [vmem:[#allocation25_spill] sm:$0xff] }
 0x353   :  { %v6893_v2 = vsub.s32 1, %v6892_v38 }
 0x354   :  { %2061 = vmatmul.mubr.f32.gmra.mrb[6].mxu0 %v6384_v33 }
 0x355   :  { %2595 = vmatmul.mubr.f32.gmra.mrb[22].mxu1 %v6384_v33  ;;  %v1520_v27 = vrot.slane %v1511_v52, %v6893_v2  ;;  %v6894_v33 = vsub.s32 3, %v6892_v38  ;;  %v3167_v2 = vld [vmem:[#allocation13 + $0x98] sm:$0xff] }
 0x357   :  { %v1528_v51 = vrot.slane %v1511_v52, %v6894_v33  ;;  %v5238_v52 = vpack.c.bf16 %v3149_v25, %v3148_v32  ;;  %v3151_v33 = vld [vmem:[#allocation13 + $0x18] sm:$0xff]  ;;  %v3184_v25 = vld [vmem:[#allocation13 + $0x120] sm:$0xff] }
 0x359   :  { %5239 = vmatpush3.bf16.msra.mxu0 %v5238_v52 }
 0x41b   :  { %v2044_v59 = vpop.f32.mrb[0].mxu0 }
 0x41c   :  { %v6478_v15 = vadd.f32 %v2044_v59, %v1516_v60  ;;  %v2578_v63 = vpop.f32.mrb[16].mxu1  ;;  %v2046_v45 = vpop.f32.mrb[1].mxu0  ;;  %v3181_v59 = vld [vmem:[#allocation13 + $0x108] sm:$0xff] }
 0x41d   :  { %v2580_v17 = vpop.f32.mrb[17].mxu1  ;;  %v6481_v3 = vadd.f32 %v2578_v63, %v1524_v13  ;;  %v6491_v34 = vadd.f32 %v2046_v45, %v1520_v27 }
 0x41e   :  { %v2601_v21 = vmax.f32 %v6478_v15, 0.0  ;;  %v6500_v46 = vadd.f32 %v2580_v17, %v1528_v51  ;;  %v3166_v17 = vld [vmem:[#allocation13 + $0x90] sm:$0xff] }
 0x41f   :  { %v2050_v40 = vpop.f32.mrb[2].mxu0  ;;  %v2603_v10 = vmax.f32 %v6481_v3, 0.0  ;;  %v2602_v57 = vmax.f32 %v6491_v34, 0.0 }
 0x420   :  { %v2584_v8 = vpop.f32.mrb[18].mxu1  ;;  %v2052_v7 = vpop.f32.mrb[3].mxu0  ;;  %2621 = vrot.lane.b32.xlu0 %v2601_v21, %s5860_s5  ;;  %v2604_v12 = vmax.f32 %v6500_v46, 0.0  ;;  %v6513_v28 = vadd.f32 %v2050_v40, %v1516_v60  ;;  %v5240_v40 = vpack.c.bf16 %v3167_v2, %v3166_v17  ;;  %v3155_v2 = vld [vmem:[#allocation13 + $0x38] sm:$0xff]  ;;  %v3186_v46 = vld [vmem:[#allocation13 + $0x130] sm:$0xff] }
 0x421   :  { %v2586_v61 = vpop.f32.mrb[19].mxu1  ;;  %v6527_v36 = vadd.f32 %v2584_v8, %v1524_v13  ;;  %v6539_v24 = vadd.f32 %v2052_v7, %v1520_v27  ;;  %v3199_v8 = vld [vmem:[#allocation13 + $0x198] sm:$0xff] }
 0x422   :  { %v6493_v11 = vadd.f32 %v2586_v61, %v1528_v51  ;;  %v2605_v42 = vmax.f32 %v6513_v28, 0.0  ;;  %5241 = vmatprep.subr.bf16.mxu0 %v5240_v40  ;;  %v3203_v40 = vld [vmem:[#allocation13 + $0x1b8] sm:$0xff] }
 0x423   :  { %v2056_v0 = vpop.f32.mrb[4].mxu0  ;;  %v2607_v19 = vmax.f32 %v6527_v36, 0.0  ;;  %v2606_v48 = vmax.f32 %v6539_v24, 0.0 }
 0x424   :  { %v6495_v23 = vadd.f32 %v2056_v0, %v1516_v60  ;;  %v2590_v6 = vpop.f32.mrb[20].mxu1  ;;  %v2058_v22 = vpop.f32.mrb[5].mxu0  ;;  %2661 = vrot.lane.b32.xlu0 %v2603_v10, %s5860_s5  ;;  %v3183_v0 = vld [vmem:[#allocation13 + $0x118] sm:$0xff] }
 0x425   :  { %v2592_v5 = vpop.f32.mrb[21].mxu1  ;;  %v6504_v62 = vadd.f32 %v2590_v6, %v1524_v13  ;;  %v6516_v53 = vadd.f32 %v2058_v22, %v1520_v27 }
 0x426   :  { %v2609_v9 = vmax.f32 %v6495_v23, 0.0  ;;  %v6530_v54 = vadd.f32 %v2592_v5, %v1528_v51  ;;  %v3168_v5 = vld [vmem:[#allocation13 + $0xa0] sm:$0xff] }
 0x427   :  { %v2062_v18 = vpop.f32.mrb[6].mxu0  ;;  %v2611_v49 = vmax.f32 %v6504_v62, 0.0  ;;  %v2610_v4 = vmax.f32 %v6516_v53, 0.0 }
 0x428   :  { %v2596_v29 = vpop.f32.mrb[22].mxu1  ;;  %v2064_v58 = vpop.f32.mrb[7].mxu0  ;;  %2625 = vrot.lane.b32.xlu1 %v2609_v9, %s5860_s5  ;;  %2641 = vrot.lane.b32.xlu0 %v2602_v57, %s5860_s5  ;;  %v2612_v30 = vmax.f32 %v6530_v54, 0.0  ;;  %v6542_v56 = vadd.f32 %v2062_v18, %v1516_v60  ;;  %v5268_v60 = vpack.c.bf16 %v3197_v47, %v3196_v1  ;;  %v3169_v18 = vld [vmem:[#allocation13 + $0xa8] sm:$0xff]  ;;  %v2608_v54 = vmax.f32 %v6493_v11, 0.0 }
 0x429   :  { %v2598_v26 = vpop.f32.mrb[23].mxu1  ;;  %v6552_v55 = vadd.f32 %v2596_v29, %v1524_v13  ;;  %v6561_v50 = vadd.f32 %v2064_v58, %v1520_v27  ;;  %v3180_v13 = vld [vmem:[#allocation13 + $0x100] sm:$0xff]  ;;  %v3150_v27 = vld [vmem:[#allocation13 + $0x10] sm:$0xff]  ;;  %v5244_v58 = vpack.c.bf16 %v3169_v18, %v3168_v5  ;;  %v3185_v1 = vld [vmem:[#allocation13 + $0x128] sm:$0xff] }
 0x42a   :  { %v6518_v41 = vadd.f32 %v2598_v26, %v1528_v51  ;;  %v2613_v35 = vmax.f32 %v6542_v56, 0.0  ;;  %v5270_v45 = vpack.c.bf16 %v3181_v59, %v3180_v13  ;;  %5269 = vmatprep.subr.bf16.mxu1 %v5268_v60  ;;  %v3198_v51 = vld [vmem:[#allocation13 + $0x190] sm:$0xff]  ;;  %v5242_v61 = vpack.c.bf16 %v3151_v33, %v3150_v27  ;;  %v3152_v29 = vld [vmem:[#allocation13 + $0x20] sm:$0xff]  ;;  %v3153_v26 = vld [vmem:[#allocation13 + $0x28] sm:$0xff] }
 0x42b   :  { %v2615_v44 = vmax.f32 %v6552_v55, 0.0  ;;  %v2614_v14 = vmax.f32 %v6561_v50, 0.0  ;;  %v5272_v15 = vpack.c.bf16 %v3199_v8, %v3198_v51  ;;  %v5246_v3 = vpack.c.bf16 %v3153_v26, %v3152_v29  ;;  %v3154_v59 = vld [vmem:[#allocation13 + $0x30] sm:$0xff]  ;;  %v3172_v51 = vld [vmem:[#allocation13 + $0xc0] sm:$0xff]  ;;  %v3189_v29 = vld [vmem:[#allocation13 + $0x148] sm:$0xff] }
 0x42c   :  { %2665 = vrot.lane.b32.xlu1 %v2611_v49, %s5860_s5  ;;  %2681 = vrot.lane.b32.xlu0 %v2604_v12, %s5860_s5  ;;  %v5278_v52 = vpack.c.bf16 %v3185_v1, %v3184_v25  ;;  %v3202_v27 = vld [vmem:[#allocation13 + $0x1b0] sm:$0xff]  ;;  %v3188_v5 = vld [vmem:[#allocation13 + $0x140] sm:$0xff]  ;;  %v3207_v1 = vld [vmem:[#allocation13 + $0x1d8] sm:$0xff]  ;;  %v5862_v55 = vmov 1983009808  }
 0x42d   :  { %5271 = vmatpush3.bf16.msra.mxu1 %v5270_v45  ;;  %5243 = vmatpush3.bf16.msra.mxu0 %v5242_v61  ;;  %v5280_v33 = vpack.c.bf16 %v3203_v40, %v3202_v27  ;;  %v3156_v61 = vld [vmem:[#allocation13 + $0x40] sm:$0xff]  ;;  %v5286_v26 = vpack.c.bf16 %v3189_v29, %v3188_v5  ;;  %v3206_v25 = vld [vmem:[#allocation13 + $0x1d0] sm:$0xff] }
 0x42e   :  { %5273 = vmatprep.subr.bf16.mxu1 %v5272_v15  ;;  %5245 = vmatprep.subr.bf16.mxu0 %v5244_v58  ;;  %v3157_v15 = vld [vmem:[#allocation13 + $0x48] sm:$0xff]  ;;  %v3192_v27 = vld [vmem:[#allocation13 + $0x160] sm:$0xff]  ;;  %v3194_v5 = vld [vmem:[#allocation13 + $0x170] sm:$0xff] }
 0x42f   :  { %v3260_v29 = vld [vmem:[#allocation13 + $0x380] sm:$0xff] }
 0x430   :  { %2645 = vrot.lane.b32.xlu1 %v2610_v4, %s5860_s5  ;;  %2623 = vrot.lane.b32.xlu0 %v2605_v42, %s5860_s5 }
 0x431   :  { %5247 = vmatpush3.bf16.msra.mxu0 %v5246_v3 }
 0x434   :  { %2685 = vrot.lane.b32.xlu1 %v2612_v30, %s5860_s5  ;;  %2663 = vrot.lane.b32.xlu0 %v2607_v19, %s5860_s5 }
 0x438   :  { %2627 = vrot.lane.b32.xlu1 %v2613_v35, %s5860_s5  ;;  %2643 = vrot.lane.b32.xlu0 %v2606_v48, %s5860_s5 }
 0x43c   :  { %2667 = vrot.lane.b32.xlu1 %v2615_v44, %s5860_s5 }
 0x440   :  { %2647 = vrot.lane.b32.xlu1 %v2614_v14, %s5860_s5 }
 0x492   :  { %v2622_v31 = vpop.permute.xlu0 %2621 }
 0x493   :  { %v6572_v63 = vmax.f32 %v2601_v21, %v2622_v31  ;;  %v3182_v21 = vld [vmem:[#allocation13 + $0x110] sm:$0xff] }
 0x494   :  { %v5274_v22 = vpack.c.bf16 %v3183_v0, %v3182_v21  ;;  %v3204_v0 = vld [vmem:[#allocation13 + $0x1c0] sm:$0xff] }
 0x495   :  { %2701 = vrot.lane.b32.xlu0 %v6572_v63, %s5860_s5 }
 0x496   :  { %v2662_v7 = vpop.permute.xlu0 %2661  ;;  %5275 = vmatpush3.bf16.msra.mxu1 %v5274_v22  ;;  %v3205_v22 = vld [vmem:[#allocation13 + $0x1c8] sm:$0xff] }
 0x497   :  { %v6578_v6 = vmax.f32 %v2603_v10, %v2662_v7  ;;  %v5276_v10 = vpack.c.bf16 %v3201_v20, %v3200_v37  ;;  %v3173_v7 = vld [vmem:[#allocation13 + $0xc8] sm:$0xff]  ;;  %v5284_v18 = vpack.c.bf16 %v3205_v22, %v3204_v0  ;;  %v3174_v20 = vld [vmem:[#allocation13 + $0xd0] sm:$0xff]  ;;  %v3211_v22 = vld [vmem:[#allocation13 + $0x1f8] sm:$0xff] }
 0x498   :  { %v5252_v21 = vpack.c.bf16 %v3173_v7, %v3172_v51  ;;  %v3179_v51 = vld [vmem:[#allocation13 + $0xf8] sm:$0xff] }
 0x499   :  { %2745 = vrot.lane.b32.xlu0 %v6578_v6, %s5860_s5  ;;  %5277 = vmatprep.subr.bf16.mxu1 %v5276_v10  ;;  %v3159_v10 = vld [vmem:[#allocation13 + $0x58] sm:$0xff] }
 0x49a   :  { %v2626_v32 = vpop.permute.xlu1 %2625  ;;  %v2642_v39 = vpop.permute.xlu0 %2641  ;;  %5279 = vmatpush3.bf16.msra.mxu1 %v5278_v52  ;;  %v3190_v52 = vld [vmem:[#allocation13 + $0x150] sm:$0xff] }
 0x49b   :  { %v6584_v47 = vmax.f32 %v2609_v9, %v2626_v32  ;;  %v2653_v31 = vmax.f32 %v2602_v57, %v2642_v39  ;;  %v3170_v57 = vld [vmem:[#allocation13 + $0xb0] sm:$0xff]  ;;  %v3171_v9 = vld [vmem:[#allocation13 + $0xb8] sm:$0xff]  ;;  %5281 = vmatprep.subr.bf16.mxu1 %v5280_v33 }
 0x49c   :  { %v5248_v17 = vpack.c.bf16 %v3171_v9, %v3170_v57  ;;  %v3175_v32 = vld [vmem:[#allocation13 + $0xd8] sm:$0xff]  ;;  %v3158_v39 = vld [vmem:[#allocation13 + $0x50] sm:$0xff]  ;;  %v3177_v9 = vld [vmem:[#allocation13 + $0xe8] sm:$0xff] }
 0x49d   :  { %2705 = vrot.lane.b32.xlu1 %v6584_v47, %s5860_s5  ;;  %2717 = vrot.lane.b32.xlu0 %v2653_v31, %s5861_s14  ;;  %v5256_v3 = vpack.c.bf16 %v3175_v32, %v3174_v20 }
 0x49e   :  { %v2666_v60 = vpop.permute.xlu1 %2665  ;;  %v2682_v13 = vpop.permute.xlu0 %2681  ;;  %5249 = vmatprep.subr.bf16.mxu0 %v5248_v17  ;;  %v3208_v17 = vld [vmem:[#allocation13 + $0x1e0] sm:$0xff] }
 0x49f   :  { %v6593_v23 = vmax.f32 %v2611_v49, %v2666_v60  ;;  %v2693_v34 = vmax.f32 %v2604_v12, %v2682_v13  ;;  %v5250_v49 = vpack.c.bf16 %v3155_v2, %v3154_v59  ;;  %v3187_v12 = vld [vmem:[#allocation13 + $0x138] sm:$0xff]  ;;  %v3176_v13 = vld [vmem:[#allocation13 + $0xe0] sm:$0xff]  ;;  %v3161_v59 = vld [vmem:[#allocation13 + $0x68] sm:$0xff] }
 0x4a0   :  { %v5282_v8 = vpack.c.bf16 %v3187_v12, %v3186_v46  ;;  %v3191_v60 = vld [vmem:[#allocation13 + $0x158] sm:$0xff]  ;;  %v3209_v2 = vld [vmem:[#allocation13 + $0x1e8] sm:$0xff]  ;;  %v3178_v12 = vld [vmem:[#allocation13 + $0xf0] sm:$0xff] }
 0x4a1   :  { %2749 = vrot.lane.b32.xlu1 %v6593_v23, %s5860_s5  ;;  %2761 = vrot.lane.b32.xlu0 %v2693_v34, %s5861_s14  ;;  %v5290_v57 = vpack.c.bf16 %v3191_v60, %v3190_v52  ;;  %v5292_v33 = vpack.c.bf16 %v3209_v2, %v3208_v17  ;;  %v3193_v46 = vld [vmem:[#allocation13 + $0x168] sm:$0xff]  ;;  %v5264_v7 = vpack.c.bf16 %v3179_v51, %v3178_v12 }
 0x4a2   :  { %v2646_v45 = vpop.permute.xlu1 %2645  ;;  %5251 = vmatpush3.bf16.msra.mxu0 %v5250_v49  ;;  %5283 = vmatpush3.bf16.msra.mxu1 %v5282_v8  ;;  %v2624_v37 = vpop.permute.xlu0 %2623 }
 0x4a3   :  { %v2655_v62 = vmax.f32 %v2610_v4, %v2646_v45  ;;  %v5254_v4 = vpack.c.bf16 %v3157_v15, %v3156_v61  ;;  %5253 = vmatprep.subr.bf16.mxu0 %v5252_v21  ;;  %5285 = vmatprep.subr.bf16.mxu1 %v5284_v18  ;;  %v5260_v45 = vpack.c.bf16 %v3177_v9, %v3176_v13  ;;  %v3162_v61 = vld [vmem:[#allocation13 + $0x70] sm:$0xff]  ;;  %v3163_v15 = vld [vmem:[#allocation13 + $0x78] sm:$0xff] }
 0x4a4   :  { %v6615_v8 = vmax.f32 %v2605_v42, %v2624_v37  ;;  %v3210_v21 = vld [vmem:[#allocation13 + $0x1f0] sm:$0xff]  ;;  %v3228_v42 = vld [vmem:[#allocation13 + $0x280] sm:$0xff]  ;;  %v5266_v18 = vpack.c.bf16 %v3163_v15, %v3162_v61  ;;  %v2616_v37 = vmax.f32 %v6518_v41, 0.0  ;;  %v3231_v41 = vld [vmem:[#allocation13 + $0x298] sm:$0xff] }
 0x4a5   :  { %2721 = vrot.lane.b32.xlu1 %v2655_v62, %s5861_s14  ;;  %2729 = vrot.lane.b32.xlu0 %v2653_v31, %s5848_s20  ;;  %v5288_v31 = vpack.c.bf16 %v3207_v1, %v3206_v25  ;;  %v5296_v28 = vpack.c.bf16 %v3211_v22, %v3210_v21 }
 0x4a6   :  { %v2686_v53 = vpop.permute.xlu1 %2685  ;;  %5255 = vmatpush3.bf16.msra.mxu0 %v5254_v4  ;;  %5287 = vmatpush3.bf16.msra.mxu1 %v5286_v26  ;;  %v2664_v40 = vpop.permute.xlu0 %2663  ;;  %v3229_v4 = vld [vmem:[#allocation13 + $0x288] sm:$0xff] }
 0x4a7   :  { %v2695_v58 = vmax.f32 %v2612_v30, %v2686_v53  ;;  %v5258_v30 = vpack.c.bf16 %v3159_v10, %v3158_v39  ;;  %5257 = vmatprep.subr.bf16.mxu0 %v5256_v3  ;;  %5289 = vmatprep.subr.bf16.mxu1 %v5288_v31  ;;  %v3195_v53 = vld [vmem:[#allocation13 + $0x178] sm:$0xff]  ;;  %v3261_v26 = vld [vmem:[#allocation13 + $0x388] sm:$0xff]  ;;  %v6623_v20 = vmax.f32 %v2607_v19, %v2664_v40 }
 0x4a8   :  { %v5298_v32 = vpack.c.bf16 %v3195_v53, %v3194_v5  ;;  %v5332_v3 = vpack.c.bf16 %v3261_v26, %v3260_v29 }
 0x4a9   :  { %2765 = vrot.lane.b32.xlu1 %v2695_v58, %s5861_s14  ;;  %2773 = vrot.lane.b32.xlu0 %v2693_v34, %s5848_s20  ;;  %v3160_v34 = vld [vmem:[#allocation13 + $0x60] sm:$0xff] }
 0x4aa   :  { %5259 = vmatpush3.bf16.msra.mxu0 %v5258_v30  ;;  %v5262_v49 = vpack.c.bf16 %v3161_v59, %v3160_v34  ;;  %5291 = vmatpush3.bf16.msra.mxu1 %v5290_v57  ;;  %v2628_v0 = vpop.permute.xlu1 %2627  ;;  %v2644_v39 = vpop.permute.xlu0 %2643 }
 0x4ab   :  { %5261 = vmatprep.subr.bf16.mxu0 %v5260_v45  ;;  %5293 = vmatprep.subr.bf16.mxu1 %v5292_v33  ;;  %v6632_v36 = vmax.f32 %v2613_v35, %v2628_v0  ;;  %v2654_v19 = vmax.f32 %v2606_v48, %v2644_v39  ;;  %v3212_v39 = vld [vmem:[#allocation13 + $0x200] sm:$0xff] }
 0x4ad   :  { %2733 = vrot.lane.b32.xlu1 %v2655_v62, %s5848_s20  ;;  %2683 = vrot.lane.b32.xlu0 %v2608_v54, %s5860_s5  ;;  %v5294_v62 = vpack.c.bf16 %v3193_v46, %v3192_v27 }
 0x4ae   :  { %5263 = vmatpush3.bf16.msra.mxu0 %v5262_v49  ;;  %v2668_v10 = vpop.permute.xlu1 %2667 }
 0x4af   :  { %5295 = vmatpush3.bf16.msra.mxu1 %v5294_v62  ;;  %5265 = vmatprep.subr.bf16.mxu0 %v5264_v7  ;;  %v6641_v25 = vmax.f32 %v2615_v44, %v2668_v10  ;;  %v2822_v44 = vunpack.c.l.s4 %v5862_v55 }
 0x4b0   :  { %5297 = vmatprep.subr.bf16.mxu1 %v5296_v28 }
 0x4b1   :  { %2777 = vrot.lane.b32.xlu1 %v2695_v58, %s5848_s20  ;;  %2703 = vrot.lane.b32.xlu0 %v6615_v8, %s5860_s5  ;;  %v5300_v58 = vpack.c.bf16 %v3229_v4, %v3228_v42  ;;  %v2823_v57 = vunpack.c.0.s8 %v2822_v44 }
 0x4b2   :  { %5267 = vmatpush3.bf16.msra.mxu0 %v5266_v18  ;;  %v2648_v1 = vpop.permute.xlu1 %2647 }
 0x4b3   :  { %5299 = vmatpush3.bf16.msra.mxu1 %v5298_v32  ;;  %5301 = vmatprep.subr.bf16.mxu0 %v5300_v58  ;;  %v6647_v24 = vmax.f32 %v2614_v14, %v2648_v1  ;;  %v6658_v45 = vsub.s32 %v2823_v57, %v6892_v38  ;;  %v3244_v57 = vld [vmem:[#allocation13 + $0x300] sm:$0xff] }
 0x4b4   :  { %5333 = vmatprep.subr.bf16.mxu1 %v5332_v3  ;;  %v3213_v3 = vld [vmem:[#allocation13 + $0x208] sm:$0xff] }
 0x4b5   :  { %2687 = vrot.lane.b32.xlu1 %v2616_v37, %s5860_s5  ;;  %2747 = vrot.lane.b32.xlu0 %v6623_v20, %s5860_s5 }
 0x4b9   :  { %2707 = vrot.lane.b32.xlu1 %v6632_v36, %s5860_s5  ;;  %2719 = vrot.lane.b32.xlu0 %v2654_v19, %s5861_s14 }
 0x4bd   :  { %2751 = vrot.lane.b32.xlu1 %v6641_v25, %s5860_s5 }
 0x4c1   :  { %2723 = vrot.lane.b32.xlu1 %v6647_v24, %s5861_s14 }
 0x507   :  { %v2702_v56 = vpop.permute.xlu0 %2701 }
 0x508   :  { %v2785_v50 = vsel %vm212_vm4, %v6572_v63, %v2702_v56 }
 0x50b   :  { %v2746_v48 = vpop.permute.xlu0 %2745 }
 0x50c   :  { %v2799_v14 = vsel %vm212_vm4, %v6578_v6, %v2746_v48 }
 0x50f   :  { %v2706_v35 = vpop.permute.xlu1 %2705  ;;  %v2718_v30 = vpop.permute.xlu0 %2717 }
 0x510   :  { %v2790_v9 = vsel %vm2789_vm7, %v2785_v50, %v2718_v30  ;;  %v2787_v12 = vsel %vm212_vm4, %v6584_v47, %v2706_v35  ;;  %v3230_v35 = vld [vmem:[#allocation13 + $0x290] sm:$0xff]  ;;  %v3245_v50 = vld [vmem:[#allocation13 + $0x308] sm:$0xff] }
 0x513   :  { %v2750_v31 = vpop.permute.xlu1 %2749  ;;  %v2762_v52 = vpop.permute.xlu0 %2761 }
 0x514   :  { %v2803_v34 = vsel %vm2789_vm7, %v2799_v14, %v2762_v52  ;;  %v2801_v38 = vsel %vm212_vm4, %v6593_v23, %v2750_v31  ;;  %v5302_v31 = vpack.c.bf16 %v3213_v3, %v3212_v39  ;;  %v3214_v14 = vld [vmem:[#allocation13 + $0x210] sm:$0xff]  ;;  %v3248_v39 = vld [vmem:[#allocation13 + $0x320] sm:$0xff]  ;;  %v3249_v3 = vld [vmem:[#allocation13 + $0x328] sm:$0xff] }
 0x517   :  { %v2722_v60 = vpop.permute.xlu1 %2721  ;;  %v2730_v13 = vpop.permute.xlu0 %2729 }
 0x518   :  { %v2795_v2 = vsel %vm2794_vm8, %v2790_v9, %v2730_v13  ;;  %v2792_v7 = vsel %vm2789_vm7, %v2787_v12, %v2722_v60 }
 0x51b   :  { %v2766_v59 = vpop.permute.xlu1 %2765  ;;  %v2774_v17 = vpop.permute.xlu0 %2773 }
 0x51c   :  { %v2807_v27 = vsel %vm2794_vm8, %v2803_v34, %v2774_v17  ;;  %v2805_v61 = vsel %vm2789_vm7, %v2801_v38, %v2766_v59  ;;  %v5304_v34 = vpack.c.bf16 %v3231_v41, %v3230_v35  ;;  %v3267_v35 = vld [vmem:[#allocation13 + $0x3b8] sm:$0xff]  ;;  %v3236_v41 = vld [vmem:[#allocation13 + $0x2c0] sm:$0xff] }
 0x51d   :  { %v2819_v40 = vcombine.low %v2795_v2, %v2807_v27  ;;  %v2820_v49 = vcombine.high %v2795_v2, %v2807_v27  ;;  %v3215_v2 = vld [vmem:[#allocation13 + $0x218] sm:$0xff]  ;;  %v3262_v27 = vld [vmem:[#allocation13 + $0x390] sm:$0xff] }
 0x51f   :  { %v2827_v63 = vrot.slane %v2819_v40, %v6658_v45  ;;  %v2734_v33 = vpop.permute.xlu1 %2733  ;;  %v2684_v46 = vpop.permute.xlu0 %2683  ;;  %v2834_v51 = vrot.slane %v2820_v49, %v6658_v45  ;;  %v3263_v40 = vld [vmem:[#allocation13 + $0x398] sm:$0xff] }
 0x520   :  { %v2694_v6 = vmax.f32 %v2608_v54, %v2684_v46  ;;  %v2797_v11 = vsel %vm2794_vm8, %v2792_v7, %v2734_v33 }
 0x521   :  { %v2835_v62 = vcombine.high %v2827_v63, %v2827_v63  ;;  %v4094_v21 = vrot.slane %v2827_v63, 9  ;;  %v2836_v22 = vcombine.high %v2834_v51, %v2834_v51  ;;  %v4096_v42 = vrot.slane %v2834_v51, 9 }
 0x522   :  { %2763 = vrot.lane.b32.xlu0 %v2694_v6, %s5861_s14 }
 0x523   :  { %v2778_v15 = vpop.permute.xlu1 %2777  ;;  %v4095_v23 = vrot.slane %v2835_v62, 9  ;;  %v2955_v18 = vmax.f32 %v2827_v63, %v4094_v21  ;;  %v6685_v52 = vmax.f32 %v2834_v51, %v4096_v42  ;;  %v3232_v51 = vld [vmem:[#allocation13 + $0x2a0] sm:$0xff]  ;;  %v5336_v21 = vpack.c.bf16 %v3263_v40, %v3262_v27  ;;  %v3265_v42 = vld [vmem:[#allocation13 + $0x3a8] sm:$0xff] }
 0x524   :  { %v2809_v54 = vsel %vm2794_vm8, %v2805_v61, %v2778_v15  ;;  %v5334_v61 = vpack.c.bf16 %v3245_v50, %v3244_v57  ;;  %v5306_v15 = vpack.c.bf16 %v3215_v2, %v3214_v14  ;;  %v3221_v50 = vld [vmem:[#allocation13 + $0x248] sm:$0xff]  ;;  %v3268_v14 = vld [vmem:[#allocation13 + $0x3c0] sm:$0xff]  ;;  %v3239_v2 = vld [vmem:[#allocation13 + $0x2d8] sm:$0xff] }
 0x525   :  { %v2855_v0 = vcombine.low %v2797_v11, %v2809_v54  ;;  %v2856_v47 = vcombine.high %v2797_v11, %v2809_v54  ;;  %v2956_v10 = vmax.f32 %v2835_v62, %v4095_v23  ;;  %v2980_v30 = vrot.slane %v2955_v18, %v6891_v43  ;;  %v3233_v62 = vld [vmem:[#allocation13 + $0x2a8] sm:$0xff]  ;;  %v3216_v23 = vld [vmem:[#allocation13 + $0x220] sm:$0xff] }
 0x526   :  { %2731 = vrot.lane.b32.xlu0 %v2654_v19, %s5848_s20  ;;  %v4097_v19 = vrot.slane %v2836_v22, 9  ;;  %v2976_v44 = vrot.slane %v2955_v18, %v6890_v16  ;;  %v3234_v18 = vld [vmem:[#allocation13 + $0x2b0] sm:$0xff] }
 0x527   :  { %v2863_v5 = vrot.slane %v2855_v0, %v6658_v45  ;;  %v2870_v53 = vrot.slane %v2856_v47, %v6658_v45  ;;  %v2688_v28 = vpop.permute.xlu1 %2687  ;;  %v3003_v33 = vrot.slane %v2956_v10, %v6891_v43  ;;  %v3246_v47 = vld [vmem:[#allocation13 + $0x310] sm:$0xff] }
 0x528   :  { %v2696_v4 = vmax.f32 %v2616_v37, %v2688_v28  ;;  %v6694_v59 = vmax.f32 %v2836_v22, %v4097_v19  ;;  %v3247_v22 = vld [vmem:[#allocation13 + $0x318] sm:$0xff]  ;;  %v3264_v28 = vld [vmem:[#allocation13 + $0x3a0] sm:$0xff] }
 0x529   :  { %v2871_v29 = vcombine.high %v2863_v5, %v2863_v5  ;;  %v2872_v26 = vcombine.high %v2870_v53, %v2870_v53  ;;  %v4102_v32 = vrot.slane %v2863_v5, 9  ;;  %v4104_v58 = vrot.slane %v2870_v53, 9 }
 0x52a   :  { %2767 = vrot.lane.b32.xlu1 %v2696_v4, %s5861_s14  ;;  %2775 = vrot.lane.b32.xlu0 %v2694_v6, %s5848_s20  ;;  %v2999_v6 = vrot.slane %v2956_v10, %v6890_v16  ;;  %v3047_v0 = vrot.slane %v6694_v59, %v6891_v43  ;;  %v3218_v10 = vld [vmem:[#allocation13 + $0x230] sm:$0xff] }
 0x52b   :  { %v2963_v1 = vmax.f32 %v2863_v5, %v4102_v32  ;;  %v4103_v56 = vrot.slane %v2871_v29, 9  ;;  %v6682_v48 = vmax.f32 %v2870_v53, %v4104_v58  ;;  %v4105_v37 = vrot.slane %v2872_v26, 9  ;;  %v3217_v53 = vld [vmem:[#allocation13 + $0x228] sm:$0xff] }
 0x52c   :  { %v5308_v5 = vpack.c.bf16 %v3233_v62, %v3232_v51  ;;  %v5310_v32 = vpack.c.bf16 %v3217_v53, %v3216_v23  ;;  %v5340_v58 = vpack.c.bf16 %v3265_v42, %v3264_v28  ;;  %v3240_v51 = vld [vmem:[#allocation13 + $0x2e0] sm:$0xff]  ;;  %v3241_v62 = vld [vmem:[#allocation13 + $0x2e8] sm:$0xff]  ;;  %v3243_v53 = vld [vmem:[#allocation13 + $0x2f8] sm:$0xff] }
 0x52d   :  { %v2988_v55 = vrot.slane %v2963_v1, %v6891_v43  ;;  %v2984_v60 = vrot.slane %v2963_v1, %v6890_v16  ;;  %v2964_v13 = vmax.f32 %v2871_v29, %v4103_v56  ;;  %v3033_v9 = vrot.slane %v6682_v48, %v6891_v43  ;;  %v3235_v29 = vld [vmem:[#allocation13 + $0x2b8] sm:$0xff]  ;;  %v3266_v56 = vld [vmem:[#allocation13 + $0x3b0] sm:$0xff]  ;;  %v3273_v23 = vld [vmem:[#allocation13 + $0x3e8] sm:$0xff] }
 0x52e   :  { %2735 = vrot.lane.b32.xlu1 %v6647_v24, %s5848_s20  ;;  %v6696_v17 = vmax.f32 %v2872_v26, %v4105_v37  ;;  %v3025_v24 = vrot.slane %v6685_v52, %v6891_v43  ;;  %v5338_v26 = vpack.c.bf16 %v3247_v22, %v3246_v47  ;;  %v5312_v19 = vpack.c.bf16 %v3235_v29, %v3234_v18  ;;  %v3219_v1 = vld [vmem:[#allocation13 + $0x238] sm:$0xff]  ;;  %v3237_v37 = vld [vmem:[#allocation13 + $0x2c8] sm:$0xff]  ;;  %v3272_v22 = vld [vmem:[#allocation13 + $0x3e0] sm:$0xff] }
 0x52f   :  { %v2991_v49 = vsel %vm2989_vm9, %v2988_v55, %v2980_v30  ;;  %v2990_v63 = vsel %vm2989_vm9, %v2984_v60, %v2976_v44  ;;  %v3011_v46 = vrot.slane %v2964_v13, %v6891_v43  ;;  %v3007_v12 = vrot.slane %v2964_v13, %v6890_v16  ;;  %v3250_v44 = vld [vmem:[#allocation13 + $0x330] sm:$0xff]  ;;  %v3251_v60 = vld [vmem:[#allocation13 + $0x338] sm:$0xff]  ;;  %v3220_v13 = vld [vmem:[#allocation13 + $0x240] sm:$0xff] }
 0x530   :  { %3475 = vmatprep.mubr.f32.mxu0 %v2991_v49  ;;  %v3055_v38 = vrot.slane %v6696_v17, %v6891_v43  ;;  %v3035_v11 = vsel %vm2989_vm9, %v3033_v9, %v3025_v24  ;;  %v5342_v30 = vpack.c.bf16 %v3249_v3, %v3248_v39  ;;  %v5344_v55 = vpack.c.bf16 %v3267_v35, %v3266_v56  ;;  %v3269_v9 = vld [vmem:[#allocation13 + $0x3c8] sm:$0xff]  ;;  %v3256_v18 = vld [vmem:[#allocation13 + $0x360] sm:$0xff]  ;;  %v3274_v39 = vld [vmem:[#allocation13 + $0x3f0] sm:$0xff] }
 0x531   :  { %3476 = vmatmul.mubr.f32.vlgmr.msra.gmra.mrb[8].mxu0 %v2990_v63  ;;  %v3013_v7 = vsel %vm2989_vm9, %v3011_v46, %v3003_v33  ;;  %v3012_v54 = vsel %vm2989_vm9, %v3007_v12, %v2999_v6  ;;  %v5316_v57 = vpack.c.bf16 %v3237_v37, %v3236_v41  ;;  %v5346_v27 = vpack.c.bf16 %v3251_v60, %v3250_v44  ;;  %v3252_v63 = vld [vmem:[#allocation13 + $0x340] sm:$0xff]  ;;  %v3253_v33 = vld [vmem:[#allocation13 + $0x348] sm:$0xff]  ;;  %v3222_v46 = vld [vmem:[#allocation13 + $0x250] sm:$0xff] }
 0x532   :  { %5303 = vmatpush3.bf16.msra.mxu0 %v5302_v31  ;;  %2779 = vrot.lane.b32.xlu1 %v2696_v4, %s5848_s20  ;;  %v3057_v4 = vsel %vm2989_vm9, %v3055_v38, %v3047_v0  ;;  %v5314_v31 = vpack.c.bf16 %v3219_v1, %v3218_v10  ;;  %v5318_v40 = vpack.c.bf16 %v3221_v50, %v3220_v13  ;;  %v3223_v6 = vld [vmem:[#allocation13 + $0x258] sm:$0xff]  ;;  %v3270_v12 = vld [vmem:[#allocation13 + $0x3d0] sm:$0xff]  ;;  %v3225_v47 = vld [vmem:[#allocation13 + $0x268] sm:$0xff] }
 0x533   :  { %3545 = vmatprep.mubr.f32.mxu1 %v3013_v7  ;;  %3615 = vmatprep.mubr.f32.mxu0 %v3035_v11  ;;  %v5348_v49 = vpack.c.bf16 %v3269_v9, %v3268_v14  ;;  %v3271_v38 = vld [vmem:[#allocation13 + $0x3d8] sm:$0xff]  ;;  %v5350_v7 = vpack.c.bf16 %v3253_v33, %v3252_v63  ;;  %v5324_v0 = vpack.c.bf16 %v3241_v62, %v3240_v51  ;;  %v3257_v29 = vld [vmem:[#allocation13 + $0x368] sm:$0xff]  ;;  %v3292_v10 = vld [vmem:[#allocation13 + $0x480] sm:$0xff] }
 0x534   :  { %3546 = vmatmul.mubr.f32.vlgmr.msra.gmra.mrb[24].mxu1 %v3012_v54  ;;  %5305 = vmatprep.subr.bf16.mxu0 %v5304_v34  ;;  %v3238_v34 = vld [vmem:[#allocation13 + $0x2d0] sm:$0xff]  ;;  %v3255_v11 = vld [vmem:[#allocation13 + $0x358] sm:$0xff]  ;;  %v3224_v54 = vld [vmem:[#allocation13 + $0x260] sm:$0xff]  ;;  %v5358_v1 = vpack.c.bf16 %v3257_v29, %v3256_v18  ;;  %v3029_v13 = vrot.slane %v6682_v48, %v6890_v16  ;;  %v3021_v9 = vrot.slane %v6685_v52, %v6890_v16 }
 0x535   :  { %5335 = vmatpush3.bf16.msra.mxu1 %v5334_v61  ;;  %3685 = vmatprep.mubr.f32.mxu1 %v3057_v4  ;;  %v5320_v24 = vpack.c.bf16 %v3239_v2, %v3238_v34  ;;  %v5322_v61 = vpack.c.bf16 %v3223_v6, %v3222_v46  ;;  %v5326_v42 = vpack.c.bf16 %v3225_v47, %v3224_v54  ;;  %v3275_v3 = vld [vmem:[#allocation13 + $0x3f8] sm:$0xff]  ;;  %v3258_v41 = vld [vmem:[#allocation13 + $0x370] sm:$0xff]  ;;  %v3324_v44 = vld [vmem:[#allocation13 + $0x580] sm:$0xff] }
 0x536   :  { %5307 = vmatpush3.bf16.msra.mxu0 %v5306_v15  ;;  %5337 = vmatprep.subr.bf16.mxu1 %v5336_v21  ;;  %v5352_v15 = vpack.c.bf16 %v3271_v38, %v3270_v12  ;;  %v3254_v21 = vld [vmem:[#allocation13 + $0x350] sm:$0xff]  ;;  %v5356_v4 = vpack.c.bf16 %v3273_v23, %v3272_v22  ;;  %v5360_v35 = vpack.c.bf16 %v3275_v3, %v3274_v39  ;;  %v3259_v37 = vld [vmem:[#allocation13 + $0x378] sm:$0xff]  ;;  %v3325_v60 = vld [vmem:[#allocation13 + $0x588] sm:$0xff] }
 0x537   :  { %5309 = vmatprep.subr.bf16.mxu0 %v5308_v5  ;;  %v3242_v5 = vld [vmem:[#allocation13 + $0x2f0] sm:$0xff]  ;;  %v5354_v28 = vpack.c.bf16 %v3255_v11, %v3254_v21  ;;  %v3295_v50 = vld [vmem:[#allocation13 + $0x498] sm:$0xff]  ;;  %v5362_v14 = vpack.c.bf16 %v3259_v37, %v3258_v41  ;;  %v5396_v2 = vpack.c.bf16 %v3325_v60, %v3324_v44  ;;  %v3051_v63 = vrot.slane %v6696_v17, %v6890_v16  ;;  %v3296_v12 = vld [vmem:[#allocation13 + $0x4a0] sm:$0xff] }
 0x538   :  { %v3279_v48 = vld [vmem:[#allocation13 + $0x418] sm:$0xff]  ;;  %v3326_v46 = vld [vmem:[#allocation13 + $0x590] sm:$0xff]  ;;  %v3034_v6 = vsel %vm2989_vm9, %v3029_v13, %v3021_v9  ;;  %v3297_v38 = vld [vmem:[#allocation13 + $0x4a8] sm:$0xff]  ;;  %v3043_v52 = vrot.slane %v6694_v59, %v6890_v16 }
 0x539   :  { %5339 = vmatpush3.bf16.msra.mxu1 %v5338_v26  ;;  %v3226_v26 = vld [vmem:[#allocation13 + $0x270] sm:$0xff]  ;;  %v5372_v11 = vpack.c.bf16 %v3297_v38, %v3296_v12  ;;  %v3281_v54 = vld [vmem:[#allocation13 + $0x428] sm:$0xff]  ;;  %v3299_v23 = vld [vmem:[#allocation13 + $0x4b8] sm:$0xff] }
 0x53a   :  { %5311 = vmatpush3.bf16.msra.mxu0 %v5310_v32  ;;  %5341 = vmatprep.subr.bf16.mxu1 %v5340_v58  ;;  %v5328_v32 = vpack.c.bf16 %v3243_v53, %v3242_v5  ;;  %v3227_v58 = vld [vmem:[#allocation13 + $0x278] sm:$0xff]  ;;  %v3310_v17 = vld [vmem:[#allocation13 + $0x510] sm:$0xff]  ;;  %v3056_v21 = vsel %vm2989_vm9, %v3051_v63, %v3043_v52  ;;  %v3329_v47 = vld [vmem:[#allocation13 + $0x5a8] sm:$0xff] }
 0x53b   :  { %5313 = vmatprep.subr.bf16.mxu0 %v5312_v19  ;;  %v3293_v19 = vld [vmem:[#allocation13 + $0x488] sm:$0xff]  ;;  %v5330_v56 = vpack.c.bf16 %v3227_v58, %v3226_v26  ;;  %v3298_v22 = vld [vmem:[#allocation13 + $0x4b0] sm:$0xff]  ;;  %v3283_v29 = vld [vmem:[#allocation13 + $0x438] sm:$0xff] }
 0x53c   :  { %v5376_v18 = vpack.c.bf16 %v3299_v23, %v3298_v22  ;;  %v3330_v26 = vld [vmem:[#allocation13 + $0x5b0] sm:$0xff]  ;;  %v3300_v58 = vld [vmem:[#allocation13 + $0x4c0] sm:$0xff]  ;;  %v3301_v39 = vld [vmem:[#allocation13 + $0x4c8] sm:$0xff] }
 0x53d   :  { %5343 = vmatpush3.bf16.msra.mxu1 %v5342_v30  ;;  %v3276_v30 = vld [vmem:[#allocation13 + $0x400] sm:$0xff]  ;;  %v5380_v41 = vpack.c.bf16 %v3301_v39, %v3300_v58  ;;  %v3285_v37 = vld [vmem:[#allocation13 + $0x448] sm:$0xff]  ;;  %v3303_v44 = vld [vmem:[#allocation13 + $0x4d8] sm:$0xff] }
 0x53e   :  { %5315 = vmatpush3.bf16.msra.mxu0 %v5314_v31  ;;  %5345 = vmatprep.subr.bf16.mxu1 %v5344_v55  ;;  %v5364_v31 = vpack.c.bf16 %v3293_v19, %v3292_v10  ;;  %v3277_v55 = vld [vmem:[#allocation13 + $0x408] sm:$0xff]  ;;  %v3286_v9 = vld [vmem:[#allocation13 + $0x450] sm:$0xff]  ;;  %v3288_v12 = vld [vmem:[#allocation13 + $0x460] sm:$0xff] }
 0x53f   :  { %5317 = vmatprep.subr.bf16.mxu0 %v5316_v57  ;;  %v3294_v57 = vld [vmem:[#allocation13 + $0x490] sm:$0xff]  ;;  %v5366_v34 = vpack.c.bf16 %v3277_v55, %v3276_v30  ;;  %v3332_v30 = vld [vmem:[#allocation13 + $0x5c0] sm:$0xff]  ;;  %v3305_v63 = vld [vmem:[#allocation13 + $0x4e8] sm:$0xff] }
 0x540   :  { %v5368_v33 = vpack.c.bf16 %v3295_v50, %v3294_v57  ;;  %v3302_v55 = vld [vmem:[#allocation13 + $0x4d0] sm:$0xff]  ;;  %v3316_v50 = vld [vmem:[#allocation13 + $0x540] sm:$0xff]  ;;  %v3289_v52 = vld [vmem:[#allocation13 + $0x468] sm:$0xff] }
 0x541   :  { %5347 = vmatpush3.bf16.msra.mxu1 %v5346_v27  ;;  %v3308_v27 = vld [vmem:[#allocation13 + $0x500] sm:$0xff]  ;;  %v3291_v22 = vld [vmem:[#allocation13 + $0x478] sm:$0xff]  ;;  %v3338_v23 = vld [vmem:[#allocation13 + $0x5f0] sm:$0xff] }
 0x542   :  { %5319 = vmatpush3.bf16.msra.mxu0 %v5318_v40  ;;  %5349 = vmatprep.subr.bf16.mxu1 %v5348_v49  ;;  %v3309_v40 = vld [vmem:[#allocation13 + $0x508] sm:$0xff]  ;;  %v3278_v49 = vld [vmem:[#allocation13 + $0x410] sm:$0xff] }
 0x543   :  { %5321 = vmatprep.subr.bf16.mxu0 %v5320_v24  ;;  %v3327_v24 = vld [vmem:[#allocation13 + $0x598] sm:$0xff]  ;;  %v5398_v51 = vpack.c.bf16 %v3309_v40, %v3308_v27  ;;  %v5370_v62 = vpack.c.bf16 %v3279_v48, %v3278_v49  ;;  %v3334_v27 = vld [vmem:[#allocation13 + $0x5d0] sm:$0xff]  ;;  %v3304_v49 = vld [vmem:[#allocation13 + $0x4e0] sm:$0xff] }
 0x544   :  { %v3335_v40 = vld [vmem:[#allocation13 + $0x5d8] sm:$0xff]  ;;  %v5388_v38 = vpack.c.bf16 %v3305_v63, %v3304_v49  ;;  %v3389_v58 = vld [vmem:[#allocation13 + $0x788] sm:$0xff] }
 0x545   :  { %5351 = vmatpush3.bf16.msra.mxu1 %v5350_v7  ;;  %v5400_v7 = vpack.c.bf16 %v3327_v24, %v3326_v46  ;;  %v5416_v46 = vpack.c.bf16 %v3335_v40, %v3334_v27  ;;  %v3318_v24 = vld [vmem:[#allocation13 + $0x550] sm:$0xff] }
 0x546   :  { %5323 = vmatpush3.bf16.msra.mxu0 %v5322_v61  ;;  %5353 = vmatprep.subr.bf16.mxu1 %v5352_v15  ;;  %v3311_v61 = vld [vmem:[#allocation13 + $0x518] sm:$0xff]  ;;  %v3280_v15 = vld [vmem:[#allocation13 + $0x420] sm:$0xff] }
 0x547   :  { %5325 = vmatprep.subr.bf16.mxu0 %v5324_v0  ;;  %v3328_v0 = vld [vmem:[#allocation13 + $0x5a0] sm:$0xff]  ;;  %v5402_v59 = vpack.c.bf16 %v3311_v61, %v3310_v17  ;;  %v5374_v5 = vpack.c.bf16 %v3281_v54, %v3280_v15  ;;  %v3307_v17 = vld [vmem:[#allocation13 + $0x4f8] sm:$0xff]  ;;  %v5390_v15 = vpack.c.bf16 %v3289_v52, %v3288_v12  ;;  %v3321_v54 = vld [vmem:[#allocation13 + $0x568] sm:$0xff] }
 0x548   :  { %v5404_v53 = vpack.c.bf16 %v3329_v47, %v3328_v0  ;;  %v3290_v0 = vld [vmem:[#allocation13 + $0x470] sm:$0xff] }
 0x549   :  { %5355 = vmatpush3.bf16.msra.mxu1 %v5354_v28  ;;  %v3312_v28 = vld [vmem:[#allocation13 + $0x520] sm:$0xff] }
 0x54a   :  { %5327 = vmatpush3.bf16.msra.mxu0 %v5326_v42  ;;  %5357 = vmatprep.subr.bf16.mxu1 %v5356_v4  ;;  %v3313_v42 = vld [vmem:[#allocation13 + $0x528] sm:$0xff]  ;;  %v3282_v4 = vld [vmem:[#allocation13 + $0x430] sm:$0xff] }
 0x54b   :  { %5329 = vmatprep.subr.bf16.mxu0 %v5328_v32  ;;  %v3331_v32 = vld [vmem:[#allocation13 + $0x5b8] sm:$0xff]  ;;  %v5406_v3 = vpack.c.bf16 %v3313_v42, %v3312_v28  ;;  %v5378_v10 = vpack.c.bf16 %v3283_v29, %v3282_v4  ;;  %v5394_v42 = vpack.c.bf16 %v3291_v22, %v3290_v0  ;;  %v3372_v0 = vld [vmem:[#allocation13 + $0x700] sm:$0xff] }
 0x54c   :  { %v5408_v19 = vpack.c.bf16 %v3331_v32, %v3330_v26  ;;  %v3323_v29 = vld [vmem:[#allocation13 + $0x578] sm:$0xff]  ;;  %v3388_v32 = vld [vmem:[#allocation13 + $0x780] sm:$0xff] }
 0x54d   :  { %5359 = vmatpush3.bf16.msra.mxu1 %v5358_v1  ;;  %v3314_v1 = vld [vmem:[#allocation13 + $0x530] sm:$0xff] }
 0x54e   :  { %5331 = vmatpush3.bf16.msra.mxu0 %v5330_v56  ;;  %5361 = vmatprep.subr.bf16.mxu1 %v5360_v35  ;;  %v3315_v56 = vld [vmem:[#allocation13 + $0x538] sm:$0xff]  ;;  %v3284_v35 = vld [vmem:[#allocation13 + $0x440] sm:$0xff] }
 0x54f   :  { %5365 = vmatprep.subr.bf16.mxu0 %v5364_v31  ;;  %v3333_v31 = vld [vmem:[#allocation13 + $0x5c8] sm:$0xff]  ;;  %v5410_v60 = vpack.c.bf16 %v3315_v56, %v3314_v1  ;;  %v5382_v13 = vpack.c.bf16 %v3285_v37, %v3284_v35  ;;  %v2708_v1 = vpop.permute.xlu1 %2707 }
 0x550   :  { %v5412_v57 = vpack.c.bf16 %v3333_v31, %v3332_v30 }
 0x551   :  { %5363 = vmatpush3.bf16.msra.mxu1 %v5362_v14  ;;  %3616 = vmatmul.mubr.f32.vlgmr.msra.gmra.mrb[10].mxu0 %v3034_v6  ;;  %v3317_v14 = vld [vmem:[#allocation13 + $0x548] sm:$0xff]  ;;  %v3319_v6 = vld [vmem:[#allocation13 + $0x558] sm:$0xff] }
 0x552   :  { %5367 = vmatpush3.bf16.msra.mxu0 %v5366_v34  ;;  %5397 = vmatprep.subr.bf16.mxu1 %v5396_v2  ;;  %v5384_v34 = vpack.c.bf16 %v3303_v44, %v3302_v55  ;;  %v3287_v2 = vld [vmem:[#allocation13 + $0x458] sm:$0xff]  ;;  %v5418_v61 = vpack.c.bf16 %v3319_v6, %v3318_v24 }
 0x553   :  { %5369 = vmatprep.subr.bf16.mxu0 %v5368_v33  ;;  %v5414_v33 = vpack.c.bf16 %v3317_v14, %v3316_v50  ;;  %v5386_v48 = vpack.c.bf16 %v3287_v2, %v3286_v9  ;;  %v2752_v35 = vpop.permute.xlu1 %2751 }
 0x554   :  { %3686 = vmatmul.mubr.f32.vlgmr.msra.gmra.mrb[26].mxu1 %v3056_v21 }
 0x555   :  { %5399 = vmatpush3.bf16.msra.mxu1 %v5398_v51  ;;  %v3336_v51 = vld [vmem:[#allocation13 + $0x5e0] sm:$0xff] }
 0x556   :  { %5371 = vmatpush3.bf16.msra.mxu0 %v5370_v62  ;;  %5401 = vmatprep.subr.bf16.mxu1 %v5400_v7  ;;  %v3337_v62 = vld [vmem:[#allocation13 + $0x5e8] sm:$0xff]  ;;  %v3306_v7 = vld [vmem:[#allocation13 + $0x4f0] sm:$0xff] }
 0x557   :  { %5373 = vmatprep.subr.bf16.mxu0 %v5372_v11  ;;  %v5420_v21 = vpack.c.bf16 %v3337_v62, %v3336_v51  ;;  %v3320_v11 = vld [vmem:[#allocation13 + $0x560] sm:$0xff]  ;;  %v5392_v47 = vpack.c.bf16 %v3307_v17, %v3306_v7  ;;  %v2724_v37 = vpop.permute.xlu1 %2723 }
 0x558   :  { %v5422_v28 = vpack.c.bf16 %v3321_v54, %v3320_v11  ;;  %v3340_v17 = vld [vmem:[#allocation13 + $0x600] sm:$0xff]  ;;  %v3341_v54 = vld [vmem:[#allocation13 + $0x608] sm:$0xff] }
 0x559   :  { %5403 = vmatpush3.bf16.msra.mxu1 %v5402_v59  ;;  %v3339_v59 = vld [vmem:[#allocation13 + $0x5f8] sm:$0xff] }
 0x55a   :  { %5375 = vmatpush3.bf16.msra.mxu0 %v5374_v5  ;;  %5405 = vmatprep.subr.bf16.mxu1 %v5404_v53  ;;  %v3356_v5 = vld [vmem:[#allocation13 + $0x680] sm:$0xff]  ;;  %v3357_v53 = vld [vmem:[#allocation13 + $0x688] sm:$0xff]  ;;  %v5424_v4 = vpack.c.bf16 %v3339_v59, %v3338_v23 }
 0x55b   :  { %5377 = vmatprep.subr.bf16.mxu0 %v5376_v18  ;;  %v3322_v18 = vld [vmem:[#allocation13 + $0x570] sm:$0xff]  ;;  %v5428_v26 = vpack.c.bf16 %v3357_v53, %v3356_v5 }
 0x55c   :  { %v5426_v39 = vpack.c.bf16 %v3323_v29, %v3322_v18  ;;  %v5430_v18 = vpack.c.bf16 %v3341_v54, %v3340_v17  ;;  %v3394_v17 = vld [vmem:[#allocation13 + $0x7b0] sm:$0xff] }
 0x55d   :  { %5407 = vmatpush3.bf16.msra.mxu1 %v5406_v3  ;;  %v5460_v3 = vpack.c.bf16 %v3389_v58, %v3388_v32 }
 0x55e   :  { %5379 = vmatpush3.bf16.msra.mxu0 %v5378_v10  ;;  %5409 = vmatprep.subr.bf16.mxu1 %v5408_v19  ;;  %v2704_v10 = vpop.permute.xlu0 %2703 }
 0x55f   :  { %5381 = vmatprep.subr.bf16.mxu0 %v5380_v41  ;;  %v2786_v31 = vsel %vm212_vm4, %v6615_v8, %v2704_v10  ;;  %v2788_v8 = vsel %vm212_vm4, %v6632_v36, %v2708_v1  ;;  %v3342_v10 = vld [vmem:[#allocation13 + $0x610] sm:$0xff] }
 0x560   :  { %v2793_v63 = vsel %vm2789_vm7, %v2788_v8, %v2724_v37  ;;  %v3390_v37 = vld [vmem:[#allocation13 + $0x790] sm:$0xff] }
 0x561   :  { %5411 = vmatpush3.bf16.msra.mxu1 %v5410_v60 }
 0x562   :  { %5383 = vmatpush3.bf16.msra.mxu0 %v5382_v13  ;;  %5413 = vmatprep.subr.bf16.mxu1 %v5412_v57  ;;  %v2748_v19 = vpop.permute.xlu0 %2747 }
 0x563   :  { %5385 = vmatprep.subr.bf16.mxu0 %v5384_v34  ;;  %v2800_v55 = vsel %vm212_vm4, %v6623_v20, %v2748_v19  ;;  %v2802_v20 = vsel %vm212_vm4, %v6641_v25, %v2752_v35 }
 0x565   :  { %5415 = vmatpush3.bf16.msra.mxu1 %v5414_v33 }
 0x566   :  { %5387 = vmatpush3.bf16.msra.mxu0 %v5386_v48  ;;  %5417 = vmatprep.subr.bf16.mxu1 %v5416_v46  ;;  %v2720_v56 = vpop.permute.xlu0 %2719 }
 0x567   :  { %5389 = vmatprep.subr.bf16.mxu0 %v5388_v38  ;;  %v2791_v44 = vsel %vm2789_vm7, %v2786_v31, %v2720_v56 }
 0x569   :  { %5419 = vmatpush3.bf16.msra.mxu1 %v5418_v61 }
 0x56a   :  { %5391 = vmatpush3.bf16.msra.mxu0 %v5390_v15  ;;  %5421 = vmatprep.subr.bf16.mxu1 %v5420_v21 }
 0x56b   :  { %5393 = vmatprep.subr.bf16.mxu0 %v5392_v47  ;;  %v3373_v47 = vld [vmem:[#allocation13 + $0x708] sm:$0xff] }
 0x56d   :  { %5423 = vmatpush3.bf16.msra.mxu1 %v5422_v28  ;;  %v3358_v28 = vld [vmem:[#allocation13 + $0x690] sm:$0xff] }
 0x56e   :  { %5395 = vmatpush3.bf16.msra.mxu0 %v5394_v42  ;;  %5425 = vmatprep.subr.bf16.mxu1 %v5424_v4  ;;  %v3359_v42 = vld [vmem:[#allocation13 + $0x698] sm:$0xff] }
 0x56f   :  { %5429 = vmatprep.subr.bf16.mxu0 %v5428_v26  ;;  %v5462_v26 = vpack.c.bf16 %v3373_v47, %v3372_v0  ;;  %v5432_v1 = vpack.c.bf16 %v3359_v42, %v3358_v28  ;;  %v3364_v0 = vld [vmem:[#allocation13 + $0x6c0] sm:$0xff]  ;;  %v3365_v47 = vld [vmem:[#allocation13 + $0x6c8] sm:$0xff] }
 0x570   :  { %v3396_v28 = vld [vmem:[#allocation13 + $0x7c0] sm:$0xff]  ;;  %v3397_v42 = vld [vmem:[#allocation13 + $0x7c8] sm:$0xff] }
 0x571   :  { %5427 = vmatpush3.bf16.msra.mxu1 %v5426_v39 }
 0x572   :  { %5461 = vmatprep.subr.bf16.mxu1 %v5460_v3 }
 0x594   :  { %v2764_v41 = vpop.permute.xlu0 %2763 }
 0x595   :  { %v2804_v60 = vsel %vm2789_vm7, %v2800_v55, %v2764_v41  ;;  %v3343_v41 = vld [vmem:[#allocation13 + $0x618] sm:$0xff] }
 0x598   :  { %v2732_v30 = vpop.permute.xlu0 %2731 }
 0x599   :  { %v2796_v50 = vsel %vm2794_vm8, %v2791_v44, %v2732_v30  ;;  %v3391_v30 = vld [vmem:[#allocation13 + $0x798] sm:$0xff] }
 0x59a   :  { %v5464_v8 = vpack.c.bf16 %v3391_v30, %v3390_v37  ;;  %v3350_v30 = vld [vmem:[#allocation13 + $0x650] sm:$0xff] }
 0x59c   :  { %v2768_v13 = vpop.permute.xlu1 %2767  ;;  %v2776_v57 = vpop.permute.xlu0 %2775 }
 0x59d   :  { %v2808_v14 = vsel %vm2794_vm8, %v2804_v60, %v2776_v57  ;;  %v2806_v33 = vsel %vm2789_vm7, %v2802_v20, %v2768_v13  ;;  %v3374_v20 = vld [vmem:[#allocation13 + $0x710] sm:$0xff] }
 0x59e   :  { %v2837_v9 = vcombine.low %v2796_v50, %v2808_v14  ;;  %v2838_v34 = vcombine.high %v2796_v50, %v2808_v14 }
 0x5a0   :  { %v2845_v2 = vrot.slane %v2837_v9, %v6658_v45  ;;  %v2736_v27 = vpop.permute.xlu1 %2735  ;;  %v2852_v40 = vrot.slane %v2838_v34, %v6658_v45  ;;  %v3360_v9 = vld [vmem:[#allocation13 + $0x6a0] sm:$0xff]  ;;  %v3361_v34 = vld [vmem:[#allocation13 + $0x6a8] sm:$0xff] }
 0x5a1   :  { %v2798_v24 = vsel %vm2794_vm8, %v2793_v63, %v2736_v27  ;;  %v5434_v27 = vpack.c.bf16 %v3343_v41, %v3342_v10  ;;  %v3381_v10 = vld [vmem:[#allocation13 + $0x748] sm:$0xff]  ;;  %v3399_v41 = vld [vmem:[#allocation13 + $0x7d8] sm:$0xff] }
 0x5a2   :  { %v2853_v49 = vcombine.high %v2845_v2, %v2845_v2  ;;  %v4098_v46 = vrot.slane %v2845_v2, 9  ;;  %v2854_v52 = vcombine.high %v2852_v40, %v2852_v40  ;;  %v4100_v62 = vrot.slane %v2852_v40, 9 }
 0x5a4   :  { %v2780_v48 = vpop.permute.xlu1 %2779  ;;  %v4099_v36 = vrot.slane %v2853_v49, 9  ;;  %v2959_v7 = vmax.f32 %v2845_v2, %v4098_v46  ;;  %v4101_v23 = vrot.slane %v2854_v52, 9  ;;  %v6748_v29 = vmax.f32 %v2852_v40, %v4100_v62  ;;  %v3375_v40 = vld [vmem:[#allocation13 + $0x718] sm:$0xff]  ;;  %v3393_v46 = vld [vmem:[#allocation13 + $0x7a8] sm:$0xff]  ;;  %v3376_v62 = vld [vmem:[#allocation13 + $0x720] sm:$0xff] }
 0x5a5   :  { %v2810_v6 = vsel %vm2794_vm8, %v2806_v33, %v2780_v48  ;;  %v3392_v48 = vld [vmem:[#allocation13 + $0x7a0] sm:$0xff] }
 0x5a6   :  { %v2873_v12 = vcombine.low %v2798_v24, %v2810_v6  ;;  %v2874_v38 = vcombine.high %v2798_v24, %v2810_v6  ;;  %v2960_v22 = vmax.f32 %v2853_v49, %v4099_v36  ;;  %v3065_v58 = vrot.slane %v2959_v7, %v6890_v16  ;;  %v3344_v6 = vld [vmem:[#allocation13 + $0x620] sm:$0xff]  ;;  %v3362_v36 = vld [vmem:[#allocation13 + $0x6b0] sm:$0xff] }
 0x5a7   :  { %v6755_v56 = vmax.f32 %v2854_v52, %v4101_v23  ;;  %v3113_v13 = vrot.slane %v6748_v29, %v6891_v43  ;;  %v5436_v24 = vpack.c.bf16 %v3361_v34, %v3360_v9  ;;  %v5466_v52 = vpack.c.bf16 %v3375_v40, %v3374_v20  ;;  %v3378_v23 = vld [vmem:[#allocation13 + $0x730] sm:$0xff]  ;;  %v3400_v9 = vld [vmem:[#allocation13 + $0x7e0] sm:$0xff]  ;;  %v3401_v34 = vld [vmem:[#allocation13 + $0x7e8] sm:$0xff] }
 0x5a8   :  { %v2881_v51 = vrot.slane %v2873_v12, %v6658_v45  ;;  %v2888_v25 = vrot.slane %v2874_v38, %v6658_v45  ;;  %v3069_v45 = vrot.slane %v2959_v7, %v6891_v43  ;;  %v3091_v44 = vrot.slane %v2960_v22, %v6891_v43  ;;  %v3345_v12 = vld [vmem:[#allocation13 + $0x628] sm:$0xff]  ;;  %v3370_v40 = vld [vmem:[#allocation13 + $0x6f0] sm:$0xff] }
 0x5a9   :  { %v3087_v57 = vrot.slane %v2960_v22, %v6890_v16  ;;  %v3135_v33 = vrot.slane %v6755_v56, %v6891_v43  ;;  %v3377_v7 = vld [vmem:[#allocation13 + $0x728] sm:$0xff] }
 0x5aa   :  { %v2889_v61 = vcombine.high %v2881_v51, %v2881_v51  ;;  %v2890_v15 = vcombine.high %v2888_v25, %v2888_v25  ;;  %v4106_v21 = vrot.slane %v2881_v51, 9  ;;  %v4108_v11 = vrot.slane %v2888_v25, 9 }
 0x5ab   :  { %v5470_v54 = vpack.c.bf16 %v3377_v7, %v3376_v62  ;;  %v3387_v62 = vld [vmem:[#allocation13 + $0x778] sm:$0xff] }
 0x5ac   :  { %v2967_v59 = vmax.f32 %v2881_v51, %v4106_v21  ;;  %v4107_v5 = vrot.slane %v2889_v61, 9  ;;  %v6745_v53 = vmax.f32 %v2888_v25, %v4108_v11  ;;  %v4109_v4 = vrot.slane %v2890_v15, 9  ;;  %v3363_v51 = vld [vmem:[#allocation13 + $0x6b8] sm:$0xff]  ;;  %v3346_v21 = vld [vmem:[#allocation13 + $0x630] sm:$0xff] }
 0x5ad   :  { %v5468_v25 = vpack.c.bf16 %v3393_v46, %v3392_v48  ;;  %v3347_v11 = vld [vmem:[#allocation13 + $0x638] sm:$0xff]  ;;  %v3385_v48 = vld [vmem:[#allocation13 + $0x768] sm:$0xff] }
 0x5ae   :  { %v3077_v32 = vrot.slane %v2967_v59, %v6891_v43  ;;  %v3073_v39 = vrot.slane %v2967_v59, %v6890_v16  ;;  %v2968_v3 = vmax.f32 %v2889_v61, %v4107_v5  ;;  %v3121_v19 = vrot.slane %v6745_v53, %v6891_v43  ;;  %v3395_v61 = vld [vmem:[#allocation13 + $0x7b8] sm:$0xff] }
 0x5af   :  { %v6757_v35 = vmax.f32 %v2890_v15, %v4109_v4  ;;  %v5440_v15 = vpack.c.bf16 %v3363_v51, %v3362_v36  ;;  %v5472_v22 = vpack.c.bf16 %v3395_v61, %v3394_v17  ;;  %v3379_v59 = vld [vmem:[#allocation13 + $0x738] sm:$0xff]  ;;  %v5442_v5 = vpack.c.bf16 %v3347_v11, %v3346_v21 }
 0x5b0   :  { %v3079_v31 = vsel %vm2989_vm9, %v3077_v32, %v3069_v45  ;;  %v3078_v55 = vsel %vm2989_vm9, %v3073_v39, %v3065_v58  ;;  %v3099_v60 = vrot.slane %v2968_v3, %v6891_v43  ;;  %v3095_v50 = vrot.slane %v2968_v3, %v6890_v16  ;;  %v3348_v45 = vld [vmem:[#allocation13 + $0x640] sm:$0xff]  ;;  %v3366_v32 = vld [vmem:[#allocation13 + $0x6d0] sm:$0xff]  ;;  %v3367_v58 = vld [vmem:[#allocation13 + $0x6d8] sm:$0xff] }
 0x5b1   :  { %3755 = vmatprep.mubr.f32.mxu0 %v3079_v31  ;;  %v3143_v14 = vrot.slane %v6757_v35, %v6891_v43  ;;  %v3123_v49 = vsel %vm2989_vm9, %v3121_v19, %v3113_v13  ;;  %v5438_v43 = vpack.c.bf16 %v3345_v12, %v3344_v6  ;;  %v5444_v4 = vpack.c.bf16 %v3365_v47, %v3364_v0  ;;  %v3380_v3 = vld [vmem:[#allocation13 + $0x740] sm:$0xff]  ;;  %v3351_v31 = vld [vmem:[#allocation13 + $0x658] sm:$0xff] }
 0x5b2   :  { %3756 = vmatmul.mubr.f32.vlgmr.msra.gmra.mrb[12].mxu0 %v3078_v55  ;;  %v3101_v2 = vsel %vm2989_vm9, %v3099_v60, %v3091_v44  ;;  %v3100_v63 = vsel %vm2989_vm9, %v3095_v50, %v3087_v57  ;;  %v5476_v39 = vpack.c.bf16 %v3397_v42, %v3396_v28  ;;  %v5448_v37 = vpack.c.bf16 %v3367_v58, %v3366_v32  ;;  %v3368_v44 = vld [vmem:[#allocation13 + $0x6e0] sm:$0xff]  ;;  %v3369_v60 = vld [vmem:[#allocation13 + $0x6e8] sm:$0xff]  ;;  %v3382_v57 = vld [vmem:[#allocation13 + $0x750] sm:$0xff] }
 0x5b3   :  { %5431 = vmatpush3.bf16.msra.mxu0 %v5430_v18  ;;  %3825 = vmatprep.mubr.f32.mxu1 %v3101_v2  ;;  %v3145_v38 = vsel %vm2989_vm9, %v3143_v14, %v3135_v33  ;;  %v3349_v18 = vld [vmem:[#allocation13 + $0x648] sm:$0xff]  ;;  %v5478_v55 = vpack.c.bf16 %v3381_v10, %v3380_v3  ;;  %v3383_v50 = vld [vmem:[#allocation13 + $0x758] sm:$0xff]  ;;  %v5450_v14 = vpack.c.bf16 %v3351_v31, %v3350_v30  ;;  %v3384_v33 = vld [vmem:[#allocation13 + $0x760] sm:$0xff]  ;;  %v5863_v42 = vmov 0.0|0.0  }
 0x5b4   :  { %3895 = vmatprep.mubr.f32.mxu0 %v3123_v49  ;;  %3826 = vmatmul.mubr.f32.vlgmr.msra.gmra.mrb[28].mxu1 %v3100_v63  ;;  %v5446_v19 = vpack.c.bf16 %v3349_v18, %v3348_v45  ;;  %v5452_v2 = vpack.c.bf16 %v3369_v60, %v3368_v44  ;;  %v5482_v20 = vpack.c.bf16 %v3383_v50, %v3382_v57  ;;  %v3371_v49 = vld [vmem:[#allocation13 + $0x6f8] sm:$0xff]  ;;  %v3975_v45 = vld [vmem:[%s6853_s7 + $0x18] sm:$0xff]  ;;  %v3977_v32 = vld [vmem:[%s6853_s7 + $0x28] sm:$0xff] }
 0x5b5   :  { %5463 = vmatpush3.bf16.msra.mxu1 %v5462_v26  ;;  %5433 = vmatprep.subr.bf16.mxu0 %v5432_v1  ;;  %v5474_v26 = vpack.c.bf16 %v3379_v59, %v3378_v23  ;;  %v3398_v1 = vld [vmem:[#allocation13 + $0x7d0] sm:$0xff]  ;;  %v5484_v63 = vpack.c.bf16 %v3401_v34, %v3400_v9  ;;  %v3403_v6 = vld [vmem:[#allocation13 + $0x7f8] sm:$0xff]  ;;  %v5456_v12 = vpack.c.bf16 %v3371_v49, %v3370_v40  ;;  %v3979_v3 = vld [vmem:[%s6853_s7 + $0x38] sm:$0xff]  ;;  %v6895_v40 = vmov 0.0  }
 0x5b6   :  { %3965 = vmatprep.mubr.f32.mxu1 %v3145_v38  ;;  %5465 = vmatprep.subr.bf16.mxu1 %v5464_v8  ;;  %v5480_v13 = vpack.c.bf16 %v3399_v41, %v3398_v1  ;;  %v3353_v8 = vld [vmem:[#allocation13 + $0x668] sm:$0xff]  ;;  %v3354_v38 = vld [vmem:[#allocation13 + $0x670] sm:$0xff]  ;;  %v5486_v36 = vpack.c.bf16 %v3385_v48, %v3384_v33  ;;  %v3117_v17 = vrot.slane %v6745_v53, %v6890_v16  ;;  %v4110_v53 = vld [vmem:[#allocation15] ss:$0 sm:$0xff] }
 0x5b7   :  { %5435 = vmatpush3.bf16.msra.mxu0 %v5434_v27  ;;  %v3352_v27 = vld [vmem:[#allocation13 + $0x660] sm:$0xff]  ;;  %v3109_v61 = vrot.slane %v6748_v29, %v6890_v16  ;;  %v3131_v11 = vrot.slane %v6755_v56, %v6890_v16  ;;  %v3974_v56 = vld [vmem:[%s6853_s7 + $0x10] sm:$0xff]  ;;  %v3981_v1 = vld [vmem:[%s6853_s7 + $0x48] sm:$0xff] }
 0x5b8   :  { %5437 = vmatprep.subr.bf16.mxu0 %v5436_v24  ;;  %v5454_v46 = vpack.c.bf16 %v3353_v8, %v3352_v27  ;;  %v3402_v24 = vld [vmem:[#allocation13 + $0x7f0] sm:$0xff]  ;;  %v5496_v18 = vpack.c.bf16 %v3975_v45, %v3974_v56  ;;  %v3983_v30 = vld [vmem:[%s6853_s7 + $0x58] sm:$0xff]  ;;  %v3984_v34 = vld [vmem:[%s6853_s7 + $0x60] sm:$0xff] }
 0x5b9   :  { %5467 = vmatpush3.bf16.msra.mxu1 %v5466_v52  ;;  %v3355_v52 = vld [vmem:[#allocation13 + $0x678] sm:$0xff]  ;;  %v5488_v51 = vpack.c.bf16 %v3403_v6, %v3402_v24  ;;  %v3122_v21 = vsel %vm2989_vm9, %v3117_v17, %v3109_v61 }
 0x5ba   :  { %5469 = vmatprep.subr.bf16.mxu1 %v5468_v25  ;;  %v3386_v25 = vld [vmem:[#allocation13 + $0x770] sm:$0xff]  ;;  %v5458_v7 = vpack.c.bf16 %v3355_v52, %v3354_v38  ;;  %v3986_v27 = vld [vmem:[%s6853_s7 + $0x70] sm:$0xff] }
 0x5bb   :  { %5439 = vmatpush3.bf16.msra.mxu0 %v5438_v43  ;;  %v5490_v43 = vpack.c.bf16 %v3387_v62, %v3386_v25 }
 0x5bc   :  { %5441 = vmatprep.subr.bf16.mxu0 %v5440_v15  ;;  %v3139_v15 = vrot.slane %v6757_v35, %v6890_v16  ;;  %v3972_v35 = vld [vmem:[%s6853_s7] sm:$0xff]  ;;  %v3973_v16 = vld [vmem:[%s6853_s7 + $0x8] sm:$0xff] }
 0x5bd   :  { %5471 = vmatpush3.bf16.msra.mxu1 %v5470_v54 }
 0x5be   :  { %5473 = vmatprep.subr.bf16.mxu1 %v5472_v22  ;;  %v3144_v54 = vsel %vm2989_vm9, %v3139_v15, %v3131_v11  ;;  %v4111_v15 = vld [vmem:[#allocation16] ss:$0 sm:$0xff] }
 0x5bf   :  { %5443 = vmatpush3.bf16.msra.mxu0 %v5442_v5 }
 0x5c0   :  { %5445 = vmatprep.subr.bf16.mxu0 %v5444_v4  ;;  %v5493_v4 = vpack.c.bf16 %v3973_v16, %v3972_v35 }
 0x5c1   :  { %5475 = vmatpush3.bf16.msra.mxu1 %v5474_v26  ;;  %v3976_v26 = vld [vmem:[%s6853_s7 + $0x20] sm:$0xff] }
 0x5c2   :  { %5477 = vmatprep.subr.bf16.mxu1 %v5476_v39  ;;  %v5499_v58 = vpack.c.bf16 %v3977_v32, %v3976_v26  ;;  %v3978_v39 = vld [vmem:[%s6853_s7 + $0x30] sm:$0xff] }
 0x5c3   :  { %5447 = vmatpush3.bf16.msra.mxu0 %v5446_v19  ;;  %v5502_v10 = vpack.c.bf16 %v3979_v3, %v3978_v39  ;;  %v3980_v19 = vld [vmem:[%s6853_s7 + $0x40] sm:$0xff] }
 0x5c4   :  { %5449 = vmatprep.subr.bf16.mxu0 %v5448_v37  ;;  %v5505_v41 = vpack.c.bf16 %v3981_v1, %v3980_v19  ;;  %v3982_v37 = vld [vmem:[%s6853_s7 + $0x50] sm:$0xff] }
 0x5c5   :  { %5479 = vmatpush3.bf16.msra.mxu1 %v5478_v55  ;;  %v5508_v31 = vpack.c.bf16 %v3983_v30, %v3982_v37 }
 0x5c6   :  { %5481 = vmatprep.subr.bf16.mxu1 %v5480_v13 }
 0x5c7   :  { %5451 = vmatpush3.bf16.msra.mxu0 %v5450_v14 }
 0x5c8   :  { %5453 = vmatprep.subr.bf16.mxu0 %v5452_v2  ;;  %v3985_v2 = vld [vmem:[%s6853_s7 + $0x68] sm:$0xff] }
 0x5c9   :  { %5483 = vmatpush3.bf16.msra.mxu1 %v5482_v20  ;;  %v5511_v8 = vpack.c.bf16 %v3985_v2, %v3984_v34  ;;  %v3987_v20 = vld [vmem:[%s6853_s7 + $0x78] sm:$0xff]  ;;  %s5865_s7 = smov [#allocation18]  }
 0x5ca   :  { %5485 = vmatprep.subr.bf16.mxu1 %v5484_v63  ;;  %v5514_v49 = vpack.c.bf16 %v3987_v20, %v3986_v27  ;;  %s4073_s21 = sshll.u32 %s5865_s7, 4  ;;  %s4074_s21 = int_to_ptr.vmem [resolvable:$true] %s4073_s21 }
 0x5cb   :  { %5455 = vmatpush3.bf16.msra.mxu0 %v5454_v46  ;;  %s5812_s23 = scalar_lea.vmem %s4074_s21, 32  ;;  %p5817_p9 = scmp.lt.s32.totalorder %s4074_s21, %s4074_s21 }
 0x5cc   :  { %5457 = vmatprep.subr.bf16.mxu0 %v5456_v12  ;;  %p5813_p8 = scmp.ne.s32.totalorder %s4074_s21, %s5812_s23  ;;  %p5818_p10 = scmp.lt.s32.totalorder %s5812_s23, %s5812_s23 }
 0x5cd   :  { %5487 = vmatpush3.bf16.msra.mxu1 %v5486_v36 }
 0x5ce   :  { %5489 = vmatprep.subr.bf16.mxu1 %v5488_v51  ;;  %p5819_p11 = por %p5818_p10, %p5817_p9 }
 0x5cf   :  { %5459 = vmatpush3.bf16.msra.mxu0 %v5458_v7 }
 0x5d0   :  { %5492 = vmatprep.subr.bf16.mxu0 %v5863_v42  ;;  %p5820_p12 = pnand %p5819_p11, %p5813_p8 }
 0x5d1   :  { %5491 = vmatpush3.bf16.msra.mxu1 %v5490_v43 }
 0x5d2   :  { %3896 = vmatmul.mubr.f32.vlgmr.msra.gmra.mrb[14].mxu0 %v3122_v21 }
 0x5d3   :  { %5494 = vmatpush3.bf16.msra.mxu0 %v5493_v4  ;;  %4441 = vmatprep.mubr.msk.f32.mxu0 %vm5864_vm10, %v6895_v40 }
 0x5d4   :  { %3966 = vmatmul.mubr.f32.vlgmr.msra.gmra.mrb[30].mxu1 %v3144_v54  ;;  %5495 = vmatprep.subr.bf16.mxu0 %v5863_v42 }
 0x5d7   :  { %5497 = vmatpush3.bf16.msra.mxu0 %v5496_v18 }
 0x5d8   :  { %5498 = vmatprep.subr.bf16.mxu0 %v5863_v42 }
 0x5db   :  { %5500 = vmatpush3.bf16.msra.mxu0 %v5499_v58 }
 0x5dc   :  { %5501 = vmatprep.subr.bf16.mxu0 %v5863_v42 }
 0x5df   :  { %5503 = vmatpush3.bf16.msra.mxu0 %v5502_v10 }
 0x5e0   :  { %5504 = vmatprep.subr.bf16.mxu0 %v5863_v42 }
 0x5e3   :  { %5506 = vmatpush3.bf16.msra.mxu0 %v5505_v41 }
 0x5e4   :  { %5507 = vmatprep.subr.bf16.mxu0 %v5863_v42 }
 0x5e7   :  { %5509 = vmatpush3.bf16.msra.mxu0 %v5508_v31 }
 0x5e8   :  { %5510 = vmatprep.subr.bf16.mxu0 %v5863_v42 }
 0x5eb   :  { %5512 = vmatpush3.bf16.msra.mxu0 %v5511_v8 }
 0x5ec   :  { %5513 = vmatprep.subr.bf16.mxu0 %v5863_v42 }
 0x5ef   :  { %5515 = vmatpush3.bf16.msra.mxu0 %v5514_v49 }
 0x604   :  { %v4144_v0 = vpop.f32.mrb[8].mxu0 }
 0x605   :  { %v4145_v47 = vpop.f32.mrb[9].mxu0 }
 0x606   :  { %v4146_v22 = vadd.f32 %v4145_v47, %v4144_v0 }
 0x607   :  { %v4179_v23 = vpop.f32.mrb[24].mxu1 }
 0x608   :  { %v3478_v59 = vadd.f32 %v4146_v22, %v4110_v53  ;;  %v4180_v29 = vpop.f32.mrb[25].mxu1 }
 0x609   :  { %v4181_v5 = vadd.f32 %v4180_v29, %v4179_v23 }
 0x60b   :  { %v3548_v28 = vadd.f32 %v4181_v5, %v3478_v59 }
 0x624   :  { %v4214_v55 = vpop.f32.mrb[10].mxu0 }
 0x625   :  { %v4215_v44 = vpop.f32.mrb[11].mxu0 }
 0x626   :  { %v4216_v60 = vadd.f32 %v4215_v44, %v4214_v55 }
 0x627   :  { %v4249_v13 = vpop.f32.mrb[26].mxu1 }
 0x628   :  { %v3618_v57 = vadd.f32 %v4216_v60, %v3548_v28  ;;  %v4250_v50 = vpop.f32.mrb[27].mxu1 }
 0x629   :  { %v4251_v14 = vadd.f32 %v4250_v50, %v4249_v13 }
 0x62b   :  { %v3688_v9 = vadd.f32 %v4251_v14, %v3618_v57 }
 0x685   :  { %v4284_v63 = vpop.f32.mrb[12].mxu0 }
 0x686   :  { %v4285_v33 = vpop.f32.mrb[13].mxu0 }
 0x687   :  { %v4286_v48 = vadd.f32 %v4285_v33, %v4284_v63  ;;  %v4319_v46 = vpop.f32.mrb[28].mxu1 }
 0x688   :  { %v4320_v24 = vpop.f32.mrb[29].mxu1 }
 0x689   :  { %v3758_v6 = vadd.f32 %v4286_v48, %v3688_v9  ;;  %v4321_v12 = vadd.f32 %v4320_v24, %v4319_v46 }
 0x68b   :  { %v3828_v38 = vadd.f32 %v4321_v12, %v3758_v6 }
 0x6a5   :  { %v4354_v52 = vpop.f32.mrb[14].mxu0 }
 0x6a6   :  { %v4355_v36 = vpop.f32.mrb[15].mxu0 }
 0x6a7   :  { %v4356_v51 = vadd.f32 %v4355_v36, %v4354_v52  ;;  %v4389_v25 = vpop.f32.mrb[30].mxu1 }
 0x6a8   :  { %v4390_v62 = vpop.f32.mrb[31].mxu1 }
 0x6a9   :  { %v3898_v7 = vadd.f32 %v4356_v51, %v3828_v38  ;;  %v4391_v43 = vadd.f32 %v4390_v62, %v4389_v25 }
 0x6ab   :  { %v3968_v17 = vadd.f32 %v4391_v43, %v3898_v7 }
 0x6ad   :  { %v3971_v61 = vmax.f32 %v3968_v17, 0.0 }
 0x6af   :  { %4442 = vmatmul.mubr.f32.vlgmr.msra.gmra.mrb[16].mxu0 %v3971_v61 }
 0x782   :  { %v4061_v21 = vpop.f32.mrb[16].mxu0 }
 0x783   :  { %v4062_v11 = vadd.f32 %v4111_v15, %v4061_v21  ;;  %v4443_v54 = vpop.f32.mrb[17].mxu0 }
 0x785   :  { %4066 = vst.msk [vmem:[#allocation18] sm:$0x3] %vm4065_vm11, %v4062_v11 }
 0x786   :  { %5823 = shalt.err (!%p5820_p12)
}
 0x787   :  { %s5824_s3 = scalar_lea.hbm %s6855_s9, 32 }
 0x788   :  { %p5825_p13 = scmp.ne.s32.totalorder %s6855_s9, %s5824_s3  ;;  %p5828_p0 = scmp.lt.u32.totalorder %s5824_s3, %s6855_s9 }
 0x78a   :  { %p5830_p1 = pnand %p5828_p0, %p5825_p13 }
 0x78c   :  { %5833 = shalt.err (!%p5830_p1)
}
 0x78d   :  { %4076 = dma.vmem_to_hbm [thread:$0]  %s4074_s21, 32, %s6855_s9, [#allocation6]  }
 0x78e   :  { %5844 = dma.done.wait [#allocation6], 32  }
 0x78f   :  { %5845 = vsyncadd [#allocation6], 4294967264 }
 0x790   :  { %4080 = vsyncpa [#allocation5], 1 }
 0x791   :  { %4081 = vsyncpa [#allocation8], 1 }
 0x792   :  { %4082 = vsyncpa [#allocation11], 1 }
 0x793   :  { %4083 = vsyncpa [#allocation14], 1 }
 0x794   :  { %4084 = vsyncpa [#allocation17], 1 }
 0x795   :  { %4085 = vsyncpa [#allocation6], 1 }

</bundles_post_ra>
